<compile_context>
chip_gen: v7x
topology: tpu7x:2x2x1
jax: 0.10.0
libtpu: 0.0.40
codegen_flags: <defaults>
</compile_context>

<pallas_src>
import jax
import jax.numpy as jnp
from jax import lax
from jax.experimental import pallas as pl
from jax.experimental.pallas import tpu as pltpu

LANE = 128
SUBLANE = 8


def _round_up(x, m):
    return ((x + m - 1) // m) * m


# ----------------------------------------------------------------------------- kernel


def _make_mlp_kernel(num_layers):
    """Pallas kernel: full forward pass for `num_layers` Linear layers
    (ReLU + eval-mode dropout after every layer except the last) + log_softmax."""

    def kernel(*refs):
        # refs = [x, w1, b1, w2, b2, ..., w_out, b_out, out]
        x_ref = refs[0]
        out_ref = refs[-1]
        param_refs = refs[1:-1]

        # x arrives f32 straight from HBM; cast to bf16 in-kernel for the MXU.
        h = x_ref[...].astype(jnp.bfloat16)          # (tb, K0)
        logits = None
        for li in range(num_layers):
            w_ref = param_refs[2 * li]               # bf16 (K, out_pad)  -- pre-transposed
            b_ref = param_refs[2 * li + 1]           # f32  (1, out_pad)
            z = jnp.dot(h, w_ref[...],
                        preferred_element_type=jnp.float32) + b_ref[...]
            if li < num_layers - 1:
                # Hidden layer: ReLU (+ dropout == identity in eval mode).
                h = jnp.maximum(z, 0.0).astype(jnp.bfloat16)
            else:
                logits = z

        # log_softmax along dim=1 (numerically stable).  Padded logit columns carry a
        # -1e30 bias, so exp(shifted) there is exactly 0 and the reduction is exact.
        m = jnp.max(logits, axis=1, keepdims=True)
        shifted = logits - m
        lse = jnp.log(jnp.sum(jnp.exp(shifted), axis=1, keepdims=True))
        out_ref[...] = (shifted - lse).astype(out_ref.dtype)

    return kernel


# --------------------------------------------------------------------------- packing


def pack_params(params):
    """One-time packing (outside the hot path).

    Each torch-layout (out, in) weight is transposed to (K, N) = (in, out_pad) and
    zero-padded: N to the 128-lane multiple, K to the lane-padded width of the
    activations entering that layer (so no in-kernel padding/transpose is needed).
    Padded hidden biases are 0 (exact under ReLU + zero weight columns); padded
    output biases are -1e30 so log_softmax ignores those columns."""
    packed = []
    num = len(params)
    k_width = int(params[0][0].shape[1])   # width of activations entering layer 0 (unpadded)
    for idx, (W, b) in enumerate(params):
        W = jnp.asarray(W, jnp.float32)
        b = jnp.asarray(b, jnp.float32)
        out_dim, in_dim = W.shape
        out_p = _round_up(out_dim, LANE)
        # Pre-transposed (K, N) layout: feeds the MXU directly, no in-kernel transpose.
        Wt = jnp.zeros((k_width, out_p), jnp.float32).at[:in_dim, :out_dim].set(W.T)
        fill = -1e30 if idx == num - 1 else 0.0
        bp = jnp.full((1, out_p), fill, jnp.float32).at[0, :out_dim].set(b)
        packed.append((Wt.astype(jnp.bfloat16), bp))
        k_width = out_p                    # next layer sees the lane-padded activations
    return packed, int(params[0][0].shape[1]), int(params[-1][0].shape[0])


# --------------------------------------------------------------- generation awareness


def _num_tensorcores():
    """Best-effort TensorCore count for grid splitting (v7x = 2 TCs/chip)."""
    try:
        kind = jax.devices()[0].device_kind.lower()
    except Exception:
        return 1
    if "v7" in kind:
        return 2
    if ("v5e" in kind) or ("lite" in kind) or ("v6" in kind):
        return 1
    if ("v4" in kind) or ("v5p" in kind) or ("v5 p" in kind):
        return 2          # megacore also benefits from a parallel grid split
    return 1


def _vmem_limit_bytes():
    """Generation-aware scoped-VMEM limit with headroom (v7x has only 64 MiB/TC)."""
    try:
        cap = int(pltpu.get_tpu_info().vmem_capacity_bytes)
    except Exception:
        cap = 64 << 20
    return int(min(max(cap // 2, 16 << 20), 64 << 20))


def _pick_batch_tile(B, in_dim, packed, out_pad, block_rows=None):
    """Choose the batch tile:
      - v7x: ceil(B / 2 TCs) rounded to 8 sublanes (keep both cores busy).
      - v5e/v6e: one grid step for small B (no per-step overhead), <=1024-row tiles
        for large B (HBM-roofline sweet spot).
      - Always a multiple of 8 sublanes; capped by an explicit VMEM formula."""
    n_tc = _num_tensorcores()
    vmem_limit = _vmem_limit_bytes()

    if block_rows is None:
        tb = _round_up(pl.cdiv(B, n_tc), SUBLANE)
        tb = min(tb, 1024)
    else:
        tb = _round_up(min(block_rows, B), SUBLANE)

    # Explicit VMEM cap: double-buffered f32 x tile + double-buffered f32 out tile
    # + f32/bf16 intermediates per row, plus the resident (single-buffered) params.
    param_bytes = sum(int(w.size) * 2 + int(b.size) * 4 for w, b in packed)
    widths = [in_dim] + [int(w.shape[1]) for w, _ in packed]
    per_row = 2 * in_dim * 4 + 2 * out_pad * 4 + 6 * sum(widths)
    budget = vmem_limit - param_bytes - (2 << 20)          # 2 MiB headroom
    tb_cap = max(SUBLANE, (budget // per_row) // SUBLANE * SUBLANE)
    return max(SUBLANE, min(tb, tb_cap))


# --------------------------------------------------------------------------- wrapper


def network_forward(x, packed, in_dim, out_dim, *, block_rows=None):
    """x: (B, in_dim) float32. packed: output of pack_params.
    Returns log-probabilities of shape (B, out_dim)."""
    B = x.shape[0]
    out_pad = int(packed[-1][0].shape[1])
    num_layers = len(packed)

    tb = _pick_batch_tile(B, in_dim, packed, out_pad, block_rows)
    b_pad = _round_up(B, tb)

    # No wrapper-side repack/cast of x: pass it through as-is; pad rows only when
    # B is not a multiple of the batch tile (cheap, and a no-op for the common case).
    x_in = x if b_pad == B else jnp.pad(x, ((0, b_pad - B), (0, 0)))

    flat_params = []
    for (Wp, bp) in packed:
        flat_params += [Wp, bp]

    # Advisory cost estimate for XLA scheduling.
    flops = 2 * b_pad * sum(int(w.shape[0]) * int(w.shape[1]) for w, _ in packed)
    bytes_accessed = (b_pad * in_dim * 4
                      + sum(int(w.size) * 2 + int(bb.size) * 4 for w, bb in packed)
                      + b_pad * out_pad * 4)
    cost = pl.CostEstimate(flops=flops,
                           transcendentals=b_pad * (out_pad + 1),
                           bytes_accessed=bytes_accessed)

    vmem_limit = _vmem_limit_bytes()

    def _run(single_buffer_weights):
        if single_buffer_weights:
            # Constant index maps -> the data never changes across grid steps, so a
            # single resident VMEM buffer suffices (frees budget for bigger tiles).
            def const_spec(shape):
                return pl.BlockSpec(shape, lambda i: (0, 0),
                                    pipeline_mode=pl.Buffered(1))
        else:
            def const_spec(shape):
                return pl.BlockSpec(shape, lambda i: (0, 0))

        in_specs = [pl.BlockSpec((tb, in_dim), lambda i: (i, 0))]
        for (Wp, bp) in packed:
            in_specs.append(const_spec(Wp.shape))
            in_specs.append(const_spec(bp.shape))
        out_specs = pl.BlockSpec((tb, out_pad), lambda i: (i, 0))

        return pl.pallas_call(
            _make_mlp_kernel(num_layers),
            out_shape=jax.ShapeDtypeStruct((b_pad, out_pad), jnp.float32),
            grid=(b_pad // tb,),
            in_specs=in_specs,
            out_specs=out_specs,
            compiler_params=pltpu.CompilerParams(
                dimension_semantics=("parallel",),
                vmem_limit_bytes=vmem_limit,
            ),
            cost_estimate=cost,
        )(x_in, *flat_params)

    try:
        out_padded = _run(True)
    except Exception:
        # Fallback for JAX versions where pipeline_mode=pl.Buffered(1) is unsupported.
        out_padded = _run(False)

    return out_padded[:B, :out_dim]


# ------------------------------------------------------------------------------ init


def init_params(key, input_size, output_size, hidden_layers):
    """Deterministic init mirroring torch.nn.Linear defaults:
    U(-1/sqrt(fan_in), 1/sqrt(fan_in)) for both W and b.  Torch (out, in) layout."""
    sizes = [input_size] + list(hidden_layers) + [output_size]
    params = []
    for fan_in, fan_out in zip(sizes[:-1], sizes[1:]):
        key, kw, kb = jax.random.split(key, 3)
        bound = 1.0 / jnp.sqrt(jnp.float32(fan_in))
        W = jax.random.uniform(kw, (fan_out, fan_in), jnp.float32, -bound, bound)
        b = jax.random.uniform(kb, (fan_out,), jnp.float32, -bound, bound)
        params.append((W, b))
    return params


if __name__ == "__main__":
    input_size = 784
    output_size = 10
    hidden_layers = [128, 64]
    batch = 256     # single grid step on v5e/v6e; grid=(2,) split across TCs on v7x

    key = jax.random.PRNGKey(0)
    key, kx = jax.random.split(key)
    x = jax.random.normal(kx, (batch, input_size), jnp.float32)

    params = init_params(key, input_size, output_size, hidden_layers)
    packed, in_dim, out_dim = pack_params(params)   # one-time packing, outside hot path

    out = network_forward(x, packed, in_dim, out_dim)
    out = jax.block_until_ready(out)
    assert out.shape == (batch, output_size)

    # Reference 1: identical bf16-matmul / f32-accumulation math in plain JAX.
    dn = (((1,), (1,)), ((), ()))
    h = x.astype(jnp.bfloat16)
    for (W, b) in params[:-1]:
        z = lax.dot_general(h, W.astype(jnp.bfloat16), dn,
                            preferred_element_type=jnp.float32) + b
        h = jnp.maximum(z, 0.0).astype(jnp.bfloat16)
    logits = lax.dot_general(h, params[-1][0].astype(jnp.bfloat16), dn,
                             preferred_element_type=jnp.float32) + params[-1][1]
    ref_bf16 = jax.nn.log_softmax(logits, axis=1)
    assert jnp.allclose(out, ref_bf16, atol=2e-3, rtol=2e-3), \
        float(jnp.max(jnp.abs(out - ref_bf16)))

    # Reference 2: full-f32 torch-equivalent forward (looser tol: bf16 matmul inputs
    # are the accepted precision contract of this kernel).
    hf = x
    for (W, b) in params[:-1]:
        hf = jnp.maximum(hf @ W.T + b, 0.0)
    logits_f = hf @ params[-1][0].T + params[-1][1]
    ref_f32 = jax.nn.log_softmax(logits_f, axis=1)
    assert jnp.allclose(out, ref_f32, atol=5e-2, rtol=5e-2), \
        float(jnp.max(jnp.abs(out - ref_f32)))

    print("KERNEL_OK")
</pallas_src>

<mosaic_0001>
module attributes {stable_mosaic.version = 11 : i64} {
  func.func @kernel(%arg0: i32, %arg1: memref<256x784xf32, #tpu.memory_space<vmem>>, %arg2: memref<784x128xbf16, #tpu.memory_space<vmem>>, %arg3: memref<1x128xf32, #tpu.memory_space<vmem>>, %arg4: memref<128x128xbf16, #tpu.memory_space<vmem>>, %arg5: memref<1x128xf32, #tpu.memory_space<vmem>>, %arg6: memref<128x128xbf16, #tpu.memory_space<vmem>>, %arg7: memref<1x128xf32, #tpu.memory_space<vmem>>, %arg8: memref<256x128xf32, #tpu.memory_space<vmem>>) attributes {dimension_semantics = [#tpu.dimension_semantics<parallel>], iteration_bounds = array<i64: 1>, scalar_prefetch = 0 : i64, scratch_operands = 0 : i64, tpu.core_type = #tpu.core_type<tc>, window_params = [{transform_indices = @transform_0, window_bounds = array<i64: 256, 784>}, {pipeline_mode = #tpu.pipeline_mode<synchronous>, transform_indices = @transform_1, window_bounds = array<i64: 784, 128>}, {pipeline_mode = #tpu.pipeline_mode<synchronous>, transform_indices = @transform_2, window_bounds = array<i64: 1, 128>}, {pipeline_mode = #tpu.pipeline_mode<synchronous>, transform_indices = @transform_3, window_bounds = array<i64: 128, 128>}, {pipeline_mode = #tpu.pipeline_mode<synchronous>, transform_indices = @transform_4, window_bounds = array<i64: 1, 128>}, {pipeline_mode = #tpu.pipeline_mode<synchronous>, transform_indices = @transform_5, window_bounds = array<i64: 128, 128>}, {pipeline_mode = #tpu.pipeline_mode<synchronous>, transform_indices = @transform_6, window_bounds = array<i64: 1, 128>}, {transform_indices = @transform_7, window_bounds = array<i64: 256, 128>}]} {
    %c0 = arith.constant 0 : index
    %c0_0 = arith.constant 0 : index
    %0 = vector.load %arg1[%c0, %c0_0] : memref<256x784xf32, #tpu.memory_space<vmem>>, vector<256x784xf32>
    %1 = arith.truncf %0 : vector<256x784xf32> to vector<256x784xbf16>
    %c0_1 = arith.constant 0 : index
    %c0_2 = arith.constant 0 : index
    %2 = vector.load %arg2[%c0_1, %c0_2] : memref<784x128xbf16, #tpu.memory_space<vmem>>, vector<784x128xbf16>
    %cst = arith.constant dense<0.000000e+00> : vector<256x128xf32>
    %3 = tpu.matmul %1, %2, %cst {dimension_numbers = #tpu.dot_dimension_numbers<[1], [0], [0], [1], [0, 0, 1, 1], [], []>} : vector<256x784xbf16>, vector<784x128xbf16>, vector<256x128xf32> -> vector<256x128xf32>
    %c0_3 = arith.constant 0 : index
    %c0_4 = arith.constant 0 : index
    %4 = vector.load %arg3[%c0_3, %c0_4] : memref<1x128xf32, #tpu.memory_space<vmem>>, vector<1x128xf32>
    %5 = vector.broadcast %4 : vector<1x128xf32> to vector<256x128xf32>
    %6 = arith.addf %3, %5 : vector<256x128xf32>
    %cst_5 = arith.constant 0.000000e+00 : f32
    %7 = vector.broadcast %cst_5 : f32 to vector<256x128xf32>
    %8 = arith.maximumf %6, %7 : vector<256x128xf32>
    %9 = arith.truncf %8 : vector<256x128xf32> to vector<256x128xbf16>
    %c0_6 = arith.constant 0 : index
    %c0_7 = arith.constant 0 : index
    %10 = vector.load %arg4[%c0_6, %c0_7] : memref<128x128xbf16, #tpu.memory_space<vmem>>, vector<128x128xbf16>
    %cst_8 = arith.constant dense<0.000000e+00> : vector<256x128xf32>
    %11 = tpu.matmul %9, %10, %cst_8 {dimension_numbers = #tpu.dot_dimension_numbers<[1], [0], [0], [1], [0, 0, 1, 1], [], []>} : vector<256x128xbf16>, vector<128x128xbf16>, vector<256x128xf32> -> vector<256x128xf32>
    %c0_9 = arith.constant 0 : index
    %c0_10 = arith.constant 0 : index
    %12 = vector.load %arg5[%c0_9, %c0_10] : memref<1x128xf32, #tpu.memory_space<vmem>>, vector<1x128xf32>
    %13 = vector.broadcast %12 : vector<1x128xf32> to vector<256x128xf32>
    %14 = arith.addf %11, %13 : vector<256x128xf32>
    %cst_11 = arith.constant 0.000000e+00 : f32
    %15 = vector.broadcast %cst_11 : f32 to vector<256x128xf32>
    %16 = arith.maximumf %14, %15 : vector<256x128xf32>
    %17 = arith.truncf %16 : vector<256x128xf32> to vector<256x128xbf16>
    %c0_12 = arith.constant 0 : index
    %c0_13 = arith.constant 0 : index
    %18 = vector.load %arg6[%c0_12, %c0_13] : memref<128x128xbf16, #tpu.memory_space<vmem>>, vector<128x128xbf16>
    %cst_14 = arith.constant dense<0.000000e+00> : vector<256x128xf32>
    %19 = tpu.matmul %17, %18, %cst_14 {dimension_numbers = #tpu.dot_dimension_numbers<[1], [0], [0], [1], [0, 0, 1, 1], [], []>} : vector<256x128xbf16>, vector<128x128xbf16>, vector<256x128xf32> -> vector<256x128xf32>
    %c0_15 = arith.constant 0 : index
    %c0_16 = arith.constant 0 : index
    %20 = vector.load %arg7[%c0_15, %c0_16] : memref<1x128xf32, #tpu.memory_space<vmem>>, vector<1x128xf32>
    %21 = vector.broadcast %20 : vector<1x128xf32> to vector<256x128xf32>
    %22 = arith.addf %19, %21 : vector<256x128xf32>
    %cst_17 = arith.constant dense<0xFF800000> : vector<256xf32>
    %23 = vector.multi_reduction <maximumf>, %22, %cst_17 [1] : vector<256x128xf32> to vector<256xf32>
    %24 = vector.shape_cast %23 : vector<256xf32> to vector<256x1xf32>
    %25 = vector.broadcast %24 : vector<256x1xf32> to vector<256x128xf32>
    %26 = arith.subf %22, %25 : vector<256x128xf32>
    %27 = math.exp %26 : vector<256x128xf32>
    %cst_18 = arith.constant dense<0.000000e+00> : vector<256xf32>
    %28 = vector.multi_reduction <add>, %27, %cst_18 [1] : vector<256x128xf32> to vector<256xf32>
    %29 = vector.shape_cast %28 : vector<256xf32> to vector<256x1xf32>
    %30 = math.log %29 : vector<256x1xf32>
    %31 = vector.broadcast %30 : vector<256x1xf32> to vector<256x128xf32>
    %32 = arith.subf %26, %31 : vector<256x128xf32>
    %c0_19 = arith.constant 0 : index
    %c0_20 = arith.constant 0 : index
    %33 = vector.load %arg8[%c0_19, %c0_20] : memref<256x128xf32, #tpu.memory_space<vmem>>, vector<256x128xf32>
    tpu.vector_store %arg8[%c0_19, %c0_20], %32 {strides = array<i32>} : memref<256x128xf32, #tpu.memory_space<vmem>>, vector<256x128xf32>,
    return
  }
  func.func @transform_0(%arg0: i32) -> (i32, i32) {
    %c0_i32 = arith.constant 0 : i32
    %c0_i32_0 = arith.constant 0 : i32
    return %arg0, %c0_i32 : i32, i32
  }
  func.func @transform_1(%arg0: i32) -> (i32, i32) {
    %c0_i32 = arith.constant 0 : i32
    %c0_i32_0 = arith.constant 0 : i32
    %c0_i32_1 = arith.constant 0 : i32
    return %c0_i32, %c0_i32_0 : i32, i32
  }
  func.func @transform_2(%arg0: i32) -> (i32, i32) {
    %c0_i32 = arith.constant 0 : i32
    %c0_i32_0 = arith.constant 0 : i32
    %c0_i32_1 = arith.constant 0 : i32
    return %c0_i32, %c0_i32_0 : i32, i32
  }
  func.func @transform_3(%arg0: i32) -> (i32, i32) {
    %c0_i32 = arith.constant 0 : i32
    %c0_i32_0 = arith.constant 0 : i32
    %c0_i32_1 = arith.constant 0 : i32
    return %c0_i32, %c0_i32_0 : i32, i32
  }
  func.func @transform_4(%arg0: i32) -> (i32, i32) {
    %c0_i32 = arith.constant 0 : i32
    %c0_i32_0 = arith.constant 0 : i32
    %c0_i32_1 = arith.constant 0 : i32
    return %c0_i32, %c0_i32_0 : i32, i32
  }
  func.func @transform_5(%arg0: i32) -> (i32, i32) {
    %c0_i32 = arith.constant 0 : i32
    %c0_i32_0 = arith.constant 0 : i32
    %c0_i32_1 = arith.constant 0 : i32
    return %c0_i32, %c0_i32_0 : i32, i32
  }
  func.func @transform_6(%arg0: i32) -> (i32, i32) {
    %c0_i32 = arith.constant 0 : i32
    %c0_i32_0 = arith.constant 0 : i32
    %c0_i32_1 = arith.constant 0 : i32
    return %c0_i32, %c0_i32_0 : i32, i32
  }
  func.func @transform_7(%arg0: i32) -> (i32, i32) {
    %c0_i32 = arith.constant 0 : i32
    %c0_i32_0 = arith.constant 0 : i32
    return %arg0, %c0_i32 : i32, i32
  }
}

module attributes {stable_mosaic.version = 11 : i64} {
  func.func @kernel(%arg0: i32, %arg1: memref<256x784xf32, #tpu.memory_space<vmem>>, %arg2: memref<784x128xbf16, #tpu.memory_space<vmem>>, %arg3: memref<1x128xf32, #tpu.memory_space<vmem>>, %arg4: memref<128x128xbf16, #tpu.memory_space<vmem>>, %arg5: memref<1x128xf32, #tpu.memory_space<vmem>>, %arg6: memref<128x128xbf16, #tpu.memory_space<vmem>>, %arg7: memref<1x128xf32, #tpu.memory_space<vmem>>, %arg8: memref<256x128xf32, #tpu.memory_space<vmem>>) attributes {dimension_semantics = [#tpu.dimension_semantics<parallel>], iteration_bounds = array<i64: 1>, scalar_prefetch = 0 : i64, scratch_operands = 0 : i64, tpu.core_type = #tpu.core_type<tc>, window_params = [{transform_indices = @transform_0, window_bounds = array<i64: 256, 784>}, {pipeline_mode = #tpu.pipeline_mode<synchronous>, transform_indices = @transform_1, window_bounds = array<i64: 784, 128>}, {pipeline_mode = #tpu.pipeline_mode<synchronous>, transform_indices = @transform_2, window_bounds = array<i64: 1, 128>}, {pipeline_mode = #tpu.pipeline_mode<synchronous>, transform_indices = @transform_3, window_bounds = array<i64: 128, 128>}, {pipeline_mode = #tpu.pipeline_mode<synchronous>, transform_indices = @transform_4, window_bounds = array<i64: 1, 128>}, {pipeline_mode = #tpu.pipeline_mode<synchronous>, transform_indices = @transform_5, window_bounds = array<i64: 128, 128>}, {pipeline_mode = #tpu.pipeline_mode<synchronous>, transform_indices = @transform_6, window_bounds = array<i64: 1, 128>}, {transform_indices = @transform_7, window_bounds = array<i64: 256, 128>}]} {
    %c0 = arith.constant 0 : index
    %c0_0 = arith.constant 0 : index
    %0 = vector.load %arg1[%c0, %c0_0] : memref<256x784xf32, #tpu.memory_space<vmem>>, vector<256x784xf32>
    %1 = arith.truncf %0 : vector<256x784xf32> to vector<256x784xbf16>
    %c0_1 = arith.constant 0 : index
    %c0_2 = arith.constant 0 : index
    %2 = vector.load %arg2[%c0_1, %c0_2] : memref<784x128xbf16, #tpu.memory_space<vmem>>, vector<784x128xbf16>
    %cst = arith.constant dense<0.000000e+00> : vector<256x128xf32>
    %3 = tpu.matmul %1, %2, %cst {dimension_numbers = #tpu.dot_dimension_numbers<[1], [0], [0], [1], [0, 0, 1, 1], [], []>} : vector<256x784xbf16>, vector<784x128xbf16>, vector<256x128xf32> -> vector<256x128xf32>
    %c0_3 = arith.constant 0 : index
    %c0_4 = arith.constant 0 : index
    %4 = vector.load %arg3[%c0_3, %c0_4] : memref<1x128xf32, #tpu.memory_space<vmem>>, vector<1x128xf32>
    %5 = vector.broadcast %4 : vector<1x128xf32> to vector<256x128xf32>
    %6 = arith.addf %3, %5 : vector<256x128xf32>
    %cst_5 = arith.constant 0.000000e+00 : f32
    %7 = vector.broadcast %cst_5 : f32 to vector<256x128xf32>
    %8 = arith.maximumf %6, %7 : vector<256x128xf32>
    %9 = arith.truncf %8 : vector<256x128xf32> to vector<256x128xbf16>
    %c0_6 = arith.constant 0 : index
    %c0_7 = arith.constant 0 : index
    %10 = vector.load %arg4[%c0_6, %c0_7] : memref<128x128xbf16, #tpu.memory_space<vmem>>, vector<128x128xbf16>
    %cst_8 = arith.constant dense<0.000000e+00> : vector<256x128xf32>
    %11 = tpu.matmul %9, %10, %cst_8 {dimension_numbers = #tpu.dot_dimension_numbers<[1], [0], [0], [1], [0, 0, 1, 1], [], []>} : vector<256x128xbf16>, vector<128x128xbf16>, vector<256x128xf32> -> vector<256x128xf32>
    %c0_9 = arith.constant 0 : index
    %c0_10 = arith.constant 0 : index
    %12 = vector.load %arg5[%c0_9, %c0_10] : memref<1x128xf32, #tpu.memory_space<vmem>>, vector<1x128xf32>
    %13 = vector.broadcast %12 : vector<1x128xf32> to vector<256x128xf32>
    %14 = arith.addf %11, %13 : vector<256x128xf32>
    %cst_11 = arith.constant 0.000000e+00 : f32
    %15 = vector.broadcast %cst_11 : f32 to vector<256x128xf32>
    %16 = arith.maximumf %14, %15 : vector<256x128xf32>
    %17 = arith.truncf %16 : vector<256x128xf32> to vector<256x128xbf16>
    %c0_12 = arith.constant 0 : index
    %c0_13 = arith.constant 0 : index
    %18 = vector.load %arg6[%c0_12, %c0_13] : memref<128x128xbf16, #tpu.memory_space<vmem>>, vector<128x128xbf16>
    %cst_14 = arith.constant dense<0.000000e+00> : vector<256x128xf32>
    %19 = tpu.matmul %17, %18, %cst_14 {dimension_numbers = #tpu.dot_dimension_numbers<[1], [0], [0], [1], [0, 0, 1, 1], [], []>} : vector<256x128xbf16>, vector<128x128xbf16>, vector<256x128xf32> -> vector<256x128xf32>
    %c0_15 = arith.constant 0 : index
    %c0_16 = arith.constant 0 : index
    %20 = vector.load %arg7[%c0_15, %c0_16] : memref<1x128xf32, #tpu.memory_space<vmem>>, vector<1x128xf32>
    %21 = vector.broadcast %20 : vector<1x128xf32> to vector<256x128xf32>
    %22 = arith.addf %19, %21 : vector<256x128xf32>
    %cst_17 = arith.constant dense<0xFF800000> : vector<256xf32>
    %23 = vector.multi_reduction <maximumf>, %22, %cst_17 [1] : vector<256x128xf32> to vector<256xf32>
    %24 = vector.shape_cast %23 : vector<256xf32> to vector<256x1xf32>
    %25 = vector.broadcast %24 : vector<256x1xf32> to vector<256x128xf32>
    %26 = arith.subf %22, %25 : vector<256x128xf32>
    %27 = math.exp %26 : vector<256x128xf32>
    %cst_18 = arith.constant dense<0.000000e+00> : vector<256xf32>
    %28 = vector.multi_reduction <add>, %27, %cst_18 [1] : vector<256x128xf32> to vector<256xf32>
    %29 = vector.shape_cast %28 : vector<256xf32> to vector<256x1xf32>
    %30 = math.log %29 : vector<256x1xf32>
    %31 = vector.broadcast %30 : vector<256x1xf32> to vector<256x128xf32>
    %32 = arith.subf %26, %31 : vector<256x128xf32>
    %c0_19 = arith.constant 0 : index
    %c0_20 = arith.constant 0 : index
    %33 = vector.load %arg8[%c0_19, %c0_20] : memref<256x128xf32, #tpu.memory_space<vmem>>, vector<256x128xf32>
    tpu.vector_store %arg8[%c0_19, %c0_20], %32 {strides = array<i32>} : memref<256x128xf32, #tpu.memory_space<vmem>>, vector<256x128xf32>,
    return
  }
  func.func @transform_0(%arg0: i32) -> (i32, i32) {
    %c0_i32 = arith.constant 0 : i32
    %c0_i32_0 = arith.constant 0 : i32
    return %arg0, %c0_i32 : i32, i32
  }
  func.func @transform_1(%arg0: i32) -> (i32, i32) {
    %c0_i32 = arith.constant 0 : i32
    %c0_i32_0 = arith.constant 0 : i32
    %c0_i32_1 = arith.constant 0 : i32
    return %c0_i32, %c0_i32_0 : i32, i32
  }
  func.func @transform_2(%arg0: i32) -> (i32, i32) {
    %c0_i32 = arith.constant 0 : i32
    %c0_i32_0 = arith.constant 0 : i32
    %c0_i32_1 = arith.constant 0 : i32
    return %c0_i32, %c0_i32_0 : i32, i32
  }
  func.func @transform_3(%arg0: i32) -> (i32, i32) {
    %c0_i32 = arith.constant 0 : i32
    %c0_i32_0 = arith.constant 0 : i32
    %c0_i32_1 = arith.constant 0 : i32
    return %c0_i32, %c0_i32_0 : i32, i32
  }
  func.func @transform_4(%arg0: i32) -> (i32, i32) {
    %c0_i32 = arith.constant 0 : i32
    %c0_i32_0 = arith.constant 0 : i32
    %c0_i32_1 = arith.constant 0 : i32
    return %c0_i32, %c0_i32_0 : i32, i32
  }
  func.func @transform_5(%arg0: i32) -> (i32, i32) {
    %c0_i32 = arith.constant 0 : i32
    %c0_i32_0 = arith.constant 0 : i32
    %c0_i32_1 = arith.constant 0 : i32
    return %c0_i32, %c0_i32_0 : i32, i32
  }
  func.func @transform_6(%arg0: i32) -> (i32, i32) {
    %c0_i32 = arith.constant 0 : i32
    %c0_i32_0 = arith.constant 0 : i32
    %c0_i32_1 = arith.constant 0 : i32
    return %c0_i32, %c0_i32_0 : i32, i32
  }
  func.func @transform_7(%arg0: i32) -> (i32, i32) {
    %c0_i32 = arith.constant 0 : i32
    %c0_i32_0 = arith.constant 0 : i32
    return %arg0, %c0_i32 : i32, i32
  }
}

</mosaic_0001>

<bundles_post_ra>
// kernel: tpu_custom_call.1
= control target key start
LH: loop header
LB: loop body
LE: loop exit
PB: predicated region body
PF: predicated region fallthrough
CT: control target
= control target key end

     0   :  { %s4777_s0 = inlined_call_operand.vmem [shape: f32[256,784], index: 0, kind: input, shape index: {}]   ;;  %s4778_s1 = inlined_call_operand.vmem [shape: bf16[784,128], index: 1, kind: input, shape index: {}]   ;;  %s4779_s2 = inlined_call_operand.vmem [shape: f32[1,128], index: 2, kind: input, shape index: {}]   ;;  %s4780_s3 = inlined_call_operand.vmem [shape: bf16[128,128], index: 3, kind: input, shape index: {}]   ;;  %s4781_s4 = inlined_call_operand.vmem [shape: f32[1,128], index: 4, kind: input, shape index: {}]   ;;  %s4782_s5 = inlined_call_operand.vmem [shape: bf16[128,128], index: 5, kind: input, shape index: {}]   ;;  %s4783_s6 = inlined_call_operand.vmem [shape: f32[1,128], index: 6, kind: input, shape index: {}]   ;;  %s4784_s7 = inlined_call_operand.hbm [shape: f32[256,128], index: 7, kind: output, shape index: {}]  }
   0x1   :  { %v3018_v0 = vld [vmem:[%s4778_s1 + $0x40] sm:$0xff]   ;;  %v3020_v2 = vld [vmem:[%s4778_s1 + $0x48] sm:$0xff]   ;;  %v3022_v4 = vld [vmem:[%s4778_s1 + $0x50] sm:$0xff]  }
   0x2   :  { %v3019_v1 = vld [vmem:[%s4778_s1] sm:$0xff]   ;;  %2468 = vmatprep.subr.bf16.mxu0 %v3018_v0  ;;  %2999 = vmatprep.subr.bf16.mxu1 %v3018_v0  ;;  %v3021_v3 = vld [vmem:[%s4778_s1 + $0x8] sm:$0xff]   ;;  %v3023_v5 = vld [vmem:[%s4778_s1 + $0x10] sm:$0xff]  }
   0x3   :  { %2469 = vmatpush3.bf16.msra.mxu0 %v3019_v1  ;;  %3007 = vmatpush3.bf16.msra.mxu1 %v3019_v1  ;;  %v3024_v6 = vld [vmem:[%s4778_s1 + $0x58] sm:$0xff]   ;;  %v3026_v8 = vld [vmem:[%s4778_s1 + $0x60] sm:$0xff]   ;;  %v3028_v10 = vld [vmem:[%s4778_s1 + $0x68] sm:$0xff]  }
   0x4   :  { %2470 = vmatprep.subr.bf16.mxu0 %v3020_v2  ;;  %3000 = vmatprep.subr.bf16.mxu1 %v3020_v2  ;;  %v3025_v7 = vld [vmem:[%s4778_s1 + $0x18] sm:$0xff]   ;;  %v3027_v9 = vld [vmem:[%s4778_s1 + $0x20] sm:$0xff]   ;;  %v29_v11 = vld [vmem:[%s4777_s0 + $0x8] sm:$0xff] }
   0x5   :  { %v36_v12 = vld [vmem:[%s4777_s0 + $0x40] sm:$0xff]  ;;  %v197_v13 = vld [vmem:[%s4777_s0 + $0x548] sm:$0xff]  ;;  %v3030_v18 = vld [vmem:[%s4778_s1 + $0x70] sm:$0xff]  }
   0x6   :  { %v253_v14 = vpack.c.bf16 %v36_v12, %v29_v11  ;;  %v204_v15 = vld [vmem:[%s4777_s0 + $0x580] sm:$0xff]  ;;  %v3029_v17 = vld [vmem:[%s4778_s1 + $0x28] sm:$0xff]   ;;  %v3031_v19 = vld [vmem:[%s4778_s1 + $0x30] sm:$0xff]  }
   0x7   :  { %2471 = vmatpush3.bf16.msra.mxu0 %v3021_v3  ;;  %3008 = vmatpush3.bf16.msra.mxu1 %v3021_v3  ;;  %v337_v16 = vpack.c.bf16 %v204_v15, %v197_v13  ;;  %v3032_v20 = vld [vmem:[%s4778_s1 + $0x78] sm:$0xff]   ;;  %v28_v22 = vld [vmem:[%s4777_s0] sm:$0xff]  ;;  %v50_v29 = vld [vmem:[%s4777_s0 + $0xb0] sm:$0xff] }
   0x8   :  { %2472 = vmatprep.subr.bf16.mxu0 %v3022_v4  ;;  %3001 = vmatprep.subr.bf16.mxu1 %v3022_v4  ;;  %v3033_v21 = vld [vmem:[%s4778_s1 + $0x38] sm:$0xff]   ;;  %v196_v24 = vld [vmem:[%s4777_s0 + $0x540] sm:$0xff]  ;;  %v218_v34 = vld [vmem:[%s4777_s0 + $0x5f0] sm:$0xff] }
   0x9   :  { %844 = vmatprep.mubr.bf16.mxu0 %v253_v14  ;;  %940 = vmatprep.mubr.bf16.mxu1 %v337_v16  ;;  %v35_v23 = vld [vmem:[%s4777_s0 + $0x38] sm:$0xff]  ;;  %v3034_v26 = vld [vmem:[%s4778_s1 + $0xc0] sm:$0xff]   ;;  %v3038_v36 = vld [vmem:[%s4778_s1 + $0xc8] sm:$0xff]  }
   0xa   :  { %v203_v25 = vld [vmem:[%s4777_s0 + $0x578] sm:$0xff]  ;;  %v3035_v27 = vld [vmem:[%s4778_s1 + $0x140] sm:$0xff]   ;;  %v252_v32 = vpack.c.bf16 %v35_v23, %v28_v22  ;;  %v3039_v38 = vld [vmem:[%s4778_s1 + $0x88] sm:$0xff]  }
   0xb   :  { %2473 = vmatpush3.bf16.msra.mxu0 %v3023_v5  ;;  %3009 = vmatpush3.bf16.msra.mxu1 %v3023_v5  ;;  %v43_v28 = vld [vmem:[%s4777_s0 + $0x78] sm:$0xff]  ;;  %v3036_v30 = vld [vmem:[%s4778_s1 + $0x80] sm:$0xff]   ;;  %v336_v33 = vpack.c.bf16 %v203_v25, %v196_v24  ;;  %v42_v40 = vld [vmem:[%s4777_s0 + $0x70] sm:$0xff] }
   0xc   :  { %2474 = vmatprep.subr.bf16.mxu0 %v3024_v6  ;;  %3002 = vmatprep.subr.bf16.mxu1 %v3024_v6  ;;  %v211_v31 = vld [vmem:[%s4777_s0 + $0x5b8] sm:$0xff]  ;;  %v3037_v35 = vld [vmem:[%s4778_s1 + $0x100] sm:$0xff]   ;;  %v260_v37 = vpack.c.bf16 %v50_v29, %v43_v28  ;;  %v49_v41 = vld [vmem:[%s4777_s0 + $0xa8] sm:$0xff] }
   0xd   :  { %v344_v39 = vpack.c.bf16 %v218_v34, %v211_v31  ;;  %v3043_v42 = vld [vmem:[%s4778_s1 + $0x148] sm:$0xff]   ;;  %v210_v43 = vld [vmem:[%s4777_s0 + $0x5b0] sm:$0xff]  ;;  %v64_v48 = vld [vmem:[%s4777_s0 + $0x120] sm:$0xff]  ;;  %v259_v51 = vpack.c.bf16 %v49_v41, %v42_v40 }
   0xe   :  { %v217_v44 = vld [vmem:[%s4777_s0 + $0x5e8] sm:$0xff]  ;;  %v3040_v45 = vld [vmem:[%s4778_s1 + $0xd0] sm:$0xff]   ;;  %v232_v50 = vld [vmem:[%s4777_s0 + $0x660] sm:$0xff] }
   0xf   :  { %2475 = vmatpush3.bf16.msra.mxu0 %v3025_v7  ;;  %3010 = vmatpush3.bf16.msra.mxu1 %v3025_v7  ;;  %v3045_v46 = vld [vmem:[%s4778_s1 + $0x108] sm:$0xff]   ;;  %v343_v52 = vpack.c.bf16 %v217_v44, %v210_v43  ;;  %v3041_v53 = vld [vmem:[%s4778_s1 + $0x90] sm:$0xff]   ;;  %v3042_v55 = vld [vmem:[%s4778_s1 + $0xd8] sm:$0xff]  }
  0x10   :  { %2476 = vmatprep.subr.bf16.mxu0 %v3026_v8  ;;  %3003 = vmatprep.subr.bf16.mxu1 %v3026_v8  ;;  %v57_v47 = vld [vmem:[%s4777_s0 + $0xe8] sm:$0xff]  ;;  %v3044_v57 = vld [vmem:[%s4778_s1 + $0x98] sm:$0xff]   ;;  %v56_v58 = vld [vmem:[%s4777_s0 + $0xe0] sm:$0xff] }
  0x11   :  { %v225_v49 = vld [vmem:[%s4777_s0 + $0x628] sm:$0xff]  ;;  %v267_v54 = vpack.c.bf16 %v64_v48, %v57_v47  ;;  %v63_v59 = vld [vmem:[%s4777_s0 + $0x118] sm:$0xff]  ;;  %v224_v60 = vld [vmem:[%s4777_s0 + $0x620] sm:$0xff] }
  0x12   :  { %v351_v56 = vpack.c.bf16 %v232_v50, %v225_v49  ;;  %v231_v61 = vld [vmem:[%s4777_s0 + $0x658] sm:$0xff]  ;;  %v3046_v62 = vld [vmem:[%s4778_s1 + $0xe0] sm:$0xff]   ;;  %v78_v0 = vld [vmem:[%s4777_s0 + $0x190] sm:$0xff]  ;;  %v266_v4 = vpack.c.bf16 %v63_v59, %v56_v58 }
  0x13   :  { %2477 = vmatpush3.bf16.msra.mxu0 %v3027_v9  ;;  %3011 = vmatpush3.bf16.msra.mxu1 %v3027_v9  ;;  %v71_v63 = vld [vmem:[%s4777_s0 + $0x158] sm:$0xff]  ;;  %v3051_v2 = vld [vmem:[%s4778_s1 + $0x150] sm:$0xff]   ;;  %v350_v5 = vpack.c.bf16 %v231_v61, %v224_v60  ;;  %v3047_v7 = vld [vmem:[%s4778_s1 + $0xa0] sm:$0xff]  }
  0x14   :  { %2478 = vmatprep.subr.bf16.mxu0 %v3028_v10  ;;  %3004 = vmatprep.subr.bf16.mxu1 %v3028_v10  ;;  %v239_v1 = vld [vmem:[%s4777_s0 + $0x698] sm:$0xff]  ;;  %v246_v3 = vld [vmem:[%s4777_s0 + $0x6d0] sm:$0xff]  ;;  %v274_v8 = vpack.c.bf16 %v78_v0, %v71_v63  ;;  %v3048_v9 = vld [vmem:[%s4778_s1 + $0xe8] sm:$0xff]  }
  0x15   :  { %v3053_v6 = vld [vmem:[%s4778_s1 + $0x110] sm:$0xff]   ;;  %v358_v10 = vpack.c.bf16 %v246_v3, %v239_v1  ;;  %v3049_v11 = vld [vmem:[%s4778_s1 + $0xa8] sm:$0xff]   ;;  %v3058_v24 = vld [vmem:[%s4778_s1 + $0x118] sm:$0xff]  }
  0x16   :  { %v70_v12 = vld [vmem:[%s4777_s0 + $0x150] sm:$0xff]  ;;  %v77_v13 = vld [vmem:[%s4777_s0 + $0x188] sm:$0xff]  ;;  %v3055_v29 = vld [vmem:[%s4778_s1 + $0xb8] sm:$0xff]  }
  0x17   :  { %2479 = vmatpush3.bf16.msra.mxu0 %v3029_v17  ;;  %3012 = vmatpush3.bf16.msra.mxu1 %v3029_v17  ;;  %v238_v14 = vld [vmem:[%s4777_s0 + $0x690] sm:$0xff]  ;;  %v245_v15 = vld [vmem:[%s4777_s0 + $0x6c8] sm:$0xff]  ;;  %v273_v22 = vpack.c.bf16 %v77_v13, %v70_v12  ;;  %v91_v31 = vld [vmem:[%s4777_s0 + $0x1f8] sm:$0xff] }
  0x18   :  { %2480 = vmatprep.subr.bf16.mxu0 %v3030_v18  ;;  %3005 = vmatprep.subr.bf16.mxu1 %v3030_v18  ;;  %v3050_v16 = vld [vmem:[%s4778_s1 + $0xf0] sm:$0xff]   ;;  %v85_v17 = vld [vmem:[%s4777_s0 + $0x1c8] sm:$0xff]  ;;  %v92_v18 = vld [vmem:[%s4777_s0 + $0x200] sm:$0xff]  ;;  %v357_v23 = vpack.c.bf16 %v245_v15, %v238_v14 }
  0x19   :  { %v3052_v25 = vld [vmem:[%s4778_s1 + $0xb0] sm:$0xff]   ;;  %v3056_v34 = vld [vmem:[%s4778_s1 + $0x180] sm:$0xff]   ;;  %v105_v47 = vld [vmem:[%s4777_s0 + $0x268] sm:$0xff] }
  0x1a   :  { %v3060_v40 = vld [vmem:[%s4778_s1 + $0x120] sm:$0xff]   ;;  %v3062_v48 = vld [vmem:[%s4778_s1 + $0x128] sm:$0xff]   ;;  %v51_v50 = vld [vmem:[%s4777_s0 + $0xb8] sm:$0xff] }
  0x1b   :  { %2481 = vmatpush3.bf16.msra.mxu0 %v3031_v19  ;;  %3013 = vmatpush3.bf16.msra.mxu1 %v3031_v19  ;;  %v31_v19 = vld [vmem:[%s4777_s0 + $0x18] sm:$0xff]  ;;  %v44_v49 = vld [vmem:[%s4777_s0 + $0x80] sm:$0xff]  ;;  %v3063_v59 = vld [vmem:[%s4778_s1 + $0x170] sm:$0xff]  }
  0x1c   :  { %2482 = vmatprep.subr.bf16.mxu0 %v3032_v20  ;;  %3006 = vmatprep.subr.bf16.mxu1 %v3032_v20  ;;  %v38_v20 = vld [vmem:[%s4777_s0 + $0x50] sm:$0xff]  ;;  %v112_v60 = vld [vmem:[%s4777_s0 + $0x2a0] sm:$0xff]  ;;  %v65_v0 = vld [vmem:[%s4777_s0 + $0x128] sm:$0xff] }
  0x1d   :  { %v255_v28 = vpack.c.bf16 %v38_v20, %v31_v19  ;;  %v3064_v61 = vld [vmem:[%s4778_s1 + $0x130] sm:$0xff]   ;;  %v127_v1 = vld [vmem:[%s4777_s0 + $0x318] sm:$0xff]  ;;  %v73_v3 = vld [vmem:[%s4777_s0 + $0x168] sm:$0xff] }
  0x1e   :  { %v58_v63 = vld [vmem:[%s4777_s0 + $0xf0] sm:$0xff]  ;;  %v133_v12 = vld [vmem:[%s4777_s0 + $0x348] sm:$0xff]  ;;  %v72_v13 = vld [vmem:[%s4777_s0 + $0x160] sm:$0xff] }
  0x1f   :  { %2483 = vmatpush3.bf16.msra.mxu0 %v3033_v21  ;;  %3014 = vmatpush3.bf16.msra.mxu1 %v3033_v21  ;;  %v3057_v21 = vld [vmem:[%s4778_s1 + $0x158] sm:$0xff]   ;;  %v141_v15 = vld [vmem:[%s4777_s0 + $0x388] sm:$0xff] }
  0x20   :  { %2580 = vmatprep.subr.bf16.mxu1 %v3034_v26  ;;  %2692 = vmatprep.subr.bf16.mxu0 %v3035_v27  ;;  %v281_v26 = vpack.c.bf16 %v92_v18, %v85_v17  ;;  %v3054_v27 = vld [vmem:[%s4778_s1 + $0xf8] sm:$0xff]   ;;  %v94_v18 = vld [vmem:[%s4777_s0 + $0x210] sm:$0xff] }
  0x21   :  { %v79_v14 = vld [vmem:[%s4777_s0 + $0x198] sm:$0xff] }
  0x22   :  { %845 = vmatmul.mubr.bf16.vlgmr.msra.gmra.mrb[0].mxu0 %v252_v32  ;;  %941 = vmatmul.mubr.bf16.vlgmr.msra.gmra.mrb[0].mxu1 %v336_v33  ;;  %v30_v32 = vld [vmem:[%s4777_s0 + $0x10] sm:$0xff]  ;;  %v37_v33 = vld [vmem:[%s4777_s0 + $0x48] sm:$0xff]  ;;  %v87_v17 = vld [vmem:[%s4777_s0 + $0x1d8] sm:$0xff]  ;;  %v275_v20 = vpack.c.bf16 %v79_v14, %v72_v13 }
  0x23   :  { %2581 = vmatpush3.bf16.msra.mxu1 %v3036_v30  ;;  %2693 = vmatpush3.bf16.msra.mxu0 %v3037_v35  ;;  %v84_v30 = vld [vmem:[%s4777_s0 + $0x1c0] sm:$0xff]  ;;  %v99_v35 = vld [vmem:[%s4777_s0 + $0x238] sm:$0xff]  ;;  %v54_v14 = vld [vmem:[%s4777_s0 + $0xd0] sm:$0xff] }
  0x24   :  { %2582 = vmatprep.subr.bf16.mxu1 %v3038_v36  ;;  %852 = vmatprep.mubr.bf16.mxu0 %v260_v37  ;;  %v106_v36 = vld [vmem:[%s4777_s0 + $0x270] sm:$0xff]  ;;  %v45_v37 = vld [vmem:[%s4777_s0 + $0x88] sm:$0xff]  ;;  %v280_v41 = vpack.c.bf16 %v91_v31, %v84_v30  ;;  %v108_v30 = vld [vmem:[%s4777_s0 + $0x280] sm:$0xff] }
  0x25   :  { %948 = vmatprep.mubr.bf16.mxu1 %v344_v39  ;;  %2694 = vmatprep.subr.bf16.mxu0 %v3043_v42  ;;  %v52_v39 = vld [vmem:[%s4777_s0 + $0xc0] sm:$0xff]  ;;  %v254_v42 = vpack.c.bf16 %v37_v33, %v30_v32  ;;  %v288_v43 = vpack.c.bf16 %v106_v36, %v99_v35  ;;  %v154_v35 = vld [vmem:[%s4777_s0 + $0x3f0] sm:$0xff]  ;;  %v161_v36 = vld [vmem:[%s4777_s0 + $0x428] sm:$0xff] }
  0x26   :  { %v262_v44 = vpack.c.bf16 %v52_v39, %v45_v37  ;;  %v100_v37 = vld [vmem:[%s4777_s0 + $0x240] sm:$0xff]  ;;  %v169_v39 = vld [vmem:[%s4777_s0 + $0x468] sm:$0xff]  ;;  %v47_v13 = vld [vmem:[%s4777_s0 + $0x98] sm:$0xff] }
  0x27   :  { %2583 = vmatpush3.bf16.msra.mxu1 %v3039_v38  ;;  %2695 = vmatpush3.bf16.msra.mxu0 %v3045_v46  ;;  %v3059_v38 = vld [vmem:[%s4778_s1 + $0x160] sm:$0xff]   ;;  %v98_v46 = vld [vmem:[%s4777_s0 + $0x230] sm:$0xff] }
  0x28   :  { %2584 = vmatprep.subr.bf16.mxu1 %v3040_v45  ;;  %2696 = vmatprep.subr.bf16.mxu0 %v3051_v2  ;;  %v3061_v45 = vld [vmem:[%s4778_s1 + $0x168] sm:$0xff]   ;;  %v134_v2 = vld [vmem:[%s4777_s0 + $0x350] sm:$0xff] }
  0x2a   :  { %853 = vmatmul.mubr.bf16.gmra.mrb[4].mxu0 %v259_v51  ;;  %949 = vmatmul.mubr.bf16.gmra.mrb[4].mxu1 %v343_v52  ;;  %v113_v51 = vld [vmem:[%s4777_s0 + $0x2a8] sm:$0xff]  ;;  %v120_v52 = vld [vmem:[%s4777_s0 + $0x2e0] sm:$0xff] }
  0x2b   :  { %2585 = vmatpush3.bf16.msra.mxu1 %v3041_v53  ;;  %860 = vmatprep.mubr.bf16.mxu0 %v267_v54  ;;  %v59_v53 = vld [vmem:[%s4777_s0 + $0xf8] sm:$0xff]  ;;  %v66_v54 = vld [vmem:[%s4777_s0 + $0x130] sm:$0xff] }
  0x2c   :  { %2586 = vmatprep.subr.bf16.mxu1 %v3042_v55  ;;  %956 = vmatprep.mubr.bf16.mxu1 %v351_v56  ;;  %v287_v55 = vpack.c.bf16 %v105_v47, %v98_v46  ;;  %v261_v56 = vpack.c.bf16 %v51_v50, %v44_v49  ;;  %v269_v58 = vpack.c.bf16 %v66_v54, %v59_v53  ;;  %v168_v47 = vld [vmem:[%s4777_s0 + $0x460] sm:$0xff]  ;;  %v114_v49 = vld [vmem:[%s4777_s0 + $0x2b0] sm:$0xff]  ;;  %v121_v50 = vld [vmem:[%s4777_s0 + $0x2e8] sm:$0xff] }
  0x2d   :  { %2697 = vmatpush3.bf16.msra.mxu0 %v3053_v6  ;;  %v129_v53 = vld [vmem:[%s4777_s0 + $0x328] sm:$0xff]  ;;  %v136_v54 = vld [vmem:[%s4777_s0 + $0x360] sm:$0xff] }
  0x2e   :  { %2698 = vmatprep.subr.bf16.mxu0 %v3057_v21 }
  0x2f   :  { %2587 = vmatpush3.bf16.msra.mxu1 %v3044_v57  ;;  %v295_v57 = vpack.c.bf16 %v120_v52, %v113_v51  ;;  %v183_v51 = vld [vmem:[%s4777_s0 + $0x4d8] sm:$0xff]  ;;  %v190_v52 = vld [vmem:[%s4777_s0 + $0x510] sm:$0xff] }
  0x30   :  { %2588 = vmatprep.subr.bf16.mxu1 %v3046_v62  ;;  %v119_v62 = vld [vmem:[%s4777_s0 + $0x2d8] sm:$0xff] }
  0x31   :  { %2699 = vmatpush3.bf16.msra.mxu0 %v3058_v24  ;;  %v294_v6 = vpack.c.bf16 %v119_v62, %v112_v60  ;;  %v147_v24 = vld [vmem:[%s4777_s0 + $0x3b8] sm:$0xff]  ;;  %v189_v60 = vld [vmem:[%s4777_s0 + $0x508] sm:$0xff] }
  0x32   :  { %861 = vmatmul.mubr.bf16.gmra.mrb[8].mxu0 %v266_v4  ;;  %957 = vmatmul.mubr.bf16.gmra.mrb[8].mxu1 %v350_v5  ;;  %v80_v4 = vld [vmem:[%s4777_s0 + $0x1a0] sm:$0xff]  ;;  %v3065_v5 = vld [vmem:[%s4778_s1 + $0x178] sm:$0xff]  }
  0x33   :  { %2589 = vmatpush3.bf16.msra.mxu1 %v3047_v7  ;;  %868 = vmatprep.mubr.bf16.mxu0 %v274_v8  ;;  %v268_v7 = vpack.c.bf16 %v65_v0, %v58_v63  ;;  %v3066_v8 = vld [vmem:[%s4778_s1 + $0x138] sm:$0xff]   ;;  %v150_v0 = vld [vmem:[%s4777_s0 + $0x3d0] sm:$0xff] }
  0x34   :  { %2590 = vmatprep.subr.bf16.mxu1 %v3048_v9  ;;  %964 = vmatprep.mubr.bf16.mxu1 %v358_v10  ;;  %v302_v9 = vpack.c.bf16 %v134_v2, %v127_v1  ;;  %v276_v10 = vpack.c.bf16 %v80_v4, %v73_v3  ;;  %v135_v62 = vld [vmem:[%s4777_s0 + $0x358] sm:$0xff]  ;;  %v33_v1 = vld [vmem:[%s4777_s0 + $0x28] sm:$0xff]  ;;  %v40_v2 = vld [vmem:[%s4777_s0 + $0x60] sm:$0xff] }
  0x35   :  { %2700 = vmatprep.subr.bf16.mxu0 %v3059_v38  ;;  %v107_v38 = vld [vmem:[%s4777_s0 + $0x278] sm:$0xff] }
  0x36   :  { %2701 = vmatpush3.bf16.msra.mxu0 %v3060_v40  ;;  %v176_v40 = vld [vmem:[%s4777_s0 + $0x4a0] sm:$0xff]  ;;  %v143_v63 = vld [vmem:[%s4777_s0 + $0x398] sm:$0xff] }
  0x37   :  { %2591 = vmatpush3.bf16.msra.mxu1 %v3049_v11  ;;  %2702 = vmatprep.subr.bf16.mxu0 %v3061_v45  ;;  %v126_v11 = vld [vmem:[%s4777_s0 + $0x310] sm:$0xff]  ;;  %v323_v45 = vpack.c.bf16 %v176_v40, %v169_v39 }
  0x38   :  { %2592 = vmatprep.subr.bf16.mxu1 %v3050_v16  ;;  %v148_v16 = vld [vmem:[%s4777_s0 + $0x3c0] sm:$0xff]  ;;  %v301_v19 = vpack.c.bf16 %v133_v12, %v126_v11  ;;  %v157_v11 = vld [vmem:[%s4777_s0 + $0x408] sm:$0xff] }
  0x39   :  { %v309_v21 = vpack.c.bf16 %v148_v16, %v141_v15  ;;  %v164_v12 = vld [vmem:[%s4777_s0 + $0x440] sm:$0xff] }
  0x3a   :  { %869 = vmatmul.mubr.bf16.gmra.mrb[12].mxu0 %v273_v22  ;;  %965 = vmatmul.mubr.bf16.gmra.mrb[12].mxu1 %v357_v23  ;;  %v283_v22 = vpack.c.bf16 %v94_v18, %v87_v17  ;;  %v140_v23 = vld [vmem:[%s4777_s0 + $0x380] sm:$0xff]  ;;  %v318_v17 = vpack.c.bf16 %v164_v12, %v157_v11  ;;  %v264_v18 = vpack.c.bf16 %v54_v14, %v47_v13 }
  0x3b   :  { %2593 = vmatpush3.bf16.msra.mxu1 %v3052_v25  ;;  %876 = vmatprep.mubr.bf16.mxu0 %v281_v26  ;;  %v86_v25 = vld [vmem:[%s4777_s0 + $0x1d0] sm:$0xff]  ;;  %v93_v26 = vld [vmem:[%s4777_s0 + $0x208] sm:$0xff]  ;;  %v308_v31 = vpack.c.bf16 %v147_v24, %v140_v23  ;;  %v171_v23 = vld [vmem:[%s4777_s0 + $0x478] sm:$0xff] }
  0x3c   :  { %2594 = vmatprep.subr.bf16.mxu1 %v3054_v27  ;;  %1005 = vmatprep.mubr.bf16.mxu1 %v255_v28  ;;  %v155_v27 = vld [vmem:[%s4777_s0 + $0x3f8] sm:$0xff]  ;;  %v162_v28 = vld [vmem:[%s4777_s0 + $0x430] sm:$0xff]  ;;  %v282_v32 = vpack.c.bf16 %v93_v26, %v86_v25  ;;  %v61_v25 = vld [vmem:[%s4777_s0 + $0x108] sm:$0xff] }
  0x3d   :  { %2703 = vmatpush3.bf16.msra.mxu0 %v3062_v48  ;;  %v316_v33 = vpack.c.bf16 %v162_v28, %v155_v27  ;;  %v175_v48 = vld [vmem:[%s4777_s0 + $0x498] sm:$0xff]  ;;  %v178_v24 = vld [vmem:[%s4777_s0 + $0x4b0] sm:$0xff]  ;;  %v68_v26 = vld [vmem:[%s4777_s0 + $0x140] sm:$0xff] }
  0x3e   :  { %2704 = vmatprep.subr.bf16.mxu0 %v3063_v59  ;;  %v182_v59 = vld [vmem:[%s4777_s0 + $0x4d0] sm:$0xff] }
  0x3f   :  { %2595 = vmatpush3.bf16.msra.mxu1 %v3055_v29  ;;  %v101_v29 = vld [vmem:[%s4777_s0 + $0x248] sm:$0xff]  ;;  %v329_v3 = vpack.c.bf16 %v189_v60, %v182_v59 }
  0x40   :  { %2869 = vmatprep.subr.bf16.mxu1 %v3056_v34 }
  0x41   :  { %2705 = vmatpush3.bf16.msra.mxu0 %v3064_v61  ;;  %v128_v61 = vld [vmem:[%s4777_s0 + $0x320] sm:$0xff] }
  0x42   :  { %877 = vmatmul.mubr.bf16.gmra.mrb[16].mxu0 %v280_v41  ;;  %1006 = vmatmul.mubr.bf16.vlgmr.msra.gmra.mrb[16].mxu1 %v254_v42  ;;  %v115_v41 = vld [vmem:[%s4777_s0 + $0x2b8] sm:$0xff]  ;;  %v122_v42 = vld [vmem:[%s4777_s0 + $0x2f0] sm:$0xff]  ;;  %v303_v4 = vpack.c.bf16 %v135_v62, %v128_v61 }
  0x43   :  { %2870 = vmatpush3.bf16.msra.mxu1 %v3056_v34  ;;  %884 = vmatprep.mubr.bf16.mxu0 %v288_v43  ;;  %v290_v34 = vpack.c.bf16 %v108_v30, %v101_v29  ;;  %v315_v43 = vpack.c.bf16 %v161_v36, %v154_v35  ;;  %v297_v46 = vpack.c.bf16 %v122_v42, %v115_v41 }
  0x44   :  { %1013 = vmatprep.mubr.bf16.mxu1 %v262_v44  ;;  %2706 = vmatprep.subr.bf16.mxu0 %v3065_v5  ;;  %v289_v44 = vpack.c.bf16 %v107_v38, %v100_v37  ;;  %v311_v5 = vpack.c.bf16 %v150_v0, %v143_v63 }
  0x45   :  { %2707 = vmatpush3.bf16.msra.mxu0 %v3066_v8  ;;  %v149_v8 = vld [vmem:[%s4777_s0 + $0x3c8] sm:$0xff] }
  0x4a   :  { %885 = vmatmul.mubr.bf16.gmra.mrb[20].mxu0 %v287_v55  ;;  %1014 = vmatmul.mubr.bf16.gmra.mrb[20].mxu1 %v261_v56  ;;  %v322_v55 = vpack.c.bf16 %v175_v48, %v168_v47  ;;  %v296_v56 = vpack.c.bf16 %v121_v50, %v114_v49 }
  0x4b   :  { %892 = vmatprep.mubr.bf16.mxu0 %v295_v57  ;;  %1021 = vmatprep.mubr.bf16.mxu1 %v269_v58  ;;  %v330_v57 = vpack.c.bf16 %v190_v52, %v183_v51  ;;  %v304_v58 = vpack.c.bf16 %v136_v54, %v129_v53 }
  0x52   :  { %893 = vmatmul.mubr.bf16.gmra.mrb[24].mxu0 %v294_v6  ;;  %1022 = vmatmul.mubr.bf16.gmra.mrb[24].mxu1 %v268_v7  ;;  %v257_v6 = vpack.c.bf16 %v40_v2, %v33_v1  ;;  %v142_v7 = vld [vmem:[%s4777_s0 + $0x390] sm:$0xff] }
  0x53   :  { %900 = vmatprep.mubr.bf16.mxu0 %v302_v9  ;;  %1029 = vmatprep.mubr.bf16.mxu1 %v276_v10  ;;  %v32_v9 = vld [vmem:[%s4777_s0 + $0x20] sm:$0xff]  ;;  %v39_v10 = vld [vmem:[%s4777_s0 + $0x58] sm:$0xff]  ;;  %v310_v15 = vpack.c.bf16 %v149_v8, %v142_v7 }
  0x54   :  { %v256_v16 = vpack.c.bf16 %v39_v10, %v32_v9 }
  0x5a   :  { %901 = vmatmul.mubr.bf16.gmra.mrb[28].mxu0 %v301_v19  ;;  %1030 = vmatmul.mubr.bf16.gmra.mrb[28].mxu1 %v275_v20  ;;  %v156_v19 = vld [vmem:[%s4777_s0 + $0x400] sm:$0xff]  ;;  %v163_v20 = vld [vmem:[%s4777_s0 + $0x438] sm:$0xff] }
  0x5b   :  { %908 = vmatprep.mubr.bf16.mxu0 %v309_v21  ;;  %1037 = vmatprep.mubr.bf16.mxu1 %v283_v22  ;;  %v46_v21 = vld [vmem:[%s4777_s0 + $0x90] sm:$0xff]  ;;  %v53_v22 = vld [vmem:[%s4777_s0 + $0xc8] sm:$0xff]  ;;  %v317_v27 = vpack.c.bf16 %v163_v20, %v156_v19 }
  0x5c   :  { %v263_v28 = vpack.c.bf16 %v53_v22, %v46_v21 }
  0x62   :  { %909 = vmatmul.mubr.bf16.gmra.mrb[32].mxu0 %v308_v31  ;;  %1038 = vmatmul.mubr.bf16.gmra.mrb[32].mxu1 %v282_v32 }
  0x63   :  { %916 = vmatprep.mubr.bf16.mxu0 %v316_v33  ;;  %1045 = vmatprep.mubr.bf16.mxu1 %v290_v34 }
  0x6a   :  { %917 = vmatmul.mubr.bf16.gmra.mrb[36].mxu0 %v315_v43  ;;  %1046 = vmatmul.mubr.bf16.gmra.mrb[36].mxu1 %v289_v44 }
  0x6b   :  { %924 = vmatprep.mubr.bf16.mxu0 %v323_v45  ;;  %1053 = vmatprep.mubr.bf16.mxu1 %v297_v46 }
  0x72   :  { %925 = vmatmul.mubr.bf16.gmra.mrb[40].mxu0 %v322_v55  ;;  %1054 = vmatmul.mubr.bf16.gmra.mrb[40].mxu1 %v296_v56 }
  0x73   :  { %932 = vmatprep.mubr.bf16.mxu0 %v330_v57  ;;  %1061 = vmatprep.mubr.bf16.mxu1 %v304_v58 }
  0x7a   :  { %933 = vmatmul.mubr.bf16.gmra.mrb[44].mxu0 %v329_v3  ;;  %1062 = vmatmul.mubr.bf16.gmra.mrb[44].mxu1 %v303_v4 }
  0x7b   :  { %1069 = vmatprep.mubr.bf16.mxu1 %v311_v5  ;;  %1166 = vmatprep.mubr.bf16.mxu0 %v257_v6 }
  0x82   :  { %1070 = vmatmul.mubr.bf16.gmra.mrb[48].mxu1 %v310_v15  ;;  %1167 = vmatmul.mubr.bf16.vlgmr.msra.gmra.mrb[48].mxu0 %v256_v16 }
  0x83   :  { %1077 = vmatprep.mubr.bf16.mxu1 %v318_v17  ;;  %1174 = vmatprep.mubr.bf16.mxu0 %v264_v18 }
  0x84   :  { %12 = vsyncpa [#allocation3], 0  ;;  %v325_v29 = vpack.c.bf16 %v178_v24, %v171_v23  ;;  %v271_v30 = vpack.c.bf16 %v68_v26, %v61_v25  ;;  %v170_v31 = vld [vmem:[%s4777_s0 + $0x470] sm:$0xff]  ;;  %v177_v32 = vld [vmem:[%s4777_s0 + $0x4a8] sm:$0xff]  ;;  %vm763_vm0 = vcmask 130048  }
  0x85   :  { %v60_v33 = vld [vmem:[%s4777_s0 + $0x100] sm:$0xff]  ;;  %v67_v34 = vld [vmem:[%s4777_s0 + $0x138] sm:$0xff]  ;;  %v185_v35 = vld [vmem:[%s4777_s0 + $0x4e8] sm:$0xff]  ;;  %v324_v39 = vpack.c.bf16 %v177_v32, %v170_v31 }
  0x86   :  { %v192_v36 = vld [vmem:[%s4777_s0 + $0x520] sm:$0xff]  ;;  %v75_v37 = vld [vmem:[%s4777_s0 + $0x178] sm:$0xff]  ;;  %v82_v38 = vld [vmem:[%s4777_s0 + $0x1b0] sm:$0xff]  ;;  %v270_v40 = vpack.c.bf16 %v67_v34, %v60_v33 }
  0x87   :  { %v332_v41 = vpack.c.bf16 %v192_v36, %v185_v35  ;;  %v278_v42 = vpack.c.bf16 %v82_v38, %v75_v37  ;;  %v184_v43 = vld [vmem:[%s4777_s0 + $0x4e0] sm:$0xff]  ;;  %v191_v44 = vld [vmem:[%s4777_s0 + $0x518] sm:$0xff]  ;;  %v74_v45 = vld [vmem:[%s4777_s0 + $0x170] sm:$0xff] }
  0x88   :  { %v81_v46 = vld [vmem:[%s4777_s0 + $0x1a8] sm:$0xff]  ;;  %v199_v47 = vld [vmem:[%s4777_s0 + $0x558] sm:$0xff]  ;;  %v206_v48 = vld [vmem:[%s4777_s0 + $0x590] sm:$0xff]  ;;  %v331_v51 = vpack.c.bf16 %v191_v44, %v184_v43 }
  0x89   :  { %v89_v49 = vld [vmem:[%s4777_s0 + $0x1e8] sm:$0xff]  ;;  %v96_v50 = vld [vmem:[%s4777_s0 + $0x220] sm:$0xff]  ;;  %v277_v52 = vpack.c.bf16 %v81_v46, %v74_v45  ;;  %v339_v53 = vpack.c.bf16 %v206_v48, %v199_v47  ;;  %v198_v55 = vld [vmem:[%s4777_s0 + $0x550] sm:$0xff] }
  0x8a   :  { %1078 = vmatmul.mubr.bf16.gmra.mrb[52].mxu1 %v317_v27  ;;  %1175 = vmatmul.mubr.bf16.gmra.mrb[52].mxu0 %v263_v28  ;;  %v285_v54 = vpack.c.bf16 %v96_v50, %v89_v49  ;;  %v205_v56 = vld [vmem:[%s4777_s0 + $0x588] sm:$0xff]  ;;  %v88_v57 = vld [vmem:[%s4777_s0 + $0x1e0] sm:$0xff]  ;;  %v95_v58 = vld [vmem:[%s4777_s0 + $0x218] sm:$0xff] }
  0x8b   :  { %1085 = vmatprep.mubr.bf16.mxu1 %v325_v29  ;;  %1182 = vmatprep.mubr.bf16.mxu0 %v271_v30  ;;  %v213_v59 = vld [vmem:[%s4777_s0 + $0x5c8] sm:$0xff]  ;;  %v220_v60 = vld [vmem:[%s4777_s0 + $0x600] sm:$0xff]  ;;  %v103_v61 = vld [vmem:[%s4777_s0 + $0x258] sm:$0xff]  ;;  %v338_v63 = vpack.c.bf16 %v205_v56, %v198_v55  ;;  %v284_v0 = vpack.c.bf16 %v95_v58, %v88_v57 }
  0x8c   :  { %v110_v62 = vld [vmem:[%s4777_s0 + $0x290] sm:$0xff]  ;;  %v346_v1 = vpack.c.bf16 %v220_v60, %v213_v59  ;;  %v212_v3 = vld [vmem:[%s4777_s0 + $0x5c0] sm:$0xff]  ;;  %v219_v4 = vld [vmem:[%s4777_s0 + $0x5f8] sm:$0xff] }
  0x8d   :  { %v292_v2 = vpack.c.bf16 %v110_v62, %v103_v61  ;;  %v102_v5 = vld [vmem:[%s4777_s0 + $0x250] sm:$0xff]  ;;  %v109_v6 = vld [vmem:[%s4777_s0 + $0x288] sm:$0xff]  ;;  %v227_v7 = vld [vmem:[%s4777_s0 + $0x638] sm:$0xff]  ;;  %v345_v11 = vpack.c.bf16 %v219_v4, %v212_v3 }
  0x8e   :  { %v234_v8 = vld [vmem:[%s4777_s0 + $0x670] sm:$0xff]  ;;  %v117_v9 = vld [vmem:[%s4777_s0 + $0x2c8] sm:$0xff]  ;;  %v124_v10 = vld [vmem:[%s4777_s0 + $0x300] sm:$0xff]  ;;  %v291_v12 = vpack.c.bf16 %v109_v6, %v102_v5 }
  0x8f   :  { %v353_v13 = vpack.c.bf16 %v234_v8, %v227_v7  ;;  %v299_v14 = vpack.c.bf16 %v124_v10, %v117_v9  ;;  %v226_v15 = vld [vmem:[%s4777_s0 + $0x630] sm:$0xff]  ;;  %v233_v16 = vld [vmem:[%s4777_s0 + $0x668] sm:$0xff]  ;;  %v116_v17 = vld [vmem:[%s4777_s0 + $0x2c0] sm:$0xff] }
  0x90   :  { %v123_v18 = vld [vmem:[%s4777_s0 + $0x2f8] sm:$0xff]  ;;  %v241_v19 = vld [vmem:[%s4777_s0 + $0x6a8] sm:$0xff]  ;;  %v248_v20 = vld [vmem:[%s4777_s0 + $0x6e0] sm:$0xff]  ;;  %v352_v23 = vpack.c.bf16 %v233_v16, %v226_v15 }
  0x91   :  { %v131_v21 = vld [vmem:[%s4777_s0 + $0x338] sm:$0xff]  ;;  %v138_v22 = vld [vmem:[%s4777_s0 + $0x370] sm:$0xff]  ;;  %v298_v24 = vpack.c.bf16 %v123_v18, %v116_v17  ;;  %v360_v25 = vpack.c.bf16 %v248_v20, %v241_v19  ;;  %v240_v27 = vld [vmem:[%s4777_s0 + $0x6a0] sm:$0xff] }
  0x92   :  { %1086 = vmatmul.mubr.bf16.gmra.mrb[56].mxu1 %v324_v39  ;;  %1183 = vmatmul.mubr.bf16.gmra.mrb[56].mxu0 %v270_v40  ;;  %v306_v26 = vpack.c.bf16 %v138_v22, %v131_v21  ;;  %v247_v28 = vld [vmem:[%s4777_s0 + $0x6d8] sm:$0xff]  ;;  %v130_v29 = vld [vmem:[%s4777_s0 + $0x330] sm:$0xff]  ;;  %v137_v30 = vld [vmem:[%s4777_s0 + $0x368] sm:$0xff] }
  0x93   :  { %1093 = vmatprep.mubr.bf16.mxu1 %v332_v41  ;;  %1190 = vmatprep.mubr.bf16.mxu0 %v278_v42  ;;  %v145_v31 = vld [vmem:[%s4777_s0 + $0x3a8] sm:$0xff]  ;;  %v152_v32 = vld [vmem:[%s4777_s0 + $0x3e0] sm:$0xff]  ;;  %v34_v33 = vld [vmem:[%s4777_s0 + $0x30] sm:$0xff]  ;;  %v359_v35 = vpack.c.bf16 %v247_v28, %v240_v27  ;;  %v305_v36 = vpack.c.bf16 %v137_v30, %v130_v29 }
  0x94   :  { %v41_v34 = vld [vmem:[%s4777_s0 + $0x68] sm:$0xff]  ;;  %v313_v37 = vpack.c.bf16 %v152_v32, %v145_v31  ;;  %v144_v39 = vld [vmem:[%s4777_s0 + $0x3a0] sm:$0xff]  ;;  %v151_v40 = vld [vmem:[%s4777_s0 + $0x3d8] sm:$0xff] }
  0x95   :  { %v258_v38 = vpack.c.bf16 %v41_v34, %v34_v33  ;;  %v48_v41 = vld [vmem:[%s4777_s0 + $0xa0] sm:$0xff]  ;;  %v55_v42 = vld [vmem:[%s4777_s0 + $0xd8] sm:$0xff]  ;;  %v166_v44 = vld [vmem:[%s4777_s0 + $0x450] sm:$0xff]  ;;  %v312_v47 = vpack.c.bf16 %v151_v40, %v144_v39 }
  0x96   :  { %v159_v43 = vld [vmem:[%s4777_s0 + $0x418] sm:$0xff]  ;;  %v62_v45 = vld [vmem:[%s4777_s0 + $0x110] sm:$0xff]  ;;  %v69_v46 = vld [vmem:[%s4777_s0 + $0x148] sm:$0xff]  ;;  %v265_v48 = vpack.c.bf16 %v55_v42, %v48_v41 }
  0x97   :  { %v320_v49 = vpack.c.bf16 %v166_v44, %v159_v43  ;;  %v272_v50 = vpack.c.bf16 %v69_v46, %v62_v45  ;;  %v173_v55 = vld [vmem:[%s4777_s0 + $0x488] sm:$0xff]  ;;  %v180_v56 = vld [vmem:[%s4777_s0 + $0x4c0] sm:$0xff]  ;;  %v90_v57 = vld [vmem:[%s4777_s0 + $0x1f0] sm:$0xff] }
  0x98   :  { %v97_v58 = vld [vmem:[%s4777_s0 + $0x228] sm:$0xff]  ;;  %v327_v61 = vpack.c.bf16 %v180_v56, %v173_v55  ;;  %v187_v3 = vld [vmem:[%s4777_s0 + $0x4f8] sm:$0xff]  ;;  %v194_v4 = vld [vmem:[%s4777_s0 + $0x530] sm:$0xff] }
  0x99   :  { %v286_v62 = vpack.c.bf16 %v97_v58, %v90_v57  ;;  %v118_v5 = vld [vmem:[%s4777_s0 + $0x2d0] sm:$0xff]  ;;  %v125_v6 = vld [vmem:[%s4777_s0 + $0x308] sm:$0xff]  ;;  %v334_v9 = vpack.c.bf16 %v194_v4, %v187_v3  ;;  %v208_v16 = vld [vmem:[%s4777_s0 + $0x5a0] sm:$0xff] }
  0x9a   :  { %1094 = vmatmul.mubr.bf16.gmra.mrb[60].mxu1 %v331_v51  ;;  %1191 = vmatmul.mubr.bf16.gmra.mrb[60].mxu0 %v277_v52  ;;  %v158_v51 = vld [vmem:[%s4777_s0 + $0x410] sm:$0xff]  ;;  %v165_v52 = vld [vmem:[%s4777_s0 + $0x448] sm:$0xff]  ;;  %v300_v10 = vpack.c.bf16 %v125_v6, %v118_v5  ;;  %v215_v27 = vld [vmem:[%s4777_s0 + $0x5d8] sm:$0xff] }
  0x9b   :  { %1101 = vmatprep.mubr.bf16.mxu1 %v339_v53  ;;  %1198 = vmatprep.mubr.bf16.mxu0 %v285_v54  ;;  %v76_v53 = vld [vmem:[%s4777_s0 + $0x180] sm:$0xff]  ;;  %v83_v54 = vld [vmem:[%s4777_s0 + $0x1b8] sm:$0xff]  ;;  %v319_v59 = vpack.c.bf16 %v165_v52, %v158_v51  ;;  %v201_v15 = vld [vmem:[%s4777_s0 + $0x568] sm:$0xff] }
  0x9c   :  { %v279_v60 = vpack.c.bf16 %v83_v54, %v76_v53  ;;  %v146_v17 = vld [vmem:[%s4777_s0 + $0x3b0] sm:$0xff]  ;;  %v153_v18 = vld [vmem:[%s4777_s0 + $0x3e8] sm:$0xff]  ;;  %v341_v21 = vpack.c.bf16 %v208_v16, %v201_v15  ;;  %v3067_v40 = vld [vmem:[%s4780_s3] sm:$0xff]  }
  0x9d   :  { %v314_v22 = vpack.c.bf16 %v153_v18, %v146_v17  ;;  %v222_v28 = vld [vmem:[%s4777_s0 + $0x610] sm:$0xff]  ;;  %v181_v30 = vld [vmem:[%s4777_s0 + $0x4c8] sm:$0xff]  ;;  %v236_v41 = vld [vmem:[%s4777_s0 + $0x680] sm:$0xff]  ;;  %2903 = vmatprep.subr.bf16.mxu1 %v3067_v40 }
  0x9e   :  { %v174_v29 = vld [vmem:[%s4777_s0 + $0x490] sm:$0xff]  ;;  %v348_v33 = vpack.c.bf16 %v222_v28, %v215_v27  ;;  %v229_v39 = vld [vmem:[%s4777_s0 + $0x648] sm:$0xff]  ;;  %v223_v51 = vld [vmem:[%s4777_s0 + $0x618] sm:$0xff] }
  0x9f   :  { %v328_v34 = vpack.c.bf16 %v181_v30, %v174_v29  ;;  %v202_v42 = vld [vmem:[%s4777_s0 + $0x570] sm:$0xff]  ;;  %v209_v43 = vld [vmem:[%s4777_s0 + $0x5a8] sm:$0xff]  ;;  %v355_v46 = vpack.c.bf16 %v236_v41, %v229_v39  ;;  %v243_v52 = vld [vmem:[%s4777_s0 + $0x6b8] sm:$0xff] }
  0xa0   :  { %v3068_v53 = vld [vmem:[%s4780_s3 + $0x8] sm:$0xff]   ;;  %v250_v54 = vld [vmem:[%s4777_s0 + $0x6f0] sm:$0xff]  ;;  %v3070_v16 = vld [vmem:[%s4780_s3 + $0x18] sm:$0xff]  }
  0xa1   :  { %v230_v55 = vld [vmem:[%s4777_s0 + $0x650] sm:$0xff]  ;;  %v237_v56 = vld [vmem:[%s4777_s0 + $0x688] sm:$0xff]  ;;  %v3071_v29 = vld [vmem:[%s4780_s3 + $0x20] sm:$0xff]  }
  0xa2   :  { %1102 = vmatmul.mubr.bf16.gmra.mrb[64].mxu1 %v338_v63  ;;  %1199 = vmatmul.mubr.bf16.gmra.mrb[64].mxu0 %v284_v0  ;;  %v172_v63 = vld [vmem:[%s4777_s0 + $0x480] sm:$0xff]  ;;  %v179_v0 = vld [vmem:[%s4777_s0 + $0x4b8] sm:$0xff] }
  0xa3   :  { %1109 = vmatprep.mubr.bf16.mxu1 %v346_v1  ;;  %1206 = vmatprep.mubr.bf16.mxu0 %v292_v2  ;;  %v104_v1 = vld [vmem:[%s4777_s0 + $0x260] sm:$0xff]  ;;  %v111_v2 = vld [vmem:[%s4777_s0 + $0x298] sm:$0xff]  ;;  %v326_v7 = vpack.c.bf16 %v179_v0, %v172_v63 }
  0xa4   :  { %v293_v8 = vpack.c.bf16 %v111_v2, %v104_v1  ;;  %v244_v63 = vld [vmem:[%s4777_s0 + $0x6c0] sm:$0xff]  ;;  %v251_v0 = vld [vmem:[%s4777_s0 + $0x6f8] sm:$0xff]  ;;  %v3069_v1 = vld [vmem:[%s4780_s3 + $0x10] sm:$0xff]  }
  0xaa   :  { %1110 = vmatmul.mubr.bf16.gmra.mrb[68].mxu1 %v345_v11  ;;  %1207 = vmatmul.mubr.bf16.gmra.mrb[68].mxu0 %v291_v12  ;;  %v186_v11 = vld [vmem:[%s4777_s0 + $0x4f0] sm:$0xff]  ;;  %v193_v12 = vld [vmem:[%s4777_s0 + $0x528] sm:$0xff] }
  0xab   :  { %1117 = vmatprep.mubr.bf16.mxu1 %v353_v13  ;;  %1214 = vmatprep.mubr.bf16.mxu0 %v299_v14  ;;  %v132_v13 = vld [vmem:[%s4777_s0 + $0x340] sm:$0xff]  ;;  %v139_v14 = vld [vmem:[%s4777_s0 + $0x378] sm:$0xff]  ;;  %v333_v19 = vpack.c.bf16 %v193_v12, %v186_v11 }
  0xac   :  { %v307_v20 = vpack.c.bf16 %v139_v14, %v132_v13 }
  0xb2   :  { %1118 = vmatmul.mubr.bf16.gmra.mrb[72].mxu1 %v352_v23  ;;  %1215 = vmatmul.mubr.bf16.gmra.mrb[72].mxu0 %v298_v24  ;;  %v200_v23 = vld [vmem:[%s4777_s0 + $0x560] sm:$0xff]  ;;  %v207_v24 = vld [vmem:[%s4777_s0 + $0x598] sm:$0xff] }
  0xb3   :  { %1125 = vmatprep.mubr.bf16.mxu1 %v360_v25  ;;  %1222 = vmatprep.mubr.bf16.mxu0 %v306_v26  ;;  %v160_v25 = vld [vmem:[%s4777_s0 + $0x420] sm:$0xff]  ;;  %v167_v26 = vld [vmem:[%s4777_s0 + $0x458] sm:$0xff]  ;;  %v340_v31 = vpack.c.bf16 %v207_v24, %v200_v23 }
  0xb4   :  { %v321_v32 = vpack.c.bf16 %v167_v26, %v160_v25 }
  0xba   :  { %1126 = vmatmul.mubr.bf16.gmra.mrb[76].mxu1 %v359_v35  ;;  %1223 = vmatmul.mubr.bf16.gmra.mrb[76].mxu0 %v305_v36  ;;  %v214_v35 = vld [vmem:[%s4777_s0 + $0x5d0] sm:$0xff]  ;;  %v221_v36 = vld [vmem:[%s4777_s0 + $0x608] sm:$0xff] }
  0xbb   :  { %1230 = vmatprep.mubr.bf16.mxu0 %v313_v37  ;;  %2871 = vmatprep.mubr.msk.bf16.mxu1 %vm763_vm0, %v258_v38  ;;  %v188_v37 = vld [vmem:[%s4777_s0 + $0x500] sm:$0xff]  ;;  %v195_v38 = vld [vmem:[%s4777_s0 + $0x538] sm:$0xff]  ;;  %v347_v44 = vpack.c.bf16 %v221_v36, %v214_v35 }
  0xbc   :  { %v335_v45 = vpack.c.bf16 %v195_v38, %v188_v37 }
  0xc2   :  { %1231 = vmatmul.mubr.bf16.gmra.mrb[80].mxu0 %v312_v47  ;;  %2872 = vmatmul.mubr.msk.bf16.vlgmr.msra.gmra.mrb[80].mxu1 %vm763_vm0, %v265_v48  ;;  %v342_v47 = vpack.c.bf16 %v209_v43, %v202_v42  ;;  %v228_v48 = vld [vmem:[%s4777_s0 + $0x640] sm:$0xff]  ;;  %v3072_v42 = vld [vmem:[%s4780_s3 + $0x28] sm:$0xff]  }
  0xc3   :  { %1238 = vmatprep.mubr.bf16.mxu0 %v320_v49  ;;  %2875 = vmatprep.mubr.msk.bf16.mxu1 %vm763_vm0, %v272_v50  ;;  %v235_v49 = vld [vmem:[%s4777_s0 + $0x678] sm:$0xff]  ;;  %v216_v50 = vld [vmem:[%s4777_s0 + $0x5e0] sm:$0xff] }
  0xc4   :  { %2904 = vmatpush3.bf16.msra.mxu1 %v3067_v40  ;;  %v354_v57 = vpack.c.bf16 %v235_v49, %v228_v48  ;;  %v349_v58 = vpack.c.bf16 %v223_v51, %v216_v50 }
  0xc5   :  { %2905 = vmatprep.subr.bf16.mxu1 %v3068_v53 }
  0xc8   :  { %2906 = vmatpush3.bf16.msra.mxu1 %v3068_v53 }
  0xc9   :  { %2907 = vmatprep.subr.bf16.mxu1 %v3069_v1 }
  0xca   :  { %1239 = vmatmul.mubr.bf16.gmra.mrb[84].mxu0 %v319_v59  ;;  %2876 = vmatmul.mubr.msk.bf16.gmra.mrb[84].mxu1 %vm763_vm0, %v279_v60  ;;  %v362_v59 = vpack.c.bf16 %v250_v54, %v243_v52  ;;  %v356_v60 = vpack.c.bf16 %v237_v56, %v230_v55  ;;  %v3073_v55 = vld [vmem:[%s4780_s3 + $0x30] sm:$0xff]   ;;  %v4169_v56 = vld [vmem:[%s4779_s2] ss:$0 sm:$0xff] }
  0xcb   :  { %1246 = vmatprep.mubr.bf16.mxu0 %v327_v61  ;;  %2879 = vmatprep.mubr.msk.bf16.mxu1 %vm763_vm0, %v286_v62  ;;  %v242_v61 = vld [vmem:[%s4777_s0 + $0x6b0] sm:$0xff]  ;;  %v249_v62 = vld [vmem:[%s4777_s0 + $0x6e8] sm:$0xff] }
  0xcc   :  { %v361_v6 = vpack.c.bf16 %v249_v62, %v242_v61  ;;  %2908 = vmatpush3.bf16.msra.mxu1 %v3069_v1 }
  0xcd   :  { %2909 = vmatprep.subr.bf16.mxu1 %v3070_v16 }
  0xd0   :  { %2910 = vmatpush3.bf16.msra.mxu1 %v3070_v16 }
  0xd1   :  { %2911 = vmatprep.subr.bf16.mxu1 %v3071_v29 }
  0xd2   :  { %1247 = vmatmul.mubr.bf16.gmra.mrb[88].mxu0 %v326_v7  ;;  %2880 = vmatmul.mubr.msk.bf16.gmra.mrb[88].mxu1 %vm763_vm0, %v293_v8  ;;  %v363_v7 = vpack.c.bf16 %v251_v0, %v244_v63 }
  0xd3   :  { %1254 = vmatprep.mubr.bf16.mxu0 %v334_v9  ;;  %2883 = vmatprep.mubr.msk.bf16.mxu1 %vm763_vm0, %v300_v10 }
  0xd4   :  { %2912 = vmatpush3.bf16.msra.mxu1 %v3071_v29 }
  0xd5   :  { %2913 = vmatprep.subr.bf16.mxu1 %v3072_v42 }
  0xd8   :  { %2914 = vmatpush3.bf16.msra.mxu1 %v3072_v42 }
  0xd9   :  { %2915 = vmatprep.subr.bf16.mxu1 %v3073_v55 }
  0xda   :  { %1255 = vmatmul.mubr.bf16.gmra.mrb[92].mxu0 %v333_v19  ;;  %2884 = vmatmul.mubr.msk.bf16.gmra.mrb[92].mxu1 %vm763_vm0, %v307_v20 }
  0xdb   :  { %1262 = vmatprep.mubr.bf16.mxu0 %v341_v21  ;;  %2887 = vmatprep.mubr.msk.bf16.mxu1 %vm763_vm0, %v314_v22 }
  0xdc   :  { %2916 = vmatpush3.bf16.msra.mxu1 %v3073_v55 }
  0xe2   :  { %1263 = vmatmul.mubr.bf16.gmra.mrb[96].mxu0 %v340_v31  ;;  %2888 = vmatmul.mubr.msk.bf16.gmra.mrb[96].mxu1 %vm763_vm0, %v321_v32 }
  0xe3   :  { %1270 = vmatprep.mubr.bf16.mxu0 %v348_v33  ;;  %2891 = vmatprep.mubr.msk.bf16.mxu1 %vm763_vm0, %v328_v34 }
  0xea   :  { %1271 = vmatmul.mubr.bf16.gmra.mrb[100].mxu0 %v347_v44  ;;  %2892 = vmatmul.mubr.msk.bf16.gmra.mrb[100].mxu1 %vm763_vm0, %v335_v45 }
  0xeb   :  { %1278 = vmatprep.mubr.bf16.mxu0 %v355_v46  ;;  %2895 = vmatprep.mubr.msk.bf16.mxu1 %vm763_vm0, %v342_v47 }
  0xf2   :  { %1279 = vmatmul.mubr.bf16.gmra.mrb[104].mxu0 %v354_v57  ;;  %2896 = vmatmul.mubr.msk.bf16.gmra.mrb[104].mxu1 %vm763_vm0, %v349_v58 }
  0xf3   :  { %1286 = vmatprep.mubr.bf16.mxu0 %v362_v59  ;;  %2899 = vmatprep.mubr.msk.bf16.mxu1 %vm763_vm0, %v356_v60 }
  0xf5   :  { %v2484_v2 = vpop.f32.mrb[0].mxu0  ;;  %v2556_v3 = vpop.f32.mrb[0].mxu1 }
  0xf6   :  { %v2485_v4 = vpop.f32.mrb[1].mxu0  ;;  %v2557_v5 = vpop.f32.mrb[1].mxu1 }
  0xf7   :  { %v4121_v8 = vadd.f32 %v2485_v4, %v2484_v2  ;;  %v4123_v9 = vadd.f32 %v2557_v5, %v2556_v3  ;;  %v2487_v10 = vpop.f32.mrb[2].mxu0  ;;  %v2559_v11 = vpop.f32.mrb[2].mxu1 }
  0xf8   :  { %v2488_v12 = vpop.f32.mrb[3].mxu0  ;;  %v2560_v13 = vpop.f32.mrb[3].mxu1 }
  0xf9   :  { %v4125_v14 = vadd.f32 %v2488_v12, %v2487_v10  ;;  %v4127_v15 = vadd.f32 %v2560_v13, %v2559_v11  ;;  %v847_v61 = vadd.f32 %v4121_v8, %v4169_v56  ;;  %v3074_v10 = vld [vmem:[%s4780_s3 + $0x38] sm:$0xff]  }
  0xfa   :  { %1287 = vmatmul.mubr.bf16.gmra.mrb[108].mxu0 %v361_v6  ;;  %2900 = vmatmul.mubr.msk.bf16.gmra.mrb[108].mxu1 %vm763_vm0, %v363_v7 }
  0xfb   :  { %v850_v4 = vadd.f32 %v4125_v14, %v4169_v56  ;;  %2917 = vmatprep.subr.bf16.mxu1 %v3074_v10 }
  0xfc   :  { %2918 = vmatpush3.bf16.msra.mxu1 %v3074_v10 }
  0xfd   :  { %v2490_v17 = vpop.f32.mrb[4].mxu0  ;;  %v2562_v18 = vpop.f32.mrb[4].mxu1 }
  0xfe   :  { %v2491_v19 = vpop.f32.mrb[5].mxu0  ;;  %v2563_v20 = vpop.f32.mrb[5].mxu1 }
  0xff   :  { %v4133_v21 = vadd.f32 %v2491_v19, %v2490_v17  ;;  %v4135_v22 = vadd.f32 %v2563_v20, %v2562_v18  ;;  %v2493_v23 = vpop.f32.mrb[6].mxu0  ;;  %v2565_v24 = vpop.f32.mrb[6].mxu1 }
 0x100   :  { %v2494_v25 = vpop.f32.mrb[7].mxu0  ;;  %v2566_v26 = vpop.f32.mrb[7].mxu1 }
 0x101   :  { %v4137_v27 = vadd.f32 %v2494_v25, %v2493_v23  ;;  %v4139_v28 = vadd.f32 %v2566_v26, %v2565_v24  ;;  %v855_v14 = vadd.f32 %v4133_v21, %v4169_v56 }
 0x103   :  { %v858_v25 = vadd.f32 %v4137_v27, %v4169_v56 }
 0x105   :  { %v2496_v30 = vpop.f32.mrb[8].mxu0  ;;  %v2568_v31 = vpop.f32.mrb[8].mxu1 }
 0x106   :  { %v2497_v32 = vpop.f32.mrb[9].mxu0  ;;  %v2569_v33 = vpop.f32.mrb[9].mxu1 }
 0x107   :  { %v4144_v34 = vadd.f32 %v2497_v32, %v2496_v30  ;;  %v4146_v35 = vadd.f32 %v2569_v33, %v2568_v31  ;;  %v2499_v36 = vpop.f32.mrb[10].mxu0  ;;  %v2571_v37 = vpop.f32.mrb[10].mxu1 }
 0x108   :  { %v2500_v38 = vpop.f32.mrb[11].mxu0  ;;  %v2572_v39 = vpop.f32.mrb[11].mxu1 }
 0x109   :  { %v4148_v40 = vadd.f32 %v2500_v38, %v2499_v36  ;;  %v4150_v41 = vadd.f32 %v2572_v39, %v2571_v37  ;;  %v863_v37 = vadd.f32 %v4144_v34, %v4169_v56 }
 0x10d   :  { %v2502_v43 = vpop.f32.mrb[12].mxu0  ;;  %v2574_v44 = vpop.f32.mrb[12].mxu1 }
 0x10e   :  { %v2503_v45 = vpop.f32.mrb[13].mxu0  ;;  %v2575_v46 = vpop.f32.mrb[13].mxu1 }
 0x10f   :  { %v4155_v47 = vadd.f32 %v2503_v45, %v2502_v43  ;;  %v4157_v48 = vadd.f32 %v2575_v46, %v2574_v44  ;;  %v2505_v49 = vpop.f32.mrb[14].mxu0  ;;  %v2577_v50 = vpop.f32.mrb[14].mxu1  ;;  %v866_v45 = vadd.f32 %v4148_v40, %v4169_v56 }
 0x110   :  { %v2506_v51 = vpop.f32.mrb[15].mxu0  ;;  %v2578_v52 = vpop.f32.mrb[15].mxu1 }
 0x111   :  { %v4159_v53 = vadd.f32 %v2506_v51, %v2505_v49  ;;  %v4161_v54 = vadd.f32 %v2578_v52, %v2577_v50 }
 0x115   :  { %v2508_v57 = vpop.f32.mrb[16].mxu0  ;;  %v2596_v58 = vpop.f32.mrb[16].mxu1 }
 0x116   :  { %v2509_v59 = vpop.f32.mrb[17].mxu0  ;;  %v2597_v60 = vpop.f32.mrb[17].mxu1 }
 0x117   :  { %v4173_v62 = vadd.f32 %v2509_v59, %v2508_v57  ;;  %v2598_v63 = vadd.f32 %v2597_v60, %v2596_v58  ;;  %v2511_v0 = vpop.f32.mrb[18].mxu0  ;;  %v2599_v1 = vpop.f32.mrb[18].mxu1  ;;  %v871_v58 = vadd.f32 %v4155_v47, %v4169_v56 }
 0x118   :  { %v2512_v2 = vpop.f32.mrb[19].mxu0  ;;  %v2600_v3 = vpop.f32.mrb[19].mxu1 }
 0x119   :  { %v4177_v5 = vadd.f32 %v2598_v63, %v847_v61  ;;  %v4179_v6 = vadd.f32 %v2512_v2, %v2511_v0  ;;  %v2601_v7 = vadd.f32 %v2600_v3, %v2599_v1  ;;  %v874_v1 = vadd.f32 %v4159_v53, %v4169_v56 }
 0x11b   :  { %v4184_v8 = vadd.f32 %v2601_v7, %v850_v4 }
 0x11d   :  { %v2514_v11 = vpop.f32.mrb[20].mxu0  ;;  %v2602_v12 = vpop.f32.mrb[20].mxu1 }
 0x11e   :  { %v2515_v13 = vpop.f32.mrb[21].mxu0  ;;  %v2603_v16 = vpop.f32.mrb[21].mxu1 }
 0x11f   :  { %v4188_v17 = vadd.f32 %v2515_v13, %v2514_v11  ;;  %v2604_v18 = vadd.f32 %v2603_v16, %v2602_v12  ;;  %v2517_v19 = vpop.f32.mrb[22].mxu0  ;;  %v2605_v20 = vpop.f32.mrb[22].mxu1  ;;  %v879_v13 = vadd.f32 %v4173_v62, %v4169_v56 }
 0x120   :  { %v2518_v23 = vpop.f32.mrb[23].mxu0  ;;  %v2606_v24 = vpop.f32.mrb[23].mxu1 }
 0x121   :  { %v4192_v26 = vadd.f32 %v2604_v18, %v855_v14  ;;  %v2519_v29 = vadd.f32 %v2518_v23, %v2517_v19  ;;  %v2607_v30 = vadd.f32 %v2606_v24, %v2605_v20  ;;  %v882_v23 = vadd.f32 %v4179_v6, %v4169_v56 }
 0x123   :  { %v4194_v31 = vadd.f32 %v2607_v30, %v858_v25 }
 0x125   :  { %v2520_v32 = vpop.f32.mrb[24].mxu0  ;;  %v2608_v33 = vpop.f32.mrb[24].mxu1 }
 0x126   :  { %v2521_v36 = vpop.f32.mrb[25].mxu0  ;;  %v2609_v21 = vpop.f32.mrb[25].mxu1 }
 0x127   :  { %v4198_v38 = vadd.f32 %v2521_v36, %v2520_v32  ;;  %v2610_v39 = vadd.f32 %v2609_v21, %v2608_v33  ;;  %v2523_v42 = vpop.f32.mrb[26].mxu0  ;;  %v2611_v43 = vpop.f32.mrb[26].mxu1 }
 0x128   :  { %v2524_v44 = vpop.f32.mrb[27].mxu0  ;;  %v2612_v27 = vpop.f32.mrb[27].mxu1 }
 0x129   :  { %v4202_v46 = vadd.f32 %v2610_v39, %v863_v37  ;;  %v2525_v49 = vadd.f32 %v2524_v44, %v2523_v42  ;;  %v2613_v50 = vadd.f32 %v2612_v27, %v2611_v43  ;;  %v887_v37 = vadd.f32 %v4188_v17, %v4169_v56 }
 0x12b   :  { %v4204_v51 = vadd.f32 %v2613_v50, %v866_v45  ;;  %v890_v45 = vadd.f32 %v2519_v29, %v4169_v56 }
 0x12d   :  { %v2526_v52 = vpop.f32.mrb[28].mxu0  ;;  %v2614_v55 = vpop.f32.mrb[28].mxu1 }
 0x12e   :  { %v2527_v57 = vpop.f32.mrb[29].mxu0  ;;  %v2615_v34 = vpop.f32.mrb[29].mxu1 }
 0x12f   :  { %v4208_v59 = vadd.f32 %v2527_v57, %v2526_v52  ;;  %v2616_v60 = vadd.f32 %v2615_v34, %v2614_v55  ;;  %v2529_v61 = vpop.f32.mrb[30].mxu0  ;;  %v2617_v63 = vpop.f32.mrb[30].mxu1 }
 0x130   :  { %v2530_v0 = vpop.f32.mrb[31].mxu0  ;;  %v2618_v40 = vpop.f32.mrb[31].mxu1 }
 0x131   :  { %v4212_v2 = vadd.f32 %v2616_v60, %v871_v58  ;;  %v2531_v3 = vadd.f32 %v2530_v0, %v2529_v61  ;;  %v2619_v4 = vadd.f32 %v2618_v40, %v2617_v63  ;;  %v895_v61 = vadd.f32 %v4198_v38, %v4169_v56 }
 0x133   :  { %v4214_v7 = vadd.f32 %v2619_v4, %v874_v1 }
 0x135   :  { %v2532_v10 = vpop.f32.mrb[32].mxu0  ;;  %v2620_v11 = vpop.f32.mrb[32].mxu1 }
 0x136   :  { %v2533_v12 = vpop.f32.mrb[33].mxu0  ;;  %v2621_v47 = vpop.f32.mrb[33].mxu1 }
 0x137   :  { %v4218_v16 = vadd.f32 %v2533_v12, %v2532_v10  ;;  %v2622_v14 = vadd.f32 %v2621_v47, %v2620_v11  ;;  %v2535_v18 = vpop.f32.mrb[34].mxu0  ;;  %v2623_v19 = vpop.f32.mrb[34].mxu1  ;;  %v898_v10 = vadd.f32 %v2525_v49, %v4169_v56 }
 0x138   :  { %v2536_v20 = vpop.f32.mrb[35].mxu0  ;;  %v2624_v53 = vpop.f32.mrb[35].mxu1 }
 0x139   :  { %v4222_v24 = vadd.f32 %v2622_v14, %v879_v13  ;;  %v2537_v25 = vadd.f32 %v2536_v20, %v2535_v18  ;;  %v2625_v30 = vadd.f32 %v2624_v53, %v2623_v19  ;;  %v903_v20 = vadd.f32 %v4208_v59, %v4169_v56 }
 0x13b   :  { %v4224_v32 = vadd.f32 %v2625_v30, %v882_v23 }
 0x13d   :  { %v2538_v33 = vpop.f32.mrb[36].mxu0  ;;  %v2626_v36 = vpop.f32.mrb[36].mxu1 }
 0x13e   :  { %v2539_v21 = vpop.f32.mrb[37].mxu0  ;;  %v2627_v62 = vpop.f32.mrb[37].mxu1 }
 0x13f   :  { %v4228_v39 = vadd.f32 %v2539_v21, %v2538_v33  ;;  %v2628_v42 = vadd.f32 %v2627_v62, %v2626_v36  ;;  %v2541_v43 = vpop.f32.mrb[38].mxu0  ;;  %v2629_v44 = vpop.f32.mrb[38].mxu1  ;;  %v906_v21 = vadd.f32 %v2531_v3, %v4169_v56  ;;  %v914_v3 = vadd.f32 %v2537_v25, %v4169_v56  ;;  %v3076_v25 = vld [vmem:[%s4782_s5 + $0x8] sm:$0xff]  }
 0x140   :  { %v2542_v27 = vpop.f32.mrb[39].mxu0  ;;  %v2630_v6 = vpop.f32.mrb[39].mxu1 }
 0x141   :  { %v4231_v50 = vadd.f32 %v2628_v42, %v887_v37  ;;  %v4233_v52 = vadd.f32 %v2542_v27, %v2541_v43  ;;  %v2631_v55 = vadd.f32 %v2630_v6, %v2629_v44 }
 0x143   :  { %v4235_v57 = vadd.f32 %v2631_v55, %v890_v45  ;;  %v911_v45 = vadd.f32 %v4218_v16, %v4169_v56  ;;  %v3075_v16 = vld [vmem:[%s4782_s5] sm:$0xff]  }
 0x144   :  { %2951 = vmatprep.subr.bf16.mxu0 %v3075_v16 }
 0x145   :  { %v2544_v34 = vpop.f32.mrb[40].mxu0  ;;  %v2632_v58 = vpop.f32.mrb[40].mxu1  ;;  %2952 = vmatpush3.bf16.msra.mxu0 %v3075_v16 }
 0x146   :  { %v2545_v60 = vpop.f32.mrb[41].mxu0  ;;  %v2633_v17 = vpop.f32.mrb[41].mxu1  ;;  %2953 = vmatprep.subr.bf16.mxu0 %v3076_v25 }
 0x147   :  { %v4239_v63 = vadd.f32 %v2545_v60, %v2544_v34  ;;  %v2634_v0 = vadd.f32 %v2633_v17, %v2632_v58  ;;  %v2547_v40 = vpop.f32.mrb[42].mxu0  ;;  %v2635_v1 = vpop.f32.mrb[42].mxu1 }
 0x148   :  { %v2548_v29 = vpop.f32.mrb[43].mxu0  ;;  %v2636_v4 = vpop.f32.mrb[43].mxu1 }
 0x149   :  { %v4242_v11 = vadd.f32 %v2634_v0, %v895_v61  ;;  %v4244_v12 = vadd.f32 %v2548_v29, %v2547_v40  ;;  %v2637_v47 = vadd.f32 %v2636_v4, %v2635_v1  ;;  %2954 = vmatpush3.bf16.msra.mxu0 %v3076_v25 }
 0x14b   :  { %v4246_v13 = vadd.f32 %v2637_v47, %v898_v10 }
 0x14d   :  { %v2550_v14 = vpop.f32.mrb[44].mxu0  ;;  %v2638_v18 = vpop.f32.mrb[44].mxu1 }
 0x14e   :  { %v2551_v19 = vpop.f32.mrb[45].mxu0  ;;  %v2639_v38 = vpop.f32.mrb[45].mxu1 }
 0x14f   :  { %v4250_v53 = vadd.f32 %v2551_v19, %v2550_v14  ;;  %v2640_v23 = vadd.f32 %v2639_v38, %v2638_v18  ;;  %v2553_v30 = vpop.f32.mrb[46].mxu0  ;;  %v2641_v33 = vpop.f32.mrb[46].mxu1 }
 0x150   :  { %v2554_v49 = vpop.f32.mrb[47].mxu0  ;;  %v2642_v36 = vpop.f32.mrb[47].mxu1 }
 0x151   :  { %v4253_v62 = vadd.f32 %v2640_v23, %v903_v20  ;;  %v4255_v37 = vadd.f32 %v2554_v49, %v2553_v30  ;;  %v2643_v42 = vadd.f32 %v2642_v36, %v2641_v33  ;;  %v3077_v30 = vld [vmem:[%s4782_s5 + $0x10] sm:$0xff]   ;;  %v922_v33 = vadd.f32 %v4233_v52, %v4169_v56  ;;  %v3078_v52 = vld [vmem:[%s4782_s5 + $0x18] sm:$0xff]  }
 0x152   :  { %2955 = vmatprep.subr.bf16.mxu0 %v3077_v30 }
 0x153   :  { %v4257_v43 = vadd.f32 %v2643_v42, %v906_v21  ;;  %2956 = vmatpush3.bf16.msra.mxu0 %v3077_v30 }
 0x154   :  { %2957 = vmatprep.subr.bf16.mxu0 %v3078_v52 }
 0x155   :  { %v2644_v44 = vpop.f32.mrb[48].mxu1  ;;  %v2708_v27 = vpop.f32.mrb[48].mxu0 }
 0x156   :  { %v2645_v6 = vpop.f32.mrb[49].mxu1  ;;  %v2709_v59 = vpop.f32.mrb[49].mxu0 }
 0x157   :  { %v2646_v55 = vadd.f32 %v2645_v6, %v2644_v44  ;;  %v2710_v34 = vadd.f32 %v2709_v59, %v2708_v27  ;;  %v2647_v58 = vpop.f32.mrb[50].mxu1  ;;  %v2711_v60 = vpop.f32.mrb[50].mxu0  ;;  %2958 = vmatpush3.bf16.msra.mxu0 %v3078_v52 }
 0x158   :  { %v2648_v17 = vpop.f32.mrb[51].mxu1  ;;  %v2712_v61 = vpop.f32.mrb[51].mxu0 }
 0x159   :  { %v4262_v0 = vadd.f32 %v2646_v55, %v911_v45  ;;  %v2649_v40 = vadd.f32 %v2648_v17, %v2647_v58  ;;  %v2713_v1 = vadd.f32 %v2712_v61, %v2711_v60  ;;  %v4265_v29 = vadd.f32 %v2710_v34, %v4177_v5 }
 0x15a   :  { %v919_v5 = vadd.f32 %v4228_v39, %v4169_v56  ;;  %v930_v61 = vadd.f32 %v4244_v12, %v4169_v56  ;;  %v3080_v12 = vld [vmem:[%s4782_s5 + $0x28] sm:$0xff]  }
 0x15b   :  { %v4267_v4 = vadd.f32 %v2649_v40, %v914_v3  ;;  %v4270_v10 = vadd.f32 %v2713_v1, %v4184_v8 }
 0x15d   :  { %v2650_v47 = vpop.f32.mrb[52].mxu1  ;;  %v2714_v14 = vpop.f32.mrb[52].mxu0 }
 0x15e   :  { %v2651_v18 = vpop.f32.mrb[53].mxu1  ;;  %v2715_v19 = vpop.f32.mrb[53].mxu0 }
 0x15f   :  { %v2652_v38 = vadd.f32 %v2651_v18, %v2650_v47  ;;  %v2716_v8 = vadd.f32 %v2715_v19, %v2714_v14  ;;  %v2653_v20 = vpop.f32.mrb[54].mxu1  ;;  %v2717_v23 = vpop.f32.mrb[54].mxu0 }
 0x160   :  { %v2654_v49 = vpop.f32.mrb[55].mxu1  ;;  %v2718_v36 = vpop.f32.mrb[55].mxu0 }
 0x161   :  { %v4285_v21 = vadd.f32 %v2652_v38, %v919_v5  ;;  %v2655_v42 = vadd.f32 %v2654_v49, %v2653_v20  ;;  %v2719_v44 = vadd.f32 %v2718_v36, %v2717_v23  ;;  %v4288_v39 = vadd.f32 %v2716_v8, %v4192_v26 }
 0x162   :  { %v927_v26 = vadd.f32 %v4239_v63, %v4169_v56  ;;  %v938_v49 = vadd.f32 %v4255_v37, %v4169_v56  ;;  %v3082_v37 = vld [vmem:[%s4782_s5 + $0x38] sm:$0xff]  }
 0x163   :  { %v4290_v27 = vadd.f32 %v2655_v42, %v922_v33  ;;  %v4293_v6 = vadd.f32 %v2719_v44, %v4194_v31  ;;  %v3079_v31 = vld [vmem:[%s4782_s5 + $0x20] sm:$0xff]  }
 0x164   :  { %2959 = vmatprep.subr.bf16.mxu0 %v3079_v31 }
 0x165   :  { %v2656_v59 = vpop.f32.mrb[56].mxu1  ;;  %v2720_v45 = vpop.f32.mrb[56].mxu0  ;;  %2960 = vmatpush3.bf16.msra.mxu0 %v3079_v31 }
 0x166   :  { %v2657_v55 = vpop.f32.mrb[57].mxu1  ;;  %v2721_v34 = vpop.f32.mrb[57].mxu0  ;;  %2961 = vmatprep.subr.bf16.mxu0 %v3080_v12 }
 0x167   :  { %v2658_v58 = vadd.f32 %v2657_v55, %v2656_v59  ;;  %v2722_v60 = vadd.f32 %v2721_v34, %v2720_v45  ;;  %v2659_v3 = vpop.f32.mrb[58].mxu1  ;;  %v2723_v17 = vpop.f32.mrb[58].mxu0 }
 0x168   :  { %v2660_v40 = vpop.f32.mrb[59].mxu1  ;;  %v2724_v1 = vpop.f32.mrb[59].mxu0 }
 0x169   :  { %v4305_v16 = vadd.f32 %v2658_v58, %v927_v26  ;;  %v2661_v25 = vadd.f32 %v2660_v40, %v2659_v3  ;;  %v2725_v47 = vadd.f32 %v2724_v1, %v2723_v17  ;;  %v4308_v63 = vadd.f32 %v2722_v60, %v4202_v46  ;;  %2962 = vmatpush3.bf16.msra.mxu0 %v3080_v12 }
 0x16a   :  { %v935_v46 = vadd.f32 %v4250_v53, %v4169_v56 }
 0x16b   :  { %v4310_v14 = vadd.f32 %v2661_v25, %v930_v61  ;;  %v4313_v18 = vadd.f32 %v2725_v47, %v4204_v51  ;;  %v3081_v51 = vld [vmem:[%s4782_s5 + $0x30] sm:$0xff]  }
 0x16c   :  { %2963 = vmatprep.subr.bf16.mxu0 %v3081_v51 }
 0x16d   :  { %v2662_v19 = vpop.f32.mrb[60].mxu1  ;;  %v2726_v5 = vpop.f32.mrb[60].mxu0  ;;  %2964 = vmatpush3.bf16.msra.mxu0 %v3081_v51 }
 0x16e   :  { %v2663_v38 = vpop.f32.mrb[61].mxu1  ;;  %v2727_v8 = vpop.f32.mrb[61].mxu0  ;;  %2965 = vmatprep.subr.bf16.mxu0 %v3082_v37 }
 0x16f   :  { %v2664_v20 = vadd.f32 %v2663_v38, %v2662_v19  ;;  %v2728_v23 = vadd.f32 %v2727_v8, %v2726_v5  ;;  %v2665_v30 = vpop.f32.mrb[62].mxu1  ;;  %v2729_v33 = vpop.f32.mrb[62].mxu0 }
 0x170   :  { %v2666_v36 = vpop.f32.mrb[63].mxu1  ;;  %v2730_v42 = vpop.f32.mrb[63].mxu0 }
 0x171   :  { %v4325_v44 = vadd.f32 %v2664_v20, %v935_v46  ;;  %v2667_v52 = vadd.f32 %v2666_v36, %v2665_v30  ;;  %v2731_v59 = vadd.f32 %v2730_v42, %v2729_v33  ;;  %v4328_v53 = vadd.f32 %v2728_v23, %v4212_v2  ;;  %2966 = vmatpush3.bf16.msra.mxu0 %v3082_v37 }
 0x172   :  { %v943_v2 = vadd.f32 %v4123_v9, %v4169_v56 }
 0x173   :  { %v4330_v45 = vadd.f32 %v2667_v52, %v938_v49  ;;  %v4333_v55 = vadd.f32 %v2731_v59, %v4214_v7  ;;  %v946_v7 = vadd.f32 %v4127_v15, %v4169_v56  ;;  %v951_v15 = vadd.f32 %v4135_v22, %v4169_v56 }
 0x175   :  { %v2668_v34 = vpop.f32.mrb[64].mxu1  ;;  %v2732_v26 = vpop.f32.mrb[64].mxu0 }
 0x176   :  { %v2669_v58 = vpop.f32.mrb[65].mxu1  ;;  %v2733_v60 = vpop.f32.mrb[65].mxu0 }
 0x177   :  { %v2670_v3 = vadd.f32 %v2669_v58, %v2668_v34  ;;  %v2734_v17 = vadd.f32 %v2733_v60, %v2732_v26  ;;  %v2671_v31 = vpop.f32.mrb[66].mxu1  ;;  %v2735_v61 = vpop.f32.mrb[66].mxu0 }
 0x178   :  { %v2672_v40 = vpop.f32.mrb[67].mxu1  ;;  %v2736_v1 = vpop.f32.mrb[67].mxu0 }
 0x179   :  { %v4342_v25 = vadd.f32 %v2670_v3, %v943_v2  ;;  %v2673_v47 = vadd.f32 %v2672_v40, %v2671_v31  ;;  %v2737_v12 = vadd.f32 %v2736_v1, %v2735_v61  ;;  %v4345_v19 = vadd.f32 %v2734_v17, %v4222_v24 }
 0x17a   :  { %v954_v24 = vadd.f32 %v4139_v28, %v4169_v56  ;;  %v959_v28 = vadd.f32 %v4146_v35, %v4169_v56 }
 0x17b   :  { %v4347_v5 = vadd.f32 %v2673_v47, %v946_v7  ;;  %v4350_v9 = vadd.f32 %v2737_v12, %v4224_v32 }
 0x17d   :  { %v2674_v38 = vpop.f32.mrb[68].mxu1  ;;  %v2738_v8 = vpop.f32.mrb[68].mxu0 }
 0x17e   :  { %v2675_v46 = vpop.f32.mrb[69].mxu1  ;;  %v2739_v20 = vpop.f32.mrb[69].mxu0 }
 0x17f   :  { %v2676_v23 = vadd.f32 %v2675_v46, %v2674_v38  ;;  %v2740_v30 = vadd.f32 %v2739_v20, %v2738_v8  ;;  %v2677_v33 = vpop.f32.mrb[70].mxu1  ;;  %v2741_v51 = vpop.f32.mrb[70].mxu0 }
 0x180   :  { %v2678_v49 = vpop.f32.mrb[71].mxu1  ;;  %v2742_v36 = vpop.f32.mrb[71].mxu0 }
 0x181   :  { %v4356_v42 = vadd.f32 %v2676_v23, %v951_v15  ;;  %v2679_v32 = vadd.f32 %v2678_v49, %v2677_v33  ;;  %v2743_v52 = vadd.f32 %v2742_v36, %v2741_v51  ;;  %v4359_v59 = vadd.f32 %v2740_v30, %v4231_v50 }
 0x182   :  { %v962_v50 = vadd.f32 %v4150_v41, %v4169_v56  ;;  %v967_v41 = vadd.f32 %v4157_v48, %v4169_v56 }
 0x183   :  { %v4361_v37 = vadd.f32 %v2679_v32, %v954_v24  ;;  %v4364_v22 = vadd.f32 %v2743_v52, %v4235_v57 }
 0x185   :  { %v2680_v34 = vpop.f32.mrb[72].mxu1  ;;  %v2744_v26 = vpop.f32.mrb[72].mxu0 }
 0x186   :  { %v2681_v58 = vpop.f32.mrb[73].mxu1  ;;  %v2745_v60 = vpop.f32.mrb[73].mxu0 }
 0x187   :  { %v2682_v2 = vadd.f32 %v2681_v58, %v2680_v34  ;;  %v2746_v3 = vadd.f32 %v2745_v60, %v2744_v26  ;;  %v2683_v17 = vpop.f32.mrb[74].mxu1  ;;  %v2747_v31 = vpop.f32.mrb[74].mxu0 }
 0x188   :  { %v2684_v61 = vpop.f32.mrb[75].mxu1  ;;  %v2748_v7 = vpop.f32.mrb[75].mxu0 }
 0x189   :  { %v4370_v40 = vadd.f32 %v2682_v2, %v959_v28  ;;  %v2685_v57 = vadd.f32 %v2684_v61, %v2683_v17  ;;  %v2749_v1 = vadd.f32 %v2748_v7, %v2747_v31  ;;  %v4373_v47 = vadd.f32 %v2746_v3, %v4242_v11 }
 0x18a   :  { %v970_v11 = vadd.f32 %v4161_v54, %v4169_v56 }
 0x18b   :  { %v4375_v12 = vadd.f32 %v2685_v57, %v962_v50  ;;  %v4378_v35 = vadd.f32 %v2749_v1, %v4246_v13 }
 0x18d   :  { %v2686_v38 = vpop.f32.mrb[76].mxu1  ;;  %v2750_v8 = vpop.f32.mrb[76].mxu0 }
 0x18e   :  { %v2687_v46 = vpop.f32.mrb[77].mxu1  ;;  %v2751_v20 = vpop.f32.mrb[77].mxu0 }
 0x18f   :  { %v2688_v15 = vadd.f32 %v2687_v46, %v2686_v38  ;;  %v2752_v23 = vadd.f32 %v2751_v20, %v2750_v8  ;;  %v2689_v30 = vpop.f32.mrb[78].mxu1  ;;  %v2753_v33 = vpop.f32.mrb[78].mxu0 }
 0x190   :  { %v2690_v51 = vpop.f32.mrb[79].mxu1  ;;  %v2754_v24 = vpop.f32.mrb[79].mxu0 }
 0x191   :  { %v4384_v49 = vadd.f32 %v2688_v15, %v967_v41  ;;  %v2691_v13 = vadd.f32 %v2690_v51, %v2689_v30  ;;  %v2755_v36 = vadd.f32 %v2754_v24, %v2753_v33  ;;  %v4387_v32 = vadd.f32 %v2752_v23, %v4253_v62 }
 0x193   :  { %v4389_v52 = vadd.f32 %v2691_v13, %v970_v11  ;;  %v4392_v48 = vadd.f32 %v2755_v36, %v4257_v43 }
 0x195   :  { %v2756_v34 = vpop.f32.mrb[80].mxu0  ;;  %v2873_v26 = vpop.f32.mrb[80].mxu1 }
 0x196   :  { %v1338_v58 = vadd.f32 %v2873_v26, %v4288_v39  ;;  %v2757_v60 = vpop.f32.mrb[81].mxu0  ;;  %v1329_v54 = vpop.f32.mrb[81].mxu1 }
 0x197   :  { %v2758_v56 = vadd.f32 %v2757_v60, %v2756_v34  ;;  %v1330_v28 = vadd.f32 %v1329_v54, %v4265_v29  ;;  %v2759_v2 = vpop.f32.mrb[82].mxu0  ;;  %v2874_v3 = vpop.f32.mrb[82].mxu1 }
 0x198   :  { %v1341_v17 = vadd.f32 %v2874_v3, %v4293_v6  ;;  %v2760_v62 = vpop.f32.mrb[83].mxu0  ;;  %v1332_v31 = vpop.f32.mrb[83].mxu1  ;;  %v1458_v7 = vmax.f32 %v1338_v58, 0.0 }
 0x199   :  { %v2761_v50 = vadd.f32 %v2760_v62, %v2759_v2  ;;  %v1333_v61 = vadd.f32 %v1332_v31, %v4270_v10  ;;  %v4399_v43 = vadd.f32 %v2758_v56, %v4262_v0  ;;  %v1456_v39 = vmax.f32 %v1330_v28, 0.0 }
 0x19a   :  { %v1459_v57 = vmax.f32 %v1341_v17, 0.0 }
 0x19b   :  { %v1457_v1 = vmax.f32 %v1333_v61, 0.0  ;;  %v4402_v38 = vadd.f32 %v2761_v50, %v4267_v4 }
 0x19c   :  { %v1489_v29 = vpack.c.bf16 %v1459_v57, %v1458_v7 }
 0x19d   :  { %v1488_v8 = vpack.c.bf16 %v1457_v1, %v1456_v39  ;;  %v2762_v46 = vpop.f32.mrb[84].mxu0  ;;  %v2877_v20 = vpop.f32.mrb[84].mxu1 }
 0x19e   :  { %v1354_v6 = vadd.f32 %v2877_v20, %v4328_v53  ;;  %v2763_v41 = vpop.f32.mrb[85].mxu0  ;;  %v1345_v15 = vpop.f32.mrb[85].mxu1 }
 0x19f   :  { %v2764_v23 = vadd.f32 %v2763_v41, %v2762_v46  ;;  %v1346_v10 = vadd.f32 %v1345_v15, %v4308_v63  ;;  %v2765_v0 = vpop.f32.mrb[86].mxu0  ;;  %v2878_v30 = vpop.f32.mrb[86].mxu1  ;;  %2919 = vmatprep.mubr.bf16.mxu1 %v1488_v8 }
 0x1a0   :  { %v1357_v33 = vadd.f32 %v2878_v30, %v4333_v55  ;;  %v2766_v11 = vpop.f32.mrb[87].mxu0  ;;  %v1348_v51 = vpop.f32.mrb[87].mxu1  ;;  %2920 = vmatmul.mubr.bf16.vlgmr.msra.gmra.mrb[112].mxu1 %v1489_v29  ;;  %v1462_v36 = vmax.f32 %v1354_v6, 0.0 }
 0x1a1   :  { %v2767_v4 = vadd.f32 %v2766_v11, %v2765_v0  ;;  %v1349_v24 = vadd.f32 %v1348_v51, %v4313_v18  ;;  %v1241_v13 = vadd.f32 %v2764_v23, %v4285_v21  ;;  %v1460_v34 = vmax.f32 %v1346_v10, 0.0 }
 0x1a2   :  { %v1463_v53 = vmax.f32 %v1357_v33, 0.0 }
 0x1a3   :  { %v1461_v26 = vmax.f32 %v1349_v24, 0.0  ;;  %v1244_v58 = vadd.f32 %v2767_v4, %v4290_v27 }
 0x1a4   :  { %v1491_v63 = vpack.c.bf16 %v1463_v53, %v1462_v36 }
 0x1a5   :  { %v1490_v60 = vpack.c.bf16 %v1461_v26, %v1460_v34  ;;  %v2768_v54 = vpop.f32.mrb[88].mxu0  ;;  %v2881_v56 = vpop.f32.mrb[88].mxu1 }
 0x1a6   :  { %v1370_v55 = vadd.f32 %v2881_v56, %v4359_v59  ;;  %v2769_v28 = vpop.f32.mrb[89].mxu0  ;;  %v1361_v2 = vpop.f32.mrb[89].mxu1 }
 0x1a7   :  { %v2770_v3 = vadd.f32 %v2769_v28, %v2768_v54  ;;  %v1362_v17 = vadd.f32 %v1361_v2, %v4345_v19  ;;  %v2771_v18 = vpop.f32.mrb[90].mxu0  ;;  %v2882_v62 = vpop.f32.mrb[90].mxu1  ;;  %2923 = vmatprep.mubr.bf16.mxu1 %v1490_v60 }
 0x1a8   :  { %v1373_v21 = vadd.f32 %v2882_v62, %v4364_v22  ;;  %v2772_v31 = vpop.f32.mrb[91].mxu0  ;;  %v1364_v50 = vpop.f32.mrb[91].mxu1  ;;  %2924 = vmatmul.mubr.bf16.gmra.mrb[116].mxu1 %v1491_v63  ;;  %v1466_v57 = vmax.f32 %v1370_v55, 0.0 }
 0x1a9   :  { %v2773_v27 = vadd.f32 %v2772_v31, %v2771_v18  ;;  %v1365_v61 = vadd.f32 %v1364_v50, %v4350_v9  ;;  %v1249_v7 = vadd.f32 %v2770_v3, %v4305_v16  ;;  %v1464_v39 = vmax.f32 %v1362_v17, 0.0 }
 0x1aa   :  { %v1467_v59 = vmax.f32 %v1373_v21, 0.0 }
 0x1ab   :  { %v1465_v1 = vmax.f32 %v1365_v61, 0.0  ;;  %v4416_v29 = vadd.f32 %v2773_v27, %v4310_v14 }
 0x1ac   :  { %v1493_v19 = vpack.c.bf16 %v1467_v59, %v1466_v57 }
 0x1ad   :  { %v1492_v8 = vpack.c.bf16 %v1465_v1, %v1464_v39  ;;  %v2774_v46 = vpop.f32.mrb[92].mxu0  ;;  %v2885_v20 = vpop.f32.mrb[92].mxu1 }
 0x1ae   :  { %v1386_v22 = vadd.f32 %v2885_v20, %v4387_v32  ;;  %v2775_v6 = vpop.f32.mrb[93].mxu0  ;;  %v1377_v41 = vpop.f32.mrb[93].mxu1 }
 0x1af   :  { %v2776_v15 = vadd.f32 %v2775_v6, %v2774_v46  ;;  %v1378_v9 = vadd.f32 %v1377_v41, %v4373_v47  ;;  %v2777_v23 = vpop.f32.mrb[94].mxu0  ;;  %v2886_v16 = vpop.f32.mrb[94].mxu1  ;;  %2927 = vmatprep.mubr.bf16.mxu1 %v1492_v8 }
 0x1b0   :  { %v1389_v10 = vadd.f32 %v2886_v16, %v4392_v48  ;;  %v2778_v0 = vpop.f32.mrb[95].mxu0  ;;  %v1380_v30 = vpop.f32.mrb[95].mxu1  ;;  %2928 = vmatmul.mubr.bf16.gmra.mrb[120].mxu1 %v1493_v19  ;;  %v1470_v51 = vmax.f32 %v1386_v22, 0.0 }
 0x1b1   :  { %v2779_v14 = vadd.f32 %v2778_v0, %v2777_v23  ;;  %v1381_v33 = vadd.f32 %v1380_v30, %v4378_v35  ;;  %v1257_v11 = vadd.f32 %v2776_v15, %v4325_v44  ;;  %v1468_v4 = vmax.f32 %v1378_v9, 0.0 }
 0x1b2   :  { %v1471_v32 = vmax.f32 %v1389_v10, 0.0 }
 0x1b3   :  { %v1469_v24 = vmax.f32 %v1381_v33, 0.0  ;;  %v1260_v36 = vadd.f32 %v2779_v14, %v4330_v45 }
 0x1b4   :  { %v1495_v47 = vpack.c.bf16 %v1471_v32, %v1470_v51 }
 0x1b5   :  { %v1494_v53 = vpack.c.bf16 %v1469_v24, %v1468_v4  ;;  %v2780_v34 = vpop.f32.mrb[96].mxu0  ;;  %v2889_v26 = vpop.f32.mrb[96].mxu1 }
 0x1b6   :  { %v1402_v63 = vadd.f32 %v2889_v26, %v1241_v13  ;;  %v2781_v48 = vpop.f32.mrb[97].mxu0  ;;  %v1393_v60 = vpop.f32.mrb[97].mxu1 }
 0x1b7   :  { %v2782_v54 = vadd.f32 %v2781_v48, %v2780_v34  ;;  %v1394_v56 = vadd.f32 %v1393_v60, %v4399_v43  ;;  %v2783_v55 = vpop.f32.mrb[98].mxu0  ;;  %v2890_v35 = vpop.f32.mrb[98].mxu1  ;;  %2931 = vmatprep.mubr.bf16.mxu1 %v1494_v53 }
 0x1b8   :  { %v1405_v44 = vadd.f32 %v2890_v35, %v1244_v58  ;;  %v2784_v28 = vpop.f32.mrb[99].mxu0  ;;  %v1396_v2 = vpop.f32.mrb[99].mxu1  ;;  %2932 = vmatmul.mubr.bf16.gmra.mrb[124].mxu1 %v1495_v47  ;;  %v1474_v18 = vmax.f32 %v1402_v63, 0.0 }
 0x1b9   :  { %v2785_v3 = vadd.f32 %v2784_v28, %v2783_v55  ;;  %v1397_v45 = vadd.f32 %v1396_v2, %v4402_v38  ;;  %v1265_v17 = vadd.f32 %v2782_v54, %v4342_v25  ;;  %v1472_v13 = vmax.f32 %v1394_v56, 0.0 }
 0x1ba   :  { %v1475_v62 = vmax.f32 %v1405_v44, 0.0 }
 0x1bb   :  { %v1473_v21 = vmax.f32 %v1397_v45, 0.0  ;;  %v1268_v31 = vadd.f32 %v2785_v3, %v4347_v5 }
 0x1bc   :  { %v1497_v50 = vpack.c.bf16 %v1475_v62, %v1474_v18 }
 0x1bd   :  { %v1496_v43 = vpack.c.bf16 %v1473_v21, %v1472_v13  ;;  %v2786_v27 = vpop.f32.mrb[100].mxu0  ;;  %v2893_v61 = vpop.f32.mrb[100].mxu1 }
 0x1be   :  { %v1418_v57 = vadd.f32 %v2893_v61, %v1257_v11  ;;  %v2787_v58 = vpop.f32.mrb[101].mxu0  ;;  %v1409_v59 = vpop.f32.mrb[101].mxu1 }
 0x1bf   :  { %v2788_v39 = vadd.f32 %v2787_v58, %v2786_v27  ;;  %v1410_v1 = vadd.f32 %v1409_v59, %v1249_v7  ;;  %v2789_v19 = vpop.f32.mrb[102].mxu0  ;;  %v2894_v8 = vpop.f32.mrb[102].mxu1  ;;  %2935 = vmatprep.mubr.bf16.mxu1 %v1496_v43  ;;  %v4438_v59 = vld [vmem:[%s4781_s4] ss:$0 sm:$0xff] }
 0x1c0   :  { %v1421_v38 = vadd.f32 %v2894_v8, %v1260_v36  ;;  %v2790_v25 = vpop.f32.mrb[103].mxu0  ;;  %v1412_v46 = vpop.f32.mrb[103].mxu1  ;;  %2936 = vmatmul.mubr.bf16.gmra.mrb[128].mxu1 %v1497_v50  ;;  %v1478_v6 = vmax.f32 %v1418_v57, 0.0 }
 0x1c1   :  { %v2791_v20 = vadd.f32 %v2790_v25, %v2789_v19  ;;  %v1413_v22 = vadd.f32 %v1412_v46, %v4416_v29  ;;  %v1273_v5 = vadd.f32 %v2788_v39, %v4356_v42  ;;  %v1476_v15 = vmax.f32 %v1410_v1, 0.0 }
 0x1c2   :  { %v1479_v41 = vmax.f32 %v1421_v38, 0.0 }
 0x1c3   :  { %v1477_v9 = vmax.f32 %v1413_v22, 0.0  ;;  %v1276_v23 = vadd.f32 %v2791_v20, %v4361_v37 }
 0x1c4   :  { %v1499_v16 = vpack.c.bf16 %v1479_v41, %v1478_v6 }
 0x1c5   :  { %v1498_v7 = vpack.c.bf16 %v1477_v9, %v1476_v15  ;;  %v2792_v10 = vpop.f32.mrb[104].mxu0  ;;  %v2897_v0 = vpop.f32.mrb[104].mxu1 }
 0x1c6   :  { %v1434_v30 = vadd.f32 %v2897_v0, %v1273_v5  ;;  %v2793_v14 = vpop.f32.mrb[105].mxu0  ;;  %v1425_v33 = vpop.f32.mrb[105].mxu1 }
 0x1c7   :  { %v2794_v11 = vadd.f32 %v2793_v14, %v2792_v10  ;;  %v1426_v51 = vadd.f32 %v1425_v33, %v1265_v17  ;;  %v2795_v32 = vpop.f32.mrb[106].mxu0  ;;  %v2898_v4 = vpop.f32.mrb[106].mxu1  ;;  %2939 = vmatprep.mubr.bf16.mxu1 %v1498_v7 }
 0x1c8   :  { %v1437_v29 = vadd.f32 %v2898_v4, %v1276_v23  ;;  %v2796_v42 = vpop.f32.mrb[107].mxu0  ;;  %v1428_v24 = vpop.f32.mrb[107].mxu1  ;;  %2940 = vmatmul.mubr.bf16.gmra.mrb[132].mxu1 %v1499_v16  ;;  %v1482_v53 = vmax.f32 %v1434_v30, 0.0 }
 0x1c9   :  { %v2797_v36 = vadd.f32 %v2796_v42, %v2795_v32  ;;  %v1429_v47 = vadd.f32 %v1428_v24, %v1268_v31  ;;  %v1281_v37 = vadd.f32 %v2794_v11, %v4370_v40  ;;  %v1480_v26 = vmax.f32 %v1426_v51, 0.0 }
 0x1ca   :  { %v1483_v34 = vmax.f32 %v1437_v29, 0.0 }
 0x1cb   :  { %v1481_v63 = vmax.f32 %v1429_v47, 0.0  ;;  %v1284_v48 = vadd.f32 %v2797_v36, %v4375_v12 }
 0x1cc   :  { %v1501_v60 = vpack.c.bf16 %v1483_v34, %v1482_v53 }
 0x1cd   :  { %v1500_v54 = vpack.c.bf16 %v1481_v63, %v1480_v26  ;;  %v2798_v56 = vpop.f32.mrb[108].mxu0  ;;  %v2901_v55 = vpop.f32.mrb[108].mxu1 }
 0x1ce   :  { %v2799_v35 = vpop.f32.mrb[109].mxu0  ;;  %v1441_v44 = vpop.f32.mrb[109].mxu1 }
 0x1cf   :  { %v2800_v28 = vadd.f32 %v2799_v35, %v2798_v56  ;;  %v1442_v2 = vadd.f32 %v1441_v44, %v1281_v37  ;;  %v2801_v3 = vpop.f32.mrb[110].mxu0  ;;  %v2902_v45 = vpop.f32.mrb[110].mxu1  ;;  %2943 = vmatprep.mubr.bf16.mxu1 %v1500_v54 }
 0x1d0   :  { %v2802_v17 = vpop.f32.mrb[111].mxu0  ;;  %v1444_v18 = vpop.f32.mrb[111].mxu1  ;;  %2944 = vmatmul.mubr.bf16.gmra.mrb[136].mxu1 %v1501_v60 }
 0x1d1   :  { %v1289_v40 = vadd.f32 %v2800_v28, %v4384_v49  ;;  %v2803_v62 = vadd.f32 %v2802_v17, %v2801_v3  ;;  %v1445_v13 = vadd.f32 %v1444_v18, %v1284_v48  ;;  %v1484_v12 = vmax.f32 %v1442_v2, 0.0 }
 0x1d3   :  { %v1450_v21 = vadd.f32 %v2901_v55, %v1289_v40  ;;  %v1292_v31 = vadd.f32 %v2803_v62, %v4389_v52  ;;  %v1485_v50 = vmax.f32 %v1445_v13, 0.0 }
 0x1d5   :  { %v1453_v43 = vadd.f32 %v2902_v45, %v1292_v31  ;;  %v1502_v27 = vpack.c.bf16 %v1485_v50, %v1484_v12  ;;  %v1486_v61 = vmax.f32 %v1450_v21, 0.0 }
 0x1d7   :  { %v1487_v57 = vmax.f32 %v1453_v43, 0.0  ;;  %2947 = vmatprep.mubr.bf16.mxu1 %v1502_v27 }
 0x1d9   :  { %v1503_v58 = vpack.c.bf16 %v1487_v57, %v1486_v61 }
 0x1db   :  { %2948 = vmatmul.mubr.bf16.gmra.mrb[140].mxu1 %v1503_v58 }
 0x273   :  { %v2921_v49 = vpop.f32.mrb[112].mxu1 }
 0x274   :  { %v1618_v39 = vadd.f32 %v2921_v49, %v4438_v59  ;;  %v1609_v1 = vpop.f32.mrb[113].mxu1 }
 0x275   :  { %v1610_v19 = vadd.f32 %v4438_v59, %v1609_v1  ;;  %v2922_v52 = vpop.f32.mrb[114].mxu1 }
 0x276   :  { %v1621_v8 = vadd.f32 %v2922_v52, %v4438_v59  ;;  %v1612_v38 = vpop.f32.mrb[115].mxu1  ;;  %v1738_v46 = vmax.f32 %v1618_v39, 0.0 }
 0x277   :  { %v1613_v25 = vadd.f32 %v4438_v59, %v1612_v38  ;;  %v1736_v22 = vmax.f32 %v1610_v19, 0.0 }
 0x278   :  { %v1739_v20 = vmax.f32 %v1621_v8, 0.0 }
 0x279   :  { %v1737_v5 = vmax.f32 %v1613_v25, 0.0 }
 0x27a   :  { %v1769_v6 = vpack.c.bf16 %v1739_v20, %v1738_v46 }
 0x27b   :  { %v1768_v41 = vpack.c.bf16 %v1737_v5, %v1736_v22  ;;  %v2925_v15 = vpop.f32.mrb[116].mxu1 }
 0x27c   :  { %v1634_v9 = vadd.f32 %v2925_v15, %v4438_v59  ;;  %v1625_v23 = vpop.f32.mrb[117].mxu1 }
 0x27d   :  { %v1626_v16 = vadd.f32 %v4438_v59, %v1625_v23  ;;  %v2926_v7 = vpop.f32.mrb[118].mxu1  ;;  %2967 = vmatprep.mubr.bf16.mxu0 %v1768_v41 }
 0x27e   :  { %v1637_v10 = vadd.f32 %v2926_v7, %v4438_v59  ;;  %v1628_v0 = vpop.f32.mrb[119].mxu1  ;;  %2968 = vmatmul.mubr.bf16.vlgmr.msra.gmra.mrb[112].mxu0 %v1769_v6  ;;  %v1742_v14 = vmax.f32 %v1634_v9, 0.0 }
 0x27f   :  { %v1629_v30 = vadd.f32 %v4438_v59, %v1628_v0  ;;  %v1740_v11 = vmax.f32 %v1626_v16, 0.0 }
 0x280   :  { %v1743_v33 = vmax.f32 %v1637_v10, 0.0 }
 0x281   :  { %v1741_v51 = vmax.f32 %v1629_v30, 0.0 }
 0x282   :  { %v1771_v32 = vpack.c.bf16 %v1743_v33, %v1742_v14 }
 0x283   :  { %v1770_v4 = vpack.c.bf16 %v1741_v51, %v1740_v11  ;;  %v2929_v29 = vpop.f32.mrb[120].mxu1 }
 0x284   :  { %v1650_v42 = vadd.f32 %v2929_v29, %v4438_v59  ;;  %v1641_v24 = vpop.f32.mrb[121].mxu1 }
 0x285   :  { %v1642_v36 = vadd.f32 %v4438_v59, %v1641_v24  ;;  %v2930_v47 = vpop.f32.mrb[122].mxu1  ;;  %2971 = vmatprep.mubr.bf16.mxu0 %v1770_v4 }
 0x286   :  { %v1653_v37 = vadd.f32 %v2930_v47, %v4438_v59  ;;  %v1644_v53 = vpop.f32.mrb[123].mxu1  ;;  %2972 = vmatmul.mubr.bf16.gmra.mrb[116].mxu0 %v1771_v32  ;;  %v1746_v26 = vmax.f32 %v1650_v42, 0.0 }
 0x287   :  { %v1645_v34 = vadd.f32 %v4438_v59, %v1644_v53  ;;  %v1744_v48 = vmax.f32 %v1642_v36, 0.0 }
 0x288   :  { %v1747_v63 = vmax.f32 %v1653_v37, 0.0 }
 0x289   :  { %v1745_v60 = vmax.f32 %v1645_v34, 0.0 }
 0x28a   :  { %v1773_v54 = vpack.c.bf16 %v1747_v63, %v1746_v26 }
 0x28b   :  { %v1772_v56 = vpack.c.bf16 %v1745_v60, %v1744_v48  ;;  %v2933_v55 = vpop.f32.mrb[124].mxu1 }
 0x28c   :  { %v1666_v35 = vadd.f32 %v2933_v55, %v4438_v59  ;;  %v1657_v44 = vpop.f32.mrb[125].mxu1 }
 0x28d   :  { %v1658_v28 = vadd.f32 %v4438_v59, %v1657_v44  ;;  %v2934_v2 = vpop.f32.mrb[126].mxu1  ;;  %2975 = vmatprep.mubr.bf16.mxu0 %v1772_v56 }
 0x28e   :  { %v1669_v3 = vadd.f32 %v2934_v2, %v4438_v59  ;;  %v1660_v45 = vpop.f32.mrb[127].mxu1  ;;  %2976 = vmatmul.mubr.bf16.gmra.mrb[120].mxu0 %v1773_v54  ;;  %v1750_v18 = vmax.f32 %v1666_v35, 0.0 }
 0x28f   :  { %v1661_v17 = vadd.f32 %v4438_v59, %v1660_v45  ;;  %v1748_v62 = vmax.f32 %v1658_v28, 0.0 }
 0x290   :  { %v1751_v40 = vmax.f32 %v1669_v3, 0.0 }
 0x291   :  { %v1749_v13 = vmax.f32 %v1661_v17, 0.0  ;;  %v4475_v17 = vld [vmem:[%s4783_s6] ss:$0 sm:$0xff]  ;;  %s3235_s6 = smov [#allocation2]  }
 0x292   :  { %v1775_v21 = vpack.c.bf16 %v1751_v40, %v1750_v18  ;;  %s2373_s12 = sshll.u32 %s3235_s6, 4  ;;  %s2374_s12 = int_to_ptr.vmem [resolvable:$true] %s2373_s12 }
 0x293   :  { %v1774_v12 = vpack.c.bf16 %v1749_v13, %v1748_v62  ;;  %v2937_v31 = vpop.f32.mrb[128].mxu1  ;;  %s3211_s13 = scalar_lea.vmem %s2374_s12, 4096  ;;  %p3216_p1 = scmp.lt.s32.totalorder %s2374_s12, %s2374_s12 }
 0x294   :  { %v1682_v50 = vadd.f32 %v2937_v31, %v4438_v59  ;;  %v1673_v43 = vpop.f32.mrb[129].mxu1  ;;  %p3212_p0 = scmp.ne.s32.totalorder %s2374_s12, %s3211_s13  ;;  %p3217_p2 = scmp.lt.s32.totalorder %s3211_s13, %s3211_s13 }
 0x295   :  { %v1674_v27 = vadd.f32 %v4438_v59, %v1673_v43  ;;  %v2938_v61 = vpop.f32.mrb[130].mxu1  ;;  %2979 = vmatprep.mubr.bf16.mxu0 %v1774_v12 }
 0x296   :  { %v1685_v57 = vadd.f32 %v2938_v61, %v4438_v59  ;;  %v1676_v58 = vpop.f32.mrb[131].mxu1  ;;  %2980 = vmatmul.mubr.bf16.gmra.mrb[124].mxu0 %v1775_v21  ;;  %v1754_v39 = vmax.f32 %v1682_v50, 0.0  ;;  %p3218_p3 = por %p3217_p2, %p3216_p1 }
 0x297   :  { %v1677_v49 = vadd.f32 %v4438_v59, %v1676_v58  ;;  %v1752_v19 = vmax.f32 %v1674_v27, 0.0 }
 0x298   :  { %v1755_v1 = vmax.f32 %v1685_v57, 0.0  ;;  %p3219_p4 = pnand %p3218_p3, %p3212_p0 }
 0x299   :  { %v1753_v52 = vmax.f32 %v1677_v49, 0.0 }
 0x29a   :  { %v1777_v8 = vpack.c.bf16 %v1755_v1, %v1754_v39 }
 0x29b   :  { %v1776_v38 = vpack.c.bf16 %v1753_v52, %v1752_v19  ;;  %v2941_v25 = vpop.f32.mrb[132].mxu1 }
 0x29c   :  { %v1698_v46 = vadd.f32 %v2941_v25, %v4438_v59  ;;  %v1689_v20 = vpop.f32.mrb[133].mxu1 }
 0x29d   :  { %v1690_v22 = vadd.f32 %v4438_v59, %v1689_v20  ;;  %v2942_v5 = vpop.f32.mrb[134].mxu1  ;;  %2983 = vmatprep.mubr.bf16.mxu0 %v1776_v38 }
 0x29e   :  { %v1701_v6 = vadd.f32 %v2942_v5, %v4438_v59  ;;  %v1692_v41 = vpop.f32.mrb[135].mxu1  ;;  %2984 = vmatmul.mubr.bf16.gmra.mrb[128].mxu0 %v1777_v8  ;;  %v1758_v9 = vmax.f32 %v1698_v46, 0.0 }
 0x29f   :  { %v1693_v15 = vadd.f32 %v4438_v59, %v1692_v41  ;;  %v1756_v16 = vmax.f32 %v1690_v22, 0.0 }
 0x2a0   :  { %v1759_v23 = vmax.f32 %v1701_v6, 0.0 }
 0x2a1   :  { %v1757_v7 = vmax.f32 %v1693_v15, 0.0 }
 0x2a2   :  { %v1779_v10 = vpack.c.bf16 %v1759_v23, %v1758_v9 }
 0x2a3   :  { %v1778_v0 = vpack.c.bf16 %v1757_v7, %v1756_v16  ;;  %v2945_v30 = vpop.f32.mrb[136].mxu1 }
 0x2a4   :  { %v1714_v14 = vadd.f32 %v2945_v30, %v4438_v59  ;;  %v1705_v33 = vpop.f32.mrb[137].mxu1 }
 0x2a5   :  { %v1706_v11 = vadd.f32 %v4438_v59, %v1705_v33  ;;  %v2946_v51 = vpop.f32.mrb[138].mxu1  ;;  %2987 = vmatprep.mubr.bf16.mxu0 %v1778_v0 }
 0x2a6   :  { %v1717_v32 = vadd.f32 %v2946_v51, %v4438_v59  ;;  %v1708_v4 = vpop.f32.mrb[139].mxu1  ;;  %2988 = vmatmul.mubr.bf16.gmra.mrb[132].mxu0 %v1779_v10  ;;  %v1762_v42 = vmax.f32 %v1714_v14, 0.0 }
 0x2a7   :  { %v1709_v29 = vadd.f32 %v4438_v59, %v1708_v4  ;;  %v1760_v36 = vmax.f32 %v1706_v11, 0.0 }
 0x2a8   :  { %v1763_v24 = vmax.f32 %v1717_v32, 0.0 }
 0x2a9   :  { %v1761_v47 = vmax.f32 %v1709_v29, 0.0 }
 0x2aa   :  { %v1781_v37 = vpack.c.bf16 %v1763_v24, %v1762_v42 }
 0x2ab   :  { %v1780_v53 = vpack.c.bf16 %v1761_v47, %v1760_v36 }
 0x2ad   :  { %2991 = vmatprep.mubr.bf16.mxu0 %v1780_v53 }
 0x2ae   :  { %v2949_v34 = vpop.f32.mrb[140].mxu1  ;;  %2992 = vmatmul.mubr.bf16.gmra.mrb[136].mxu0 %v1781_v37 }
 0x2af   :  { %v1730_v26 = vadd.f32 %v2949_v34, %v4438_v59  ;;  %v1721_v63 = vpop.f32.mrb[141].mxu1 }
 0x2b0   :  { %v1722_v48 = vadd.f32 %v4438_v59, %v1721_v63  ;;  %v2950_v60 = vpop.f32.mrb[142].mxu1 }
 0x2b1   :  { %v1733_v54 = vadd.f32 %v2950_v60, %v4438_v59  ;;  %v1724_v56 = vpop.f32.mrb[143].mxu1  ;;  %v1766_v35 = vmax.f32 %v1730_v26, 0.0 }
 0x2b2   :  { %v1725_v55 = vadd.f32 %v4438_v59, %v1724_v56  ;;  %v1764_v28 = vmax.f32 %v1722_v48, 0.0 }
 0x2b3   :  { %v1767_v44 = vmax.f32 %v1733_v54, 0.0 }
 0x2b4   :  { %v1765_v2 = vmax.f32 %v1725_v55, 0.0 }
 0x2b5   :  { %v1783_v3 = vpack.c.bf16 %v1767_v44, %v1766_v35 }
 0x2b6   :  { %v1782_v45 = vpack.c.bf16 %v1765_v2, %v1764_v28 }
 0x2b8   :  { %2995 = vmatprep.mubr.bf16.mxu0 %v1782_v45 }
 0x2b9   :  { %2996 = vmatmul.mubr.bf16.gmra.mrb[140].mxu0 %v1783_v3 }
 0x351   :  { %v2969_v18 = vpop.f32.mrb[112].mxu0 }
 0x352   :  { %v4478_v40 = vadd.f32 %v2969_v18, %v4475_v17  ;;  %v1889_v62 = vpop.f32.mrb[113].mxu0 }
 0x353   :  { %v4481_v59 = vadd.f32 %v4475_v17, %v1889_v62  ;;  %v2970_v13 = vpop.f32.mrb[114].mxu0 }
 0x354   :  { %2020 = vmax.xlane.f32.xlu1 %v4478_v40  ;;  %v1892_v21 = vpop.f32.mrb[115].mxu0  ;;  %v4486_v12 = vadd.f32 %v2970_v13, %v4475_v17 }
 0x355   :  { %2016 = vmax.xlane.f32.xlu0 %v4481_v59  ;;  %v4489_v31 = vadd.f32 %v4475_v17, %v1892_v21 }
 0x358   :  { %2022 = vmax.xlane.f32.xlu1 %v4486_v12 }
 0x359   :  { %v2973_v50 = vpop.f32.mrb[116].mxu0  ;;  %2018 = vmax.xlane.f32.xlu0 %v4489_v31 }
 0x35a   :  { %v4494_v43 = vadd.f32 %v2973_v50, %v4475_v17  ;;  %v1905_v27 = vpop.f32.mrb[117].mxu0 }
 0x35b   :  { %v2974_v61 = vpop.f32.mrb[118].mxu0  ;;  %v4502_v49 = vadd.f32 %v4475_v17, %v1905_v27 }
 0x35c   :  { %v4497_v57 = vadd.f32 %v2974_v61, %v4475_v17  ;;  %v1908_v58 = vpop.f32.mrb[119].mxu0 }
 0x35d   :  { %2028 = vmax.xlane.f32.xlu0 %v4494_v43  ;;  %v4505_v39 = vadd.f32 %v4475_v17, %v1908_v58 }
 0x35e   :  { %2030 = vmax.xlane.f32.xlu1 %v4497_v57 }
 0x361   :  { %v2977_v1 = vpop.f32.mrb[120].mxu0  ;;  %2024 = vmax.xlane.f32.xlu0 %v4502_v49 }
 0x362   :  { %v4509_v19 = vadd.f32 %v2977_v1, %v4475_v17  ;;  %v1921_v52 = vpop.f32.mrb[121].mxu0  ;;  %2026 = vmax.xlane.f32.xlu1 %v4505_v39 }
 0x363   :  { %v2978_v8 = vpop.f32.mrb[122].mxu0  ;;  %v4518_v46 = vadd.f32 %v4475_v17, %v1921_v52 }
 0x364   :  { %v4513_v38 = vadd.f32 %v2978_v8, %v4475_v17  ;;  %v1924_v25 = vpop.f32.mrb[123].mxu0 }
 0x365   :  { %2036 = vmax.xlane.f32.xlu0 %v4509_v19  ;;  %v4521_v20 = vadd.f32 %v4475_v17, %v1924_v25 }
 0x366   :  { %2038 = vmax.xlane.f32.xlu1 %v4513_v38 }
 0x369   :  { %v2981_v22 = vpop.f32.mrb[124].mxu0  ;;  %2032 = vmax.xlane.f32.xlu0 %v4518_v46 }
 0x36a   :  { %v4525_v5 = vadd.f32 %v2981_v22, %v4475_v17  ;;  %v1937_v6 = vpop.f32.mrb[125].mxu0  ;;  %2034 = vmax.xlane.f32.xlu1 %v4521_v20 }
 0x36b   :  { %v2982_v41 = vpop.f32.mrb[126].mxu0  ;;  %v4534_v23 = vadd.f32 %v4475_v17, %v1937_v6 }
 0x36c   :  { %v4529_v15 = vadd.f32 %v2982_v41, %v4475_v17  ;;  %v1940_v9 = vpop.f32.mrb[127].mxu0 }
 0x36d   :  { %2044 = vmax.xlane.f32.xlu0 %v4525_v5  ;;  %v4537_v16 = vadd.f32 %v4475_v17, %v1940_v9 }
 0x36e   :  { %2046 = vmax.xlane.f32.xlu1 %v4529_v15 }
 0x371   :  { %v2985_v7 = vpop.f32.mrb[128].mxu0  ;;  %2040 = vmax.xlane.f32.xlu0 %v4534_v23 }
 0x372   :  { %v4541_v10 = vadd.f32 %v2985_v7, %v4475_v17  ;;  %v1953_v0 = vpop.f32.mrb[129].mxu0  ;;  %2042 = vmax.xlane.f32.xlu1 %v4537_v16 }
 0x373   :  { %v2986_v30 = vpop.f32.mrb[130].mxu0  ;;  %v4550_v11 = vadd.f32 %v4475_v17, %v1953_v0 }
 0x374   :  { %v4545_v14 = vadd.f32 %v2986_v30, %v4475_v17  ;;  %v1956_v33 = vpop.f32.mrb[131].mxu0 }
 0x375   :  { %2052 = vmax.xlane.f32.xlu0 %v4541_v10  ;;  %v4553_v51 = vadd.f32 %v4475_v17, %v1956_v33 }
 0x376   :  { %2054 = vmax.xlane.f32.xlu1 %v4545_v14 }
 0x379   :  { %v2989_v32 = vpop.f32.mrb[132].mxu0  ;;  %2048 = vmax.xlane.f32.xlu0 %v4550_v11 }
 0x37a   :  { %v4557_v4 = vadd.f32 %v2989_v32, %v4475_v17  ;;  %v1969_v29 = vpop.f32.mrb[133].mxu0  ;;  %2050 = vmax.xlane.f32.xlu1 %v4553_v51 }
 0x37b   :  { %v2990_v42 = vpop.f32.mrb[134].mxu0  ;;  %v4566_v47 = vadd.f32 %v4475_v17, %v1969_v29 }
 0x37c   :  { %v4561_v24 = vadd.f32 %v2990_v42, %v4475_v17  ;;  %v1972_v36 = vpop.f32.mrb[135].mxu0 }
 0x37d   :  { %2060 = vmax.xlane.f32.xlu0 %v4557_v4  ;;  %v4569_v37 = vadd.f32 %v4475_v17, %v1972_v36 }
 0x37e   :  { %2062 = vmax.xlane.f32.xlu1 %v4561_v24 }
 0x381   :  { %v2993_v53 = vpop.f32.mrb[136].mxu0  ;;  %2056 = vmax.xlane.f32.xlu0 %v4566_v47 }
 0x382   :  { %v4573_v34 = vadd.f32 %v2993_v53, %v4475_v17  ;;  %v1985_v26 = vpop.f32.mrb[137].mxu0  ;;  %2058 = vmax.xlane.f32.xlu1 %v4569_v37 }
 0x383   :  { %v2994_v63 = vpop.f32.mrb[138].mxu0  ;;  %v4582_v54 = vadd.f32 %v4475_v17, %v1985_v26 }
 0x384   :  { %v4577_v48 = vadd.f32 %v2994_v63, %v4475_v17  ;;  %v1988_v60 = vpop.f32.mrb[139].mxu0 }
 0x385   :  { %2068 = vmax.xlane.f32.xlu0 %v4573_v34  ;;  %v4585_v56 = vadd.f32 %v4475_v17, %v1988_v60 }
 0x386   :  { %2070 = vmax.xlane.f32.xlu1 %v4577_v48 }
 0x389   :  { %2064 = vmax.xlane.f32.xlu0 %v4582_v54 }
 0x38a   :  { %2066 = vmax.xlane.f32.xlu1 %v4585_v56 }
 0x38c   :  { %v2997_v55 = vpop.f32.mrb[140].mxu0 }
 0x38d   :  { %v4590_v35 = vadd.f32 %v2997_v55, %v4475_v17  ;;  %v2001_v44 = vpop.f32.mrb[141].mxu0 }
 0x38e   :  { %v4593_v28 = vadd.f32 %v4475_v17, %v2001_v44  ;;  %v2998_v2 = vpop.f32.mrb[142].mxu0 }
 0x38f   :  { %v4596_v3 = vadd.f32 %v2998_v2, %v4475_v17  ;;  %v2004_v45 = vpop.f32.mrb[143].mxu0 }
 0x390   :  { %v4599_v18 = vadd.f32 %v4475_v17, %v2004_v45  ;;  %2072 = vmax.xlane.f32.xlu0 %v4593_v28 }
 0x392   :  { %2074 = vmax.xlane.f32.xlu1 %v4599_v18 }
 0x394   :  { %2076 = vmax.xlane.f32.xlu0 %v4590_v35 }
 0x396   :  { %2078 = vmax.xlane.f32.xlu1 %v4596_v3 }
 0x3e1   :  { %v2021_v62 = vpop.xlane.xlu1 %2020 }
 0x3e2   :  { %v4606_v13 = vsub.f32 %v4478_v40, %v2021_v62  ;;  %v2017_v21 = vpop.xlane.xlu0 %2016 }
 0x3e3   :  { %v4609_v50 = vsub.f32 %v4481_v59, %v2017_v21 }
 0x3e4   :  { %v2116_v27 = vmul.f32 1.442695, %v4606_v13 }
 0x3e5   :  { %v2112_v17 = vmul.f32 1.442695, %v4609_v50  ;;  %v2023_v61 = vpop.xlane.xlu1 %2022 }
 0x3e6   :  { %3083 = vpow2.f32 %v2116_v27  ;;  %v4614_v58 = vsub.f32 %v4486_v12, %v2023_v61  ;;  %v2019_v1 = vpop.xlane.xlu0 %2018 }
 0x3e7   :  { %v4617_v52 = vsub.f32 %v4489_v31, %v2019_v1  ;;  %3085 = vpow2.f32 %v2112_v17 }
 0x3e8   :  { %v2118_v40 = vmul.f32 1.442695, %v4614_v58 }
 0x3e9   :  { %v2114_v59 = vmul.f32 1.442695, %v4617_v52 }
 0x3ea   :  { %3087 = vpow2.f32 %v2118_v40  ;;  %v2029_v8 = vpop.xlane.xlu0 %2028 }
 0x3eb   :  { %v4622_v25 = vsub.f32 %v4494_v43, %v2029_v8  ;;  %v2031_v22 = vpop.xlane.xlu1 %2030  ;;  %3089 = vpow2.f32 %v2114_v59 }
 0x3ec   :  { %v4625_v6 = vsub.f32 %v4497_v57, %v2031_v22 }
 0x3ed   :  { %v2124_v12 = vmul.f32 1.442695, %v4622_v25 }
 0x3ee   :  { %v2126_v31 = vmul.f32 1.442695, %v4625_v6  ;;  %v2025_v41 = vpop.xlane.xlu0 %2024 }
 0x3ef   :  { %3091 = vpow2.f32 %v2124_v12  ;;  %v4630_v9 = vsub.f32 %v4502_v49, %v2025_v41  ;;  %v2027_v7 = vpop.xlane.xlu1 %2026 }
 0x3f0   :  { %v3084_v0 = vpop.eup %3083  ;;  %v4633_v30 = vsub.f32 %v4505_v39, %v2027_v7  ;;  %3093 = vpow2.f32 %v2126_v31 }
 0x3f1   :  { %v2120_v43 = vmul.f32 1.442695, %v4630_v9  ;;  %2180 = vadd.xlane.f32.xlu0 %v3084_v0  ;;  %v3086_v32 = vpop.eup %3085 }
 0x3f2   :  { %v2122_v57 = vmul.f32 1.442695, %v4633_v30  ;;  %v2037_v33 = vpop.xlane.xlu0 %2036 }
 0x3f3   :  { %3095 = vpow2.f32 %v2120_v43  ;;  %v4638_v29 = vsub.f32 %v4509_v19, %v2037_v33  ;;  %v2039_v42 = vpop.xlane.xlu1 %2038 }
 0x3f4   :  { %v3088_v49 = vpop.eup %3087  ;;  %v4641_v36 = vsub.f32 %v4513_v38, %v2039_v42  ;;  %3097 = vpow2.f32 %v2122_v57 }
 0x3f5   :  { %v2132_v39 = vmul.f32 1.442695, %v4638_v29  ;;  %2182 = vadd.xlane.f32.xlu1 %v3088_v49  ;;  %2176 = vadd.xlane.f32.xlu0 %v3086_v32  ;;  %v3090_v19 = vpop.eup %3089 }
 0x3f6   :  { %v2134_v53 = vmul.f32 1.442695, %v4641_v36  ;;  %v2033_v26 = vpop.xlane.xlu0 %2032 }
 0x3f7   :  { %3099 = vpow2.f32 %v2132_v39  ;;  %v4646_v63 = vsub.f32 %v4518_v46, %v2033_v26  ;;  %v2035_v60 = vpop.xlane.xlu1 %2034 }
 0x3f8   :  { %v4649_v55 = vsub.f32 %v4521_v20, %v2035_v60  ;;  %3101 = vpow2.f32 %v2134_v53 }
 0x3f9   :  { %v3092_v44 = vpop.eup %3091  ;;  %v2128_v38 = vmul.f32 1.442695, %v4646_v63  ;;  %2178 = vadd.xlane.f32.xlu1 %v3090_v19 }
 0x3fa   :  { %v2130_v2 = vmul.f32 1.442695, %v4649_v55  ;;  %2188 = vadd.xlane.f32.xlu0 %v3092_v44  ;;  %v2045_v45 = vpop.xlane.xlu0 %2044  ;;  %v3094_v21 = vpop.eup %3093 }
 0x3fb   :  { %3103 = vpow2.f32 %v2128_v38  ;;  %v4654_v62 = vsub.f32 %v4525_v5, %v2045_v45  ;;  %v2047_v46 = vpop.xlane.xlu1 %2046 }
 0x3fc   :  { %v4657_v27 = vsub.f32 %v4529_v15, %v2047_v46  ;;  %3105 = vpow2.f32 %v2130_v2 }
 0x3fd   :  { %v3096_v20 = vpop.eup %3095  ;;  %v2140_v17 = vmul.f32 1.442695, %v4654_v62  ;;  %2190 = vadd.xlane.f32.xlu1 %v3094_v21 }
 0x3fe   :  { %v2142_v61 = vmul.f32 1.442695, %v4657_v27  ;;  %2184 = vadd.xlane.f32.xlu0 %v3096_v20  ;;  %v2041_v1 = vpop.xlane.xlu0 %2040  ;;  %v3098_v59 = vpop.eup %3097 }
 0x3ff   :  { %3107 = vpow2.f32 %v2140_v17  ;;  %v4662_v40 = vsub.f32 %v4534_v23, %v2041_v1  ;;  %v2043_v5 = vpop.xlane.xlu1 %2042 }
 0x400   :  { %v4665_v8 = vsub.f32 %v4537_v16, %v2043_v5  ;;  %3109 = vpow2.f32 %v2142_v61 }
 0x401   :  { %v3100_v15 = vpop.eup %3099  ;;  %v2136_v22 = vmul.f32 1.442695, %v4662_v40  ;;  %2186 = vadd.xlane.f32.xlu1 %v3098_v59 }
 0x402   :  { %v2138_v12 = vmul.f32 1.442695, %v4665_v8  ;;  %2196 = vadd.xlane.f32.xlu0 %v3100_v15  ;;  %v2053_v31 = vpop.xlane.xlu0 %2052  ;;  %v3102_v7 = vpop.eup %3101 }
 0x403   :  { %3111 = vpow2.f32 %v2136_v22  ;;  %v4670_v41 = vsub.f32 %v4541_v10, %v2053_v31  ;;  %v2055_v23 = vpop.xlane.xlu1 %2054 }
 0x404   :  { %v4673_v0 = vsub.f32 %v4545_v14, %v2055_v23  ;;  %3113 = vpow2.f32 %v2138_v12 }
 0x405   :  { %v3104_v16 = vpop.eup %3103  ;;  %v2148_v43 = vmul.f32 1.442695, %v4670_v41  ;;  %2198 = vadd.xlane.f32.xlu1 %v3102_v7 }
 0x406   :  { %v2150_v57 = vmul.f32 1.442695, %v4673_v0  ;;  %2192 = vadd.xlane.f32.xlu0 %v3104_v16  ;;  %v2049_v33 = vpop.xlane.xlu0 %2048  ;;  %v3106_v42 = vpop.eup %3105 }
 0x407   :  { %3115 = vpow2.f32 %v2148_v43  ;;  %v4678_v32 = vsub.f32 %v4550_v11, %v2049_v33  ;;  %v2051_v10 = vpop.xlane.xlu1 %2050 }
 0x408   :  { %v4681_v49 = vsub.f32 %v4553_v51, %v2051_v10  ;;  %3117 = vpow2.f32 %v2150_v57 }
 0x409   :  { %v3108_v14 = vpop.eup %3107  ;;  %v2144_v39 = vmul.f32 1.442695, %v4678_v32  ;;  %2194 = vadd.xlane.f32.xlu1 %v3106_v42 }
 0x40a   :  { %v2146_v53 = vmul.f32 1.442695, %v4681_v49  ;;  %2204 = vadd.xlane.f32.xlu0 %v3108_v14  ;;  %v2061_v26 = vpop.xlane.xlu0 %2060  ;;  %v3110_v19 = vpop.eup %3109 }
 0x40b   :  { %3119 = vpow2.f32 %v2144_v39  ;;  %v4686_v60 = vsub.f32 %v4557_v4, %v2061_v26  ;;  %v2063_v11 = vpop.xlane.xlu1 %2062 }
 0x40c   :  { %v4689_v44 = vsub.f32 %v4561_v24, %v2063_v11  ;;  %3121 = vpow2.f32 %v2146_v53 }
 0x40d   :  { %v3112_v51 = vpop.eup %3111  ;;  %v2156_v38 = vmul.f32 1.442695, %v4686_v60  ;;  %2206 = vadd.xlane.f32.xlu1 %v3110_v19 }
 0x40e   :  { %v2158_v2 = vmul.f32 1.442695, %v4689_v44  ;;  %2200 = vadd.xlane.f32.xlu0 %v3112_v51  ;;  %v2057_v45 = vpop.xlane.xlu0 %2056  ;;  %v3114_v21 = vpop.eup %3113 }
 0x40f   :  { %3123 = vpow2.f32 %v2156_v38  ;;  %v4694_v46 = vsub.f32 %v4566_v47, %v2057_v45  ;;  %v2059_v4 = vpop.xlane.xlu1 %2058 }
 0x410   :  { %v4697_v20 = vsub.f32 %v4569_v37, %v2059_v4  ;;  %3125 = vpow2.f32 %v2158_v2 }
 0x411   :  { %v3116_v24 = vpop.eup %3115  ;;  %v2152_v17 = vmul.f32 1.442695, %v4694_v46  ;;  %2202 = vadd.xlane.f32.xlu1 %v3114_v21 }
 0x412   :  { %v2154_v61 = vmul.f32 1.442695, %v4697_v20  ;;  %2212 = vadd.xlane.f32.xlu0 %v3116_v24  ;;  %v2069_v1 = vpop.xlane.xlu0 %2068  ;;  %v3118_v59 = vpop.eup %3117 }
 0x413   :  { %3127 = vpow2.f32 %v2152_v17  ;;  %v4702_v5 = vsub.f32 %v4573_v34, %v2069_v1  ;;  %v2071_v47 = vpop.xlane.xlu1 %2070 }
 0x414   :  { %v4705_v15 = vsub.f32 %v4577_v48, %v2071_v47  ;;  %3129 = vpow2.f32 %v2154_v61 }
 0x415   :  { %v3120_v37 = vpop.eup %3119  ;;  %v2164_v22 = vmul.f32 1.442695, %v4702_v5  ;;  %2214 = vadd.xlane.f32.xlu1 %v3118_v59 }
 0x416   :  { %v2166_v12 = vmul.f32 1.442695, %v4705_v15  ;;  %2208 = vadd.xlane.f32.xlu0 %v3120_v37  ;;  %v2065_v31 = vpop.xlane.xlu0 %2064  ;;  %v3122_v7 = vpop.eup %3121 }
 0x417   :  { %3131 = vpow2.f32 %v2164_v22  ;;  %v4710_v23 = vsub.f32 %v4582_v54, %v2065_v31  ;;  %v2067_v34 = vpop.xlane.xlu1 %2066 }
 0x418   :  { %v4713_v16 = vsub.f32 %v4585_v56, %v2067_v34  ;;  %3133 = vpow2.f32 %v2166_v12 }
 0x419   :  { %v3124_v48 = vpop.eup %3123  ;;  %v2160_v43 = vmul.f32 1.442695, %v4710_v23  ;;  %2210 = vadd.xlane.f32.xlu1 %v3122_v7 }
 0x41a   :  { %v2162_v57 = vmul.f32 1.442695, %v4713_v16  ;;  %2220 = vadd.xlane.f32.xlu0 %v3124_v48  ;;  %v3126_v33 = vpop.eup %3125 }
 0x41b   :  { %3135 = vpow2.f32 %v2160_v43 }
 0x41c   :  { %3137 = vpow2.f32 %v2162_v57 }
 0x41d   :  { %v3128_v10 = vpop.eup %3127  ;;  %2222 = vadd.xlane.f32.xlu1 %v3126_v33  ;;  %v2073_v42 = vpop.xlane.xlu0 %2072 }
 0x41e   :  { %v4718_v54 = vsub.f32 %v4593_v28, %v2073_v42  ;;  %2216 = vadd.xlane.f32.xlu0 %v3128_v10  ;;  %v3130_v14 = vpop.eup %3129 }
 0x41f   :  { %v2075_v56 = vpop.xlane.xlu1 %2074 }
 0x420   :  { %v2168_v39 = vmul.f32 1.442695, %v4718_v54  ;;  %v4722_v53 = vsub.f32 %v4599_v18, %v2075_v56 }
 0x421   :  { %v3132_v26 = vpop.eup %3131  ;;  %2218 = vadd.xlane.f32.xlu1 %v3130_v14  ;;  %v2077_v11 = vpop.xlane.xlu0 %2076 }
 0x422   :  { %3139 = vpow2.f32 %v2168_v39  ;;  %v2170_v19 = vmul.f32 1.442695, %v4722_v53  ;;  %v4726_v51 = vsub.f32 %v4590_v35, %v2077_v11  ;;  %2228 = vadd.xlane.f32.xlu0 %v3132_v26  ;;  %v3134_v38 = vpop.eup %3133 }
 0x423   :  { %v2079_v28 = vpop.xlane.xlu1 %2078 }
 0x424   :  { %3141 = vpow2.f32 %v2170_v19  ;;  %v2172_v2 = vmul.f32 1.442695, %v4726_v51  ;;  %v4730_v45 = vsub.f32 %v4596_v3, %v2079_v28 }
 0x425   :  { %v3136_v18 = vpop.eup %3135  ;;  %2230 = vadd.xlane.f32.xlu1 %v3134_v38 }
 0x426   :  { %3143 = vpow2.f32 %v2172_v2  ;;  %v2174_v4 = vmul.f32 1.442695, %v4730_v45  ;;  %2224 = vadd.xlane.f32.xlu0 %v3136_v18  ;;  %v3138_v21 = vpop.eup %3137 }
 0x428   :  { %3145 = vpow2.f32 %v2174_v4 }
 0x429   :  { %2226 = vadd.xlane.f32.xlu1 %v3138_v21 }
 0x42c   :  { %v3140_v35 = vpop.eup %3139 }
 0x42d   :  { %2232 = vadd.xlane.f32.xlu0 %v3140_v35 }
 0x42e   :  { %v3142_v24 = vpop.eup %3141 }
 0x42f   :  { %2234 = vadd.xlane.f32.xlu1 %v3142_v24 }
 0x430   :  { %v3144_v17 = vpop.eup %3143 }
 0x431   :  { %2236 = vadd.xlane.f32.xlu0 %v3144_v17 }
 0x432   :  { %v3146_v61 = vpop.eup %3145 }
 0x433   :  { %2238 = vadd.xlane.f32.xlu1 %v3146_v61 }
 0x47e   :  { %v2181_v1 = vpop.xlane.xlu0 %2180 }
 0x47f   :  { %3147 = vlog2.f32 %v2181_v1 }
 0x482   :  { %v2183_v3 = vpop.xlane.xlu1 %2182  ;;  %v2177_v47 = vpop.xlane.xlu0 %2176 }
 0x483   :  { %3149 = vlog2.f32 %v2183_v3 }
 0x484   :  { %3151 = vlog2.f32 %v2177_v47 }
 0x486   :  { %v2179_v59 = vpop.xlane.xlu1 %2178 }
 0x487   :  { %3153 = vlog2.f32 %v2179_v59  ;;  %v2189_v37 = vpop.xlane.xlu0 %2188 }
 0x488   :  { %3155 = vlog2.f32 %v2189_v37 }
 0x489   :  { %v3148_v22 = vpop.eup %3147 }
 0x48a   :  { %v2245_v12 = vmul.f32 0.6931472, %v3148_v22  ;;  %v2191_v31 = vpop.xlane.xlu1 %2190 }
 0x48b   :  { %3157 = vlog2.f32 %v2191_v31  ;;  %v2185_v34 = vpop.xlane.xlu0 %2184 }
 0x48c   :  { %v2306_v7 = vsub.f32 %v4606_v13, %v2245_v12  ;;  %3159 = vlog2.f32 %v2185_v34 }
 0x48d   :  { %v3150_v48 = vpop.eup %3149 }
 0x48e   :  { %v3152_v43 = vpop.eup %3151  ;;  %2338 = vst [vmem:[#allocation2 + $0x10] sm:$0xff] %v2306_v7  ;;  %v2247_v57 = vmul.f32 0.6931472, %v3150_v48  ;;  %v2187_v33 = vpop.xlane.xlu1 %2186 }
 0x48f   :  { %v2241_v10 = vmul.f32 0.6931472, %v3152_v43  ;;  %3161 = vlog2.f32 %v2187_v33  ;;  %v2197_v42 = vpop.xlane.xlu0 %2196 }
 0x490   :  { %v2307_v56 = vsub.f32 %v4614_v58, %v2247_v57  ;;  %3163 = vlog2.f32 %v2197_v42 }
 0x491   :  { %v3154_v14 = vpop.eup %3153  ;;  %v2304_v39 = vsub.f32 %v4609_v50, %v2241_v10 }
 0x492   :  { %v3156_v26 = vpop.eup %3155  ;;  %2339 = vst [vmem:[#allocation2 + $0x18] sm:$0xff] %v2307_v56  ;;  %v2243_v11 = vmul.f32 0.6931472, %v3154_v14  ;;  %v2199_v19 = vpop.xlane.xlu1 %2198 }
 0x493   :  { %2336 = vst [vmem:[#allocation2] sm:$0xff] %v2304_v39  ;;  %v2253_v13 = vmul.f32 0.6931472, %v3156_v26  ;;  %3165 = vlog2.f32 %v2199_v19  ;;  %v2193_v28 = vpop.xlane.xlu0 %2192 }
 0x494   :  { %v2305_v38 = vsub.f32 %v4617_v52, %v2243_v11  ;;  %3167 = vlog2.f32 %v2193_v28 }
 0x495   :  { %v3158_v2 = vpop.eup %3157  ;;  %v2310_v18 = vsub.f32 %v4622_v25, %v2253_v13 }
 0x496   :  { %v3160_v4 = vpop.eup %3159  ;;  %2337 = vst [vmem:[#allocation2 + $0x8] sm:$0xff] %v2305_v38  ;;  %v2255_v58 = vmul.f32 0.6931472, %v3158_v2  ;;  %v2195_v21 = vpop.xlane.xlu1 %2194 }
 0x497   :  { %2342 = vst [vmem:[#allocation2 + $0x30] sm:$0xff] %v2310_v18  ;;  %v2249_v50 = vmul.f32 0.6931472, %v3160_v4  ;;  %3169 = vlog2.f32 %v2195_v21  ;;  %v2205_v35 = vpop.xlane.xlu0 %2204 }
 0x498   :  { %v2311_v24 = vsub.f32 %v4625_v6, %v2255_v58  ;;  %3171 = vlog2.f32 %v2205_v35 }
 0x499   :  { %v3162_v17 = vpop.eup %3161  ;;  %v2308_v61 = vsub.f32 %v4630_v9, %v2249_v50 }
 0x49a   :  { %v3164_v1 = vpop.eup %3163  ;;  %2343 = vst [vmem:[#allocation2 + $0x38] sm:$0xff] %v2311_v24  ;;  %v2251_v52 = vmul.f32 0.6931472, %v3162_v17  ;;  %v2207_v3 = vpop.xlane.xlu1 %2206 }
 0x49b   :  { %2340 = vst [vmem:[#allocation2 + $0x20] sm:$0xff] %v2308_v61  ;;  %v2261_v25 = vmul.f32 0.6931472, %v3164_v1  ;;  %3173 = vlog2.f32 %v2207_v3  ;;  %v2201_v47 = vpop.xlane.xlu0 %2200 }
 0x49c   :  { %v2309_v59 = vsub.f32 %v4633_v30, %v2251_v52  ;;  %3175 = vlog2.f32 %v2201_v47 }
 0x49d   :  { %v3166_v37 = vpop.eup %3165  ;;  %v2314_v22 = vsub.f32 %v4638_v29, %v2261_v25 }
 0x49e   :  { %v3168_v12 = vpop.eup %3167  ;;  %2341 = vst [vmem:[#allocation2 + $0x28] sm:$0xff] %v2309_v59  ;;  %v2263_v6 = vmul.f32 0.6931472, %v3166_v37  ;;  %v2203_v31 = vpop.xlane.xlu1 %2202 }
 0x49f   :  { %2346 = vst [vmem:[#allocation2 + $0x50] sm:$0xff] %v2314_v22  ;;  %v2257_v9 = vmul.f32 0.6931472, %v3168_v12  ;;  %3177 = vlog2.f32 %v2203_v31  ;;  %v2213_v34 = vpop.xlane.xlu0 %2212 }
 0x4a0   :  { %v2315_v7 = vsub.f32 %v4641_v36, %v2263_v6  ;;  %3179 = vlog2.f32 %v2213_v34 }
 0x4a1   :  { %v3170_v48 = vpop.eup %3169  ;;  %v2312_v43 = vsub.f32 %v4646_v63, %v2257_v9 }
 0x4a2   :  { %v3172_v57 = vpop.eup %3171  ;;  %2347 = vst [vmem:[#allocation2 + $0x58] sm:$0xff] %v2315_v7  ;;  %v2259_v30 = vmul.f32 0.6931472, %v3170_v48  ;;  %v2215_v33 = vpop.xlane.xlu1 %2214 }
 0x4a3   :  { %2344 = vst [vmem:[#allocation2 + $0x40] sm:$0xff] %v2312_v43  ;;  %v2269_v29 = vmul.f32 0.6931472, %v3172_v57  ;;  %3181 = vlog2.f32 %v2215_v33  ;;  %v2209_v10 = vpop.xlane.xlu0 %2208 }
 0x4a4   :  { %v2313_v42 = vsub.f32 %v4649_v55, %v2259_v30  ;;  %3183 = vlog2.f32 %v2209_v10 }
 0x4a5   :  { %v3174_v56 = vpop.eup %3173  ;;  %v2318_v14 = vsub.f32 %v4654_v62, %v2269_v29 }
 0x4a6   :  { %v3176_v39 = vpop.eup %3175  ;;  %2345 = vst [vmem:[#allocation2 + $0x48] sm:$0xff] %v2313_v42  ;;  %v2271_v36 = vmul.f32 0.6931472, %v3174_v56  ;;  %v2211_v26 = vpop.xlane.xlu1 %2210 }
 0x4a7   :  { %2350 = vst [vmem:[#allocation2 + $0x70] sm:$0xff] %v2318_v14  ;;  %v2265_v63 = vmul.f32 0.6931472, %v3176_v39  ;;  %3185 = vlog2.f32 %v2211_v26  ;;  %v2221_v11 = vpop.xlane.xlu0 %2220 }
 0x4a8   :  { %v2319_v19 = vsub.f32 %v4657_v27, %v2271_v36  ;;  %3187 = vlog2.f32 %v2221_v11 }
 0x4a9   :  { %v3178_v13 = vpop.eup %3177  ;;  %v2316_v28 = vsub.f32 %v4662_v40, %v2265_v63 }
 0x4aa   :  { %v3180_v38 = vpop.eup %3179  ;;  %2351 = vst [vmem:[#allocation2 + $0x78] sm:$0xff] %v2319_v19  ;;  %v2267_v55 = vmul.f32 0.6931472, %v3178_v13  ;;  %v2223_v2 = vpop.xlane.xlu1 %2222 }
 0x4ab   :  { %2348 = vst [vmem:[#allocation2 + $0x60] sm:$0xff] %v2316_v28  ;;  %v2277_v62 = vmul.f32 0.6931472, %v3180_v38  ;;  %3189 = vlog2.f32 %v2223_v2  ;;  %v2217_v18 = vpop.xlane.xlu0 %2216 }
 0x4ac   :  { %v2317_v4 = vsub.f32 %v4665_v8, %v2267_v55  ;;  %3191 = vlog2.f32 %v2217_v18 }
 0x4ad   :  { %v3182_v58 = vpop.eup %3181  ;;  %v2322_v21 = vsub.f32 %v4670_v41, %v2277_v62 }
 0x4ae   :  { %v3184_v50 = vpop.eup %3183  ;;  %2349 = vst [vmem:[#allocation2 + $0x68] sm:$0xff] %v2317_v4  ;;  %v2279_v27 = vmul.f32 0.6931472, %v3182_v58  ;;  %v2219_v35 = vpop.xlane.xlu1 %2218 }
 0x4af   :  { %2354 = vst [vmem:[#allocation2 + $0x90] sm:$0xff] %v2322_v21  ;;  %v2273_v40 = vmul.f32 0.6931472, %v3184_v50  ;;  %3193 = vlog2.f32 %v2219_v35  ;;  %v2229_v24 = vpop.xlane.xlu0 %2228 }
 0x4b0   :  { %v2323_v17 = vsub.f32 %v4673_v0, %v2279_v27  ;;  %3195 = vlog2.f32 %v2229_v24 }
 0x4b1   :  { %v3186_v61 = vpop.eup %3185  ;;  %v2320_v1 = vsub.f32 %v4678_v32, %v2273_v40 }
 0x4b2   :  { %v3188_v52 = vpop.eup %3187  ;;  %2355 = vst [vmem:[#allocation2 + $0x98] sm:$0xff] %v2323_v17  ;;  %v2275_v8 = vmul.f32 0.6931472, %v3186_v61  ;;  %v2231_v3 = vpop.xlane.xlu1 %2230 }
 0x4b3   :  { %2352 = vst [vmem:[#allocation2 + $0x80] sm:$0xff] %v2320_v1  ;;  %v2285_v41 = vmul.f32 0.6931472, %v3188_v52  ;;  %3197 = vlog2.f32 %v2231_v3  ;;  %v2225_v25 = vpop.xlane.xlu0 %2224 }
 0x4b4   :  { %v2321_v47 = vsub.f32 %v4681_v49, %v2275_v8  ;;  %3199 = vlog2.f32 %v2225_v25 }
 0x4b5   :  { %v3190_v59 = vpop.eup %3189  ;;  %v2326_v37 = vsub.f32 %v4686_v60, %v2285_v41 }
 0x4b6   :  { %v3192_v22 = vpop.eup %3191  ;;  %2353 = vst [vmem:[#allocation2 + $0x88] sm:$0xff] %v2321_v47  ;;  %v2287_v0 = vmul.f32 0.6931472, %v3190_v59  ;;  %v2227_v12 = vpop.xlane.xlu1 %2226 }
 0x4b7   :  { %2358 = vst [vmem:[#allocation2 + $0xb0] sm:$0xff] %v2326_v37  ;;  %v2281_v32 = vmul.f32 0.6931472, %v3192_v22  ;;  %3201 = vlog2.f32 %v2227_v12 }
 0x4b8   :  { %v2327_v6 = vsub.f32 %v4689_v44, %v2287_v0 }
 0x4b9   :  { %v3194_v31 = vpop.eup %3193  ;;  %v2324_v9 = vsub.f32 %v4694_v46, %v2281_v32 }
 0x4ba   :  { %v3196_v34 = vpop.eup %3195  ;;  %2359 = vst [vmem:[#allocation2 + $0xb8] sm:$0xff] %v2327_v6  ;;  %v2283_v7 = vmul.f32 0.6931472, %v3194_v31  ;;  %v2233_v49 = vpop.xlane.xlu0 %2232 }
 0x4bb   :  { %2356 = vst [vmem:[#allocation2 + $0xa0] sm:$0xff] %v2324_v9  ;;  %v2293_v48 = vmul.f32 0.6931472, %v3196_v34  ;;  %3203 = vlog2.f32 %v2233_v49 }
 0x4bc   :  { %v2325_v60 = vsub.f32 %v4697_v20, %v2283_v7  ;;  %v2235_v43 = vpop.xlane.xlu1 %2234 }
 0x4bd   :  { %v3198_v57 = vpop.eup %3197  ;;  %v2330_v30 = vsub.f32 %v4702_v5, %v2293_v48  ;;  %3205 = vlog2.f32 %v2235_v43 }
 0x4be   :  { %v3200_v33 = vpop.eup %3199  ;;  %2357 = vst [vmem:[#allocation2 + $0xa8] sm:$0xff] %v2325_v60  ;;  %v2295_v44 = vmul.f32 0.6931472, %v3198_v57  ;;  %v2237_v29 = vpop.xlane.xlu0 %2236 }
 0x4bf   :  { %2362 = vst [vmem:[#allocation2 + $0xd0] sm:$0xff] %v2330_v30  ;;  %v2289_v46 = vmul.f32 0.6931472, %v3200_v33  ;;  %3207 = vlog2.f32 %v2237_v29 }
 0x4c0   :  { %v2331_v10 = vsub.f32 %v4705_v15, %v2295_v44  ;;  %v2239_v42 = vpop.xlane.xlu1 %2238 }
 0x4c1   :  { %v3202_v56 = vpop.eup %3201  ;;  %v2328_v14 = vsub.f32 %v4710_v23, %v2289_v46  ;;  %3209 = vlog2.f32 %v2239_v42 }
 0x4c2   :  { %2363 = vst [vmem:[#allocation2 + $0xd8] sm:$0xff] %v2331_v10  ;;  %v2291_v20 = vmul.f32 0.6931472, %v3202_v56 }
 0x4c3   :  { %2360 = vst [vmem:[#allocation2 + $0xc0] sm:$0xff] %v2328_v14 }
 0x4c4   :  { %v2329_v5 = vsub.f32 %v4713_v16, %v2291_v20 }
 0x4c5   :  { %v3204_v39 = vpop.eup %3203 }
 0x4c6   :  { %2361 = vst [vmem:[#allocation2 + $0xc8] sm:$0xff] %v2329_v5  ;;  %v2297_v36 = vmul.f32 0.6931472, %v3204_v39 }
 0x4c7   :  { %v3206_v26 = vpop.eup %3205 }
 0x4c8   :  { %v2332_v63 = vsub.f32 %v4718_v54, %v2297_v36  ;;  %v2299_v11 = vmul.f32 0.6931472, %v3206_v26 }
 0x4c9   :  { %v3208_v19 = vpop.eup %3207 }
 0x4ca   :  { %2364 = vst [vmem:[#allocation2 + $0xe0] sm:$0xff] %v2332_v63  ;;  %v2333_v15 = vsub.f32 %v4722_v53, %v2299_v11  ;;  %v2301_v13 = vmul.f32 0.6931472, %v3208_v19 }
 0x4cb   :  { %v3210_v28 = vpop.eup %3209 }
 0x4cc   :  { %2365 = vst [vmem:[#allocation2 + $0xe8] sm:$0xff] %v2333_v15  ;;  %v2334_v23 = vsub.f32 %v4726_v51, %v2301_v13  ;;  %v2303_v38 = vmul.f32 0.6931472, %v3210_v28 }
 0x4ce   :  { %2366 = vst [vmem:[#allocation2 + $0xf0] sm:$0xff] %v2334_v23  ;;  %v2335_v16 = vsub.f32 %v4730_v45, %v2303_v38 }
 0x4d0   :  { %2367 = vst [vmem:[#allocation2 + $0xf8] sm:$0xff] %v2335_v16 }
 0x4d1   :  { %3222 = shalt.err (!%p3219_p4)
}
 0x4d2   :  { %s3223_s16 = scalar_lea.hbm %s4784_s7, 4096 }
 0x4d3   :  { %p3224_p5 = scmp.ne.s32.totalorder %s4784_s7, %s3223_s16  ;;  %p3227_p6 = scmp.lt.u32.totalorder %s3223_s16, %s4784_s7 }
 0x4d5   :  { %p3229_p7 = pnand %p3227_p6, %p3224_p5 }
 0x4d7   :  { %3232 = shalt.err (!%p3229_p7)
}
 0x4d8   :  { %s3236_s3 = smov 128   ;;  %s3237_s19 = smov 8  }
 0x4d9   :  { %2379 = dma.vmem_to_hbm [thread:$0]  %s2374_s12, 4096, %s4784_s7, [#allocation3], %s3236_s3, %s3236_s3, %s3237_s19  }
 0x4da   :  { %3233 = dma.done.wait [#allocation3], 4096  }
 0x4db   :  { %3234 = vsyncadd [#allocation3], 4294963200 }
 0x4dc   :  { %2383 = vsyncpa [#allocation3], 1 }

// kernel: tpu_custom_call.1
= control target key start
LH: loop header
LB: loop body
LE: loop exit
PB: predicated region body
PF: predicated region fallthrough
CT: control target
= control target key end

     0   :  { %s4777_s0 = inlined_call_operand.vmem [shape: f32[256,784], index: 0, kind: input, shape index: {}]   ;;  %s4778_s1 = inlined_call_operand.vmem [shape: bf16[784,128], index: 1, kind: input, shape index: {}]   ;;  %s4779_s2 = inlined_call_operand.vmem [shape: f32[1,128], index: 2, kind: input, shape index: {}]   ;;  %s4780_s3 = inlined_call_operand.vmem [shape: bf16[128,128], index: 3, kind: input, shape index: {}]   ;;  %s4781_s4 = inlined_call_operand.vmem [shape: f32[1,128], index: 4, kind: input, shape index: {}]   ;;  %s4782_s5 = inlined_call_operand.vmem [shape: bf16[128,128], index: 5, kind: input, shape index: {}]   ;;  %s4783_s6 = inlined_call_operand.vmem [shape: f32[1,128], index: 6, kind: input, shape index: {}]   ;;  %s4784_s7 = inlined_call_operand.hbm [shape: f32[256,128], index: 7, kind: output, shape index: {}]  }
   0x1   :  { %v3018_v0 = vld [vmem:[%s4778_s1 + $0x40] sm:$0xff]   ;;  %v3020_v2 = vld [vmem:[%s4778_s1 + $0x48] sm:$0xff]   ;;  %v3022_v4 = vld [vmem:[%s4778_s1 + $0x50] sm:$0xff]  }
   0x2   :  { %v3019_v1 = vld [vmem:[%s4778_s1] sm:$0xff]   ;;  %2468 = vmatprep.subr.bf16.mxu0 %v3018_v0  ;;  %2999 = vmatprep.subr.bf16.mxu1 %v3018_v0  ;;  %v3021_v3 = vld [vmem:[%s4778_s1 + $0x8] sm:$0xff]   ;;  %v3023_v5 = vld [vmem:[%s4778_s1 + $0x10] sm:$0xff]  }
   0x3   :  { %2469 = vmatpush3.bf16.msra.mxu0 %v3019_v1  ;;  %3007 = vmatpush3.bf16.msra.mxu1 %v3019_v1  ;;  %v3024_v6 = vld [vmem:[%s4778_s1 + $0x58] sm:$0xff]   ;;  %v3026_v8 = vld [vmem:[%s4778_s1 + $0x60] sm:$0xff]   ;;  %v3028_v10 = vld [vmem:[%s4778_s1 + $0x68] sm:$0xff]  }
   0x4   :  { %2470 = vmatprep.subr.bf16.mxu0 %v3020_v2  ;;  %3000 = vmatprep.subr.bf16.mxu1 %v3020_v2  ;;  %v3025_v7 = vld [vmem:[%s4778_s1 + $0x18] sm:$0xff]   ;;  %v3027_v9 = vld [vmem:[%s4778_s1 + $0x20] sm:$0xff]   ;;  %v29_v11 = vld [vmem:[%s4777_s0 + $0x8] sm:$0xff] }
   0x5   :  { %v36_v12 = vld [vmem:[%s4777_s0 + $0x40] sm:$0xff]  ;;  %v197_v13 = vld [vmem:[%s4777_s0 + $0x548] sm:$0xff]  ;;  %v3030_v18 = vld [vmem:[%s4778_s1 + $0x70] sm:$0xff]  }
   0x6   :  { %v253_v14 = vpack.c.bf16 %v36_v12, %v29_v11  ;;  %v204_v15 = vld [vmem:[%s4777_s0 + $0x580] sm:$0xff]  ;;  %v3029_v17 = vld [vmem:[%s4778_s1 + $0x28] sm:$0xff]   ;;  %v3031_v19 = vld [vmem:[%s4778_s1 + $0x30] sm:$0xff]  }
   0x7   :  { %2471 = vmatpush3.bf16.msra.mxu0 %v3021_v3  ;;  %3008 = vmatpush3.bf16.msra.mxu1 %v3021_v3  ;;  %v337_v16 = vpack.c.bf16 %v204_v15, %v197_v13  ;;  %v3032_v20 = vld [vmem:[%s4778_s1 + $0x78] sm:$0xff]   ;;  %v28_v22 = vld [vmem:[%s4777_s0] sm:$0xff]  ;;  %v50_v29 = vld [vmem:[%s4777_s0 + $0xb0] sm:$0xff] }
   0x8   :  { %2472 = vmatprep.subr.bf16.mxu0 %v3022_v4  ;;  %3001 = vmatprep.subr.bf16.mxu1 %v3022_v4  ;;  %v3033_v21 = vld [vmem:[%s4778_s1 + $0x38] sm:$0xff]   ;;  %v196_v24 = vld [vmem:[%s4777_s0 + $0x540] sm:$0xff]  ;;  %v218_v34 = vld [vmem:[%s4777_s0 + $0x5f0] sm:$0xff] }
   0x9   :  { %844 = vmatprep.mubr.bf16.mxu0 %v253_v14  ;;  %940 = vmatprep.mubr.bf16.mxu1 %v337_v16  ;;  %v35_v23 = vld [vmem:[%s4777_s0 + $0x38] sm:$0xff]  ;;  %v3034_v26 = vld [vmem:[%s4778_s1 + $0xc0] sm:$0xff]   ;;  %v3038_v36 = vld [vmem:[%s4778_s1 + $0xc8] sm:$0xff]  }
   0xa   :  { %v203_v25 = vld [vmem:[%s4777_s0 + $0x578] sm:$0xff]  ;;  %v3035_v27 = vld [vmem:[%s4778_s1 + $0x140] sm:$0xff]   ;;  %v252_v32 = vpack.c.bf16 %v35_v23, %v28_v22  ;;  %v3039_v38 = vld [vmem:[%s4778_s1 + $0x88] sm:$0xff]  }
   0xb   :  { %2473 = vmatpush3.bf16.msra.mxu0 %v3023_v5  ;;  %3009 = vmatpush3.bf16.msra.mxu1 %v3023_v5  ;;  %v43_v28 = vld [vmem:[%s4777_s0 + $0x78] sm:$0xff]  ;;  %v3036_v30 = vld [vmem:[%s4778_s1 + $0x80] sm:$0xff]   ;;  %v336_v33 = vpack.c.bf16 %v203_v25, %v196_v24  ;;  %v42_v40 = vld [vmem:[%s4777_s0 + $0x70] sm:$0xff] }
   0xc   :  { %2474 = vmatprep.subr.bf16.mxu0 %v3024_v6  ;;  %3002 = vmatprep.subr.bf16.mxu1 %v3024_v6  ;;  %v211_v31 = vld [vmem:[%s4777_s0 + $0x5b8] sm:$0xff]  ;;  %v3037_v35 = vld [vmem:[%s4778_s1 + $0x100] sm:$0xff]   ;;  %v260_v37 = vpack.c.bf16 %v50_v29, %v43_v28  ;;  %v49_v41 = vld [vmem:[%s4777_s0 + $0xa8] sm:$0xff] }
   0xd   :  { %v344_v39 = vpack.c.bf16 %v218_v34, %v211_v31  ;;  %v3043_v42 = vld [vmem:[%s4778_s1 + $0x148] sm:$0xff]   ;;  %v210_v43 = vld [vmem:[%s4777_s0 + $0x5b0] sm:$0xff]  ;;  %v64_v48 = vld [vmem:[%s4777_s0 + $0x120] sm:$0xff]  ;;  %v259_v51 = vpack.c.bf16 %v49_v41, %v42_v40 }
   0xe   :  { %v217_v44 = vld [vmem:[%s4777_s0 + $0x5e8] sm:$0xff]  ;;  %v3040_v45 = vld [vmem:[%s4778_s1 + $0xd0] sm:$0xff]   ;;  %v232_v50 = vld [vmem:[%s4777_s0 + $0x660] sm:$0xff] }
   0xf   :  { %2475 = vmatpush3.bf16.msra.mxu0 %v3025_v7  ;;  %3010 = vmatpush3.bf16.msra.mxu1 %v3025_v7  ;;  %v3045_v46 = vld [vmem:[%s4778_s1 + $0x108] sm:$0xff]   ;;  %v343_v52 = vpack.c.bf16 %v217_v44, %v210_v43  ;;  %v3041_v53 = vld [vmem:[%s4778_s1 + $0x90] sm:$0xff]   ;;  %v3042_v55 = vld [vmem:[%s4778_s1 + $0xd8] sm:$0xff]  }
  0x10   :  { %2476 = vmatprep.subr.bf16.mxu0 %v3026_v8  ;;  %3003 = vmatprep.subr.bf16.mxu1 %v3026_v8  ;;  %v57_v47 = vld [vmem:[%s4777_s0 + $0xe8] sm:$0xff]  ;;  %v3044_v57 = vld [vmem:[%s4778_s1 + $0x98] sm:$0xff]   ;;  %v56_v58 = vld [vmem:[%s4777_s0 + $0xe0] sm:$0xff] }
  0x11   :  { %v225_v49 = vld [vmem:[%s4777_s0 + $0x628] sm:$0xff]  ;;  %v267_v54 = vpack.c.bf16 %v64_v48, %v57_v47  ;;  %v63_v59 = vld [vmem:[%s4777_s0 + $0x118] sm:$0xff]  ;;  %v224_v60 = vld [vmem:[%s4777_s0 + $0x620] sm:$0xff] }
  0x12   :  { %v351_v56 = vpack.c.bf16 %v232_v50, %v225_v49  ;;  %v231_v61 = vld [vmem:[%s4777_s0 + $0x658] sm:$0xff]  ;;  %v3046_v62 = vld [vmem:[%s4778_s1 + $0xe0] sm:$0xff]   ;;  %v78_v0 = vld [vmem:[%s4777_s0 + $0x190] sm:$0xff]  ;;  %v266_v4 = vpack.c.bf16 %v63_v59, %v56_v58 }
  0x13   :  { %2477 = vmatpush3.bf16.msra.mxu0 %v3027_v9  ;;  %3011 = vmatpush3.bf16.msra.mxu1 %v3027_v9  ;;  %v71_v63 = vld [vmem:[%s4777_s0 + $0x158] sm:$0xff]  ;;  %v3051_v2 = vld [vmem:[%s4778_s1 + $0x150] sm:$0xff]   ;;  %v350_v5 = vpack.c.bf16 %v231_v61, %v224_v60  ;;  %v3047_v7 = vld [vmem:[%s4778_s1 + $0xa0] sm:$0xff]  }
  0x14   :  { %2478 = vmatprep.subr.bf16.mxu0 %v3028_v10  ;;  %3004 = vmatprep.subr.bf16.mxu1 %v3028_v10  ;;  %v239_v1 = vld [vmem:[%s4777_s0 + $0x698] sm:$0xff]  ;;  %v246_v3 = vld [vmem:[%s4777_s0 + $0x6d0] sm:$0xff]  ;;  %v274_v8 = vpack.c.bf16 %v78_v0, %v71_v63  ;;  %v3048_v9 = vld [vmem:[%s4778_s1 + $0xe8] sm:$0xff]  }
  0x15   :  { %v3053_v6 = vld [vmem:[%s4778_s1 + $0x110] sm:$0xff]   ;;  %v358_v10 = vpack.c.bf16 %v246_v3, %v239_v1  ;;  %v3049_v11 = vld [vmem:[%s4778_s1 + $0xa8] sm:$0xff]   ;;  %v3058_v24 = vld [vmem:[%s4778_s1 + $0x118] sm:$0xff]  }
  0x16   :  { %v70_v12 = vld [vmem:[%s4777_s0 + $0x150] sm:$0xff]  ;;  %v77_v13 = vld [vmem:[%s4777_s0 + $0x188] sm:$0xff]  ;;  %v3055_v29 = vld [vmem:[%s4778_s1 + $0xb8] sm:$0xff]  }
  0x17   :  { %2479 = vmatpush3.bf16.msra.mxu0 %v3029_v17  ;;  %3012 = vmatpush3.bf16.msra.mxu1 %v3029_v17  ;;  %v238_v14 = vld [vmem:[%s4777_s0 + $0x690] sm:$0xff]  ;;  %v245_v15 = vld [vmem:[%s4777_s0 + $0x6c8] sm:$0xff]  ;;  %v273_v22 = vpack.c.bf16 %v77_v13, %v70_v12  ;;  %v91_v31 = vld [vmem:[%s4777_s0 + $0x1f8] sm:$0xff] }
  0x18   :  { %2480 = vmatprep.subr.bf16.mxu0 %v3030_v18  ;;  %3005 = vmatprep.subr.bf16.mxu1 %v3030_v18  ;;  %v3050_v16 = vld [vmem:[%s4778_s1 + $0xf0] sm:$0xff]   ;;  %v85_v17 = vld [vmem:[%s4777_s0 + $0x1c8] sm:$0xff]  ;;  %v92_v18 = vld [vmem:[%s4777_s0 + $0x200] sm:$0xff]  ;;  %v357_v23 = vpack.c.bf16 %v245_v15, %v238_v14 }
  0x19   :  { %v3052_v25 = vld [vmem:[%s4778_s1 + $0xb0] sm:$0xff]   ;;  %v3056_v34 = vld [vmem:[%s4778_s1 + $0x180] sm:$0xff]   ;;  %v105_v47 = vld [vmem:[%s4777_s0 + $0x268] sm:$0xff] }
  0x1a   :  { %v3060_v40 = vld [vmem:[%s4778_s1 + $0x120] sm:$0xff]   ;;  %v3062_v48 = vld [vmem:[%s4778_s1 + $0x128] sm:$0xff]   ;;  %v51_v50 = vld [vmem:[%s4777_s0 + $0xb8] sm:$0xff] }
  0x1b   :  { %2481 = vmatpush3.bf16.msra.mxu0 %v3031_v19  ;;  %3013 = vmatpush3.bf16.msra.mxu1 %v3031_v19  ;;  %v31_v19 = vld [vmem:[%s4777_s0 + $0x18] sm:$0xff]  ;;  %v44_v49 = vld [vmem:[%s4777_s0 + $0x80] sm:$0xff]  ;;  %v3063_v59 = vld [vmem:[%s4778_s1 + $0x170] sm:$0xff]  }
  0x1c   :  { %2482 = vmatprep.subr.bf16.mxu0 %v3032_v20  ;;  %3006 = vmatprep.subr.bf16.mxu1 %v3032_v20  ;;  %v38_v20 = vld [vmem:[%s4777_s0 + $0x50] sm:$0xff]  ;;  %v112_v60 = vld [vmem:[%s4777_s0 + $0x2a0] sm:$0xff]  ;;  %v65_v0 = vld [vmem:[%s4777_s0 + $0x128] sm:$0xff] }
  0x1d   :  { %v255_v28 = vpack.c.bf16 %v38_v20, %v31_v19  ;;  %v3064_v61 = vld [vmem:[%s4778_s1 + $0x130] sm:$0xff]   ;;  %v127_v1 = vld [vmem:[%s4777_s0 + $0x318] sm:$0xff]  ;;  %v73_v3 = vld [vmem:[%s4777_s0 + $0x168] sm:$0xff] }
  0x1e   :  { %v58_v63 = vld [vmem:[%s4777_s0 + $0xf0] sm:$0xff]  ;;  %v133_v12 = vld [vmem:[%s4777_s0 + $0x348] sm:$0xff]  ;;  %v72_v13 = vld [vmem:[%s4777_s0 + $0x160] sm:$0xff] }
  0x1f   :  { %2483 = vmatpush3.bf16.msra.mxu0 %v3033_v21  ;;  %3014 = vmatpush3.bf16.msra.mxu1 %v3033_v21  ;;  %v3057_v21 = vld [vmem:[%s4778_s1 + $0x158] sm:$0xff]   ;;  %v141_v15 = vld [vmem:[%s4777_s0 + $0x388] sm:$0xff] }
  0x20   :  { %2580 = vmatprep.subr.bf16.mxu1 %v3034_v26  ;;  %2692 = vmatprep.subr.bf16.mxu0 %v3035_v27  ;;  %v281_v26 = vpack.c.bf16 %v92_v18, %v85_v17  ;;  %v3054_v27 = vld [vmem:[%s4778_s1 + $0xf8] sm:$0xff]   ;;  %v94_v18 = vld [vmem:[%s4777_s0 + $0x210] sm:$0xff] }
  0x21   :  { %v79_v14 = vld [vmem:[%s4777_s0 + $0x198] sm:$0xff] }
  0x22   :  { %845 = vmatmul.mubr.bf16.vlgmr.msra.gmra.mrb[0].mxu0 %v252_v32  ;;  %941 = vmatmul.mubr.bf16.vlgmr.msra.gmra.mrb[0].mxu1 %v336_v33  ;;  %v30_v32 = vld [vmem:[%s4777_s0 + $0x10] sm:$0xff]  ;;  %v37_v33 = vld [vmem:[%s4777_s0 + $0x48] sm:$0xff]  ;;  %v87_v17 = vld [vmem:[%s4777_s0 + $0x1d8] sm:$0xff]  ;;  %v275_v20 = vpack.c.bf16 %v79_v14, %v72_v13 }
  0x23   :  { %2581 = vmatpush3.bf16.msra.mxu1 %v3036_v30  ;;  %2693 = vmatpush3.bf16.msra.mxu0 %v3037_v35  ;;  %v84_v30 = vld [vmem:[%s4777_s0 + $0x1c0] sm:$0xff]  ;;  %v99_v35 = vld [vmem:[%s4777_s0 + $0x238] sm:$0xff]  ;;  %v54_v14 = vld [vmem:[%s4777_s0 + $0xd0] sm:$0xff] }
  0x24   :  { %2582 = vmatprep.subr.bf16.mxu1 %v3038_v36  ;;  %852 = vmatprep.mubr.bf16.mxu0 %v260_v37  ;;  %v106_v36 = vld [vmem:[%s4777_s0 + $0x270] sm:$0xff]  ;;  %v45_v37 = vld [vmem:[%s4777_s0 + $0x88] sm:$0xff]  ;;  %v280_v41 = vpack.c.bf16 %v91_v31, %v84_v30  ;;  %v108_v30 = vld [vmem:[%s4777_s0 + $0x280] sm:$0xff] }
  0x25   :  { %948 = vmatprep.mubr.bf16.mxu1 %v344_v39  ;;  %2694 = vmatprep.subr.bf16.mxu0 %v3043_v42  ;;  %v52_v39 = vld [vmem:[%s4777_s0 + $0xc0] sm:$0xff]  ;;  %v254_v42 = vpack.c.bf16 %v37_v33, %v30_v32  ;;  %v288_v43 = vpack.c.bf16 %v106_v36, %v99_v35  ;;  %v154_v35 = vld [vmem:[%s4777_s0 + $0x3f0] sm:$0xff]  ;;  %v161_v36 = vld [vmem:[%s4777_s0 + $0x428] sm:$0xff] }
  0x26   :  { %v262_v44 = vpack.c.bf16 %v52_v39, %v45_v37  ;;  %v100_v37 = vld [vmem:[%s4777_s0 + $0x240] sm:$0xff]  ;;  %v169_v39 = vld [vmem:[%s4777_s0 + $0x468] sm:$0xff]  ;;  %v47_v13 = vld [vmem:[%s4777_s0 + $0x98] sm:$0xff] }
  0x27   :  { %2583 = vmatpush3.bf16.msra.mxu1 %v3039_v38  ;;  %2695 = vmatpush3.bf16.msra.mxu0 %v3045_v46  ;;  %v3059_v38 = vld [vmem:[%s4778_s1 + $0x160] sm:$0xff]   ;;  %v98_v46 = vld [vmem:[%s4777_s0 + $0x230] sm:$0xff] }
  0x28   :  { %2584 = vmatprep.subr.bf16.mxu1 %v3040_v45  ;;  %2696 = vmatprep.subr.bf16.mxu0 %v3051_v2  ;;  %v3061_v45 = vld [vmem:[%s4778_s1 + $0x168] sm:$0xff]   ;;  %v134_v2 = vld [vmem:[%s4777_s0 + $0x350] sm:$0xff] }
  0x2a   :  { %853 = vmatmul.mubr.bf16.gmra.mrb[4].mxu0 %v259_v51  ;;  %949 = vmatmul.mubr.bf16.gmra.mrb[4].mxu1 %v343_v52  ;;  %v113_v51 = vld [vmem:[%s4777_s0 + $0x2a8] sm:$0xff]  ;;  %v120_v52 = vld [vmem:[%s4777_s0 + $0x2e0] sm:$0xff] }
  0x2b   :  { %2585 = vmatpush3.bf16.msra.mxu1 %v3041_v53  ;;  %860 = vmatprep.mubr.bf16.mxu0 %v267_v54  ;;  %v59_v53 = vld [vmem:[%s4777_s0 + $0xf8] sm:$0xff]  ;;  %v66_v54 = vld [vmem:[%s4777_s0 + $0x130] sm:$0xff] }
  0x2c   :  { %2586 = vmatprep.subr.bf16.mxu1 %v3042_v55  ;;  %956 = vmatprep.mubr.bf16.mxu1 %v351_v56  ;;  %v287_v55 = vpack.c.bf16 %v105_v47, %v98_v46  ;;  %v261_v56 = vpack.c.bf16 %v51_v50, %v44_v49  ;;  %v269_v58 = vpack.c.bf16 %v66_v54, %v59_v53  ;;  %v168_v47 = vld [vmem:[%s4777_s0 + $0x460] sm:$0xff]  ;;  %v114_v49 = vld [vmem:[%s4777_s0 + $0x2b0] sm:$0xff]  ;;  %v121_v50 = vld [vmem:[%s4777_s0 + $0x2e8] sm:$0xff] }
  0x2d   :  { %2697 = vmatpush3.bf16.msra.mxu0 %v3053_v6  ;;  %v129_v53 = vld [vmem:[%s4777_s0 + $0x328] sm:$0xff]  ;;  %v136_v54 = vld [vmem:[%s4777_s0 + $0x360] sm:$0xff] }
  0x2e   :  { %2698 = vmatprep.subr.bf16.mxu0 %v3057_v21 }
  0x2f   :  { %2587 = vmatpush3.bf16.msra.mxu1 %v3044_v57  ;;  %v295_v57 = vpack.c.bf16 %v120_v52, %v113_v51  ;;  %v183_v51 = vld [vmem:[%s4777_s0 + $0x4d8] sm:$0xff]  ;;  %v190_v52 = vld [vmem:[%s4777_s0 + $0x510] sm:$0xff] }
  0x30   :  { %2588 = vmatprep.subr.bf16.mxu1 %v3046_v62  ;;  %v119_v62 = vld [vmem:[%s4777_s0 + $0x2d8] sm:$0xff] }
  0x31   :  { %2699 = vmatpush3.bf16.msra.mxu0 %v3058_v24  ;;  %v294_v6 = vpack.c.bf16 %v119_v62, %v112_v60  ;;  %v147_v24 = vld [vmem:[%s4777_s0 + $0x3b8] sm:$0xff]  ;;  %v189_v60 = vld [vmem:[%s4777_s0 + $0x508] sm:$0xff] }
  0x32   :  { %861 = vmatmul.mubr.bf16.gmra.mrb[8].mxu0 %v266_v4  ;;  %957 = vmatmul.mubr.bf16.gmra.mrb[8].mxu1 %v350_v5  ;;  %v80_v4 = vld [vmem:[%s4777_s0 + $0x1a0] sm:$0xff]  ;;  %v3065_v5 = vld [vmem:[%s4778_s1 + $0x178] sm:$0xff]  }
  0x33   :  { %2589 = vmatpush3.bf16.msra.mxu1 %v3047_v7  ;;  %868 = vmatprep.mubr.bf16.mxu0 %v274_v8  ;;  %v268_v7 = vpack.c.bf16 %v65_v0, %v58_v63  ;;  %v3066_v8 = vld [vmem:[%s4778_s1 + $0x138] sm:$0xff]   ;;  %v150_v0 = vld [vmem:[%s4777_s0 + $0x3d0] sm:$0xff] }
  0x34   :  { %2590 = vmatprep.subr.bf16.mxu1 %v3048_v9  ;;  %964 = vmatprep.mubr.bf16.mxu1 %v358_v10  ;;  %v302_v9 = vpack.c.bf16 %v134_v2, %v127_v1  ;;  %v276_v10 = vpack.c.bf16 %v80_v4, %v73_v3  ;;  %v135_v62 = vld [vmem:[%s4777_s0 + $0x358] sm:$0xff]  ;;  %v33_v1 = vld [vmem:[%s4777_s0 + $0x28] sm:$0xff]  ;;  %v40_v2 = vld [vmem:[%s4777_s0 + $0x60] sm:$0xff] }
  0x35   :  { %2700 = vmatprep.subr.bf16.mxu0 %v3059_v38  ;;  %v107_v38 = vld [vmem:[%s4777_s0 + $0x278] sm:$0xff] }
  0x36   :  { %2701 = vmatpush3.bf16.msra.mxu0 %v3060_v40  ;;  %v176_v40 = vld [vmem:[%s4777_s0 + $0x4a0] sm:$0xff]  ;;  %v143_v63 = vld [vmem:[%s4777_s0 + $0x398] sm:$0xff] }
  0x37   :  { %2591 = vmatpush3.bf16.msra.mxu1 %v3049_v11  ;;  %2702 = vmatprep.subr.bf16.mxu0 %v3061_v45  ;;  %v126_v11 = vld [vmem:[%s4777_s0 + $0x310] sm:$0xff]  ;;  %v323_v45 = vpack.c.bf16 %v176_v40, %v169_v39 }
  0x38   :  { %2592 = vmatprep.subr.bf16.mxu1 %v3050_v16  ;;  %v148_v16 = vld [vmem:[%s4777_s0 + $0x3c0] sm:$0xff]  ;;  %v301_v19 = vpack.c.bf16 %v133_v12, %v126_v11  ;;  %v157_v11 = vld [vmem:[%s4777_s0 + $0x408] sm:$0xff] }
  0x39   :  { %v309_v21 = vpack.c.bf16 %v148_v16, %v141_v15  ;;  %v164_v12 = vld [vmem:[%s4777_s0 + $0x440] sm:$0xff] }
  0x3a   :  { %869 = vmatmul.mubr.bf16.gmra.mrb[12].mxu0 %v273_v22  ;;  %965 = vmatmul.mubr.bf16.gmra.mrb[12].mxu1 %v357_v23  ;;  %v283_v22 = vpack.c.bf16 %v94_v18, %v87_v17  ;;  %v140_v23 = vld [vmem:[%s4777_s0 + $0x380] sm:$0xff]  ;;  %v318_v17 = vpack.c.bf16 %v164_v12, %v157_v11  ;;  %v264_v18 = vpack.c.bf16 %v54_v14, %v47_v13 }
  0x3b   :  { %2593 = vmatpush3.bf16.msra.mxu1 %v3052_v25  ;;  %876 = vmatprep.mubr.bf16.mxu0 %v281_v26  ;;  %v86_v25 = vld [vmem:[%s4777_s0 + $0x1d0] sm:$0xff]  ;;  %v93_v26 = vld [vmem:[%s4777_s0 + $0x208] sm:$0xff]  ;;  %v308_v31 = vpack.c.bf16 %v147_v24, %v140_v23  ;;  %v171_v23 = vld [vmem:[%s4777_s0 + $0x478] sm:$0xff] }
  0x3c   :  { %2594 = vmatprep.subr.bf16.mxu1 %v3054_v27  ;;  %1005 = vmatprep.mubr.bf16.mxu1 %v255_v28  ;;  %v155_v27 = vld [vmem:[%s4777_s0 + $0x3f8] sm:$0xff]  ;;  %v162_v28 = vld [vmem:[%s4777_s0 + $0x430] sm:$0xff]  ;;  %v282_v32 = vpack.c.bf16 %v93_v26, %v86_v25  ;;  %v61_v25 = vld [vmem:[%s4777_s0 + $0x108] sm:$0xff] }
  0x3d   :  { %2703 = vmatpush3.bf16.msra.mxu0 %v3062_v48  ;;  %v316_v33 = vpack.c.bf16 %v162_v28, %v155_v27  ;;  %v175_v48 = vld [vmem:[%s4777_s0 + $0x498] sm:$0xff]  ;;  %v178_v24 = vld [vmem:[%s4777_s0 + $0x4b0] sm:$0xff]  ;;  %v68_v26 = vld [vmem:[%s4777_s0 + $0x140] sm:$0xff] }
  0x3e   :  { %2704 = vmatprep.subr.bf16.mxu0 %v3063_v59  ;;  %v182_v59 = vld [vmem:[%s4777_s0 + $0x4d0] sm:$0xff] }
  0x3f   :  { %2595 = vmatpush3.bf16.msra.mxu1 %v3055_v29  ;;  %v101_v29 = vld [vmem:[%s4777_s0 + $0x248] sm:$0xff]  ;;  %v329_v3 = vpack.c.bf16 %v189_v60, %v182_v59 }
  0x40   :  { %2869 = vmatprep.subr.bf16.mxu1 %v3056_v34 }
  0x41   :  { %2705 = vmatpush3.bf16.msra.mxu0 %v3064_v61  ;;  %v128_v61 = vld [vmem:[%s4777_s0 + $0x320] sm:$0xff] }
  0x42   :  { %877 = vmatmul.mubr.bf16.gmra.mrb[16].mxu0 %v280_v41  ;;  %1006 = vmatmul.mubr.bf16.vlgmr.msra.gmra.mrb[16].mxu1 %v254_v42  ;;  %v115_v41 = vld [vmem:[%s4777_s0 + $0x2b8] sm:$0xff]  ;;  %v122_v42 = vld [vmem:[%s4777_s0 + $0x2f0] sm:$0xff]  ;;  %v303_v4 = vpack.c.bf16 %v135_v62, %v128_v61 }
  0x43   :  { %2870 = vmatpush3.bf16.msra.mxu1 %v3056_v34  ;;  %884 = vmatprep.mubr.bf16.mxu0 %v288_v43  ;;  %v290_v34 = vpack.c.bf16 %v108_v30, %v101_v29  ;;  %v315_v43 = vpack.c.bf16 %v161_v36, %v154_v35  ;;  %v297_v46 = vpack.c.bf16 %v122_v42, %v115_v41 }
  0x44   :  { %1013 = vmatprep.mubr.bf16.mxu1 %v262_v44  ;;  %2706 = vmatprep.subr.bf16.mxu0 %v3065_v5  ;;  %v289_v44 = vpack.c.bf16 %v107_v38, %v100_v37  ;;  %v311_v5 = vpack.c.bf16 %v150_v0, %v143_v63 }
  0x45   :  { %2707 = vmatpush3.bf16.msra.mxu0 %v3066_v8  ;;  %v149_v8 = vld [vmem:[%s4777_s0 + $0x3c8] sm:$0xff] }
  0x4a   :  { %885 = vmatmul.mubr.bf16.gmra.mrb[20].mxu0 %v287_v55  ;;  %1014 = vmatmul.mubr.bf16.gmra.mrb[20].mxu1 %v261_v56  ;;  %v322_v55 = vpack.c.bf16 %v175_v48, %v168_v47  ;;  %v296_v56 = vpack.c.bf16 %v121_v50, %v114_v49 }
  0x4b   :  { %892 = vmatprep.mubr.bf16.mxu0 %v295_v57  ;;  %1021 = vmatprep.mubr.bf16.mxu1 %v269_v58  ;;  %v330_v57 = vpack.c.bf16 %v190_v52, %v183_v51  ;;  %v304_v58 = vpack.c.bf16 %v136_v54, %v129_v53 }
  0x52   :  { %893 = vmatmul.mubr.bf16.gmra.mrb[24].mxu0 %v294_v6  ;;  %1022 = vmatmul.mubr.bf16.gmra.mrb[24].mxu1 %v268_v7  ;;  %v257_v6 = vpack.c.bf16 %v40_v2, %v33_v1  ;;  %v142_v7 = vld [vmem:[%s4777_s0 + $0x390] sm:$0xff] }
  0x53   :  { %900 = vmatprep.mubr.bf16.mxu0 %v302_v9  ;;  %1029 = vmatprep.mubr.bf16.mxu1 %v276_v10  ;;  %v32_v9 = vld [vmem:[%s4777_s0 + $0x20] sm:$0xff]  ;;  %v39_v10 = vld [vmem:[%s4777_s0 + $0x58] sm:$0xff]  ;;  %v310_v15 = vpack.c.bf16 %v149_v8, %v142_v7 }
  0x54   :  { %v256_v16 = vpack.c.bf16 %v39_v10, %v32_v9 }
  0x5a   :  { %901 = vmatmul.mubr.bf16.gmra.mrb[28].mxu0 %v301_v19  ;;  %1030 = vmatmul.mubr.bf16.gmra.mrb[28].mxu1 %v275_v20  ;;  %v156_v19 = vld [vmem:[%s4777_s0 + $0x400] sm:$0xff]  ;;  %v163_v20 = vld [vmem:[%s4777_s0 + $0x438] sm:$0xff] }
  0x5b   :  { %908 = vmatprep.mubr.bf16.mxu0 %v309_v21  ;;  %1037 = vmatprep.mubr.bf16.mxu1 %v283_v22  ;;  %v46_v21 = vld [vmem:[%s4777_s0 + $0x90] sm:$0xff]  ;;  %v53_v22 = vld [vmem:[%s4777_s0 + $0xc8] sm:$0xff]  ;;  %v317_v27 = vpack.c.bf16 %v163_v20, %v156_v19 }
  0x5c   :  { %v263_v28 = vpack.c.bf16 %v53_v22, %v46_v21 }
  0x62   :  { %909 = vmatmul.mubr.bf16.gmra.mrb[32].mxu0 %v308_v31  ;;  %1038 = vmatmul.mubr.bf16.gmra.mrb[32].mxu1 %v282_v32 }
  0x63   :  { %916 = vmatprep.mubr.bf16.mxu0 %v316_v33  ;;  %1045 = vmatprep.mubr.bf16.mxu1 %v290_v34 }
  0x6a   :  { %917 = vmatmul.mubr.bf16.gmra.mrb[36].mxu0 %v315_v43  ;;  %1046 = vmatmul.mubr.bf16.gmra.mrb[36].mxu1 %v289_v44 }
  0x6b   :  { %924 = vmatprep.mubr.bf16.mxu0 %v323_v45  ;;  %1053 = vmatprep.mubr.bf16.mxu1 %v297_v46 }
  0x72   :  { %925 = vmatmul.mubr.bf16.gmra.mrb[40].mxu0 %v322_v55  ;;  %1054 = vmatmul.mubr.bf16.gmra.mrb[40].mxu1 %v296_v56 }
  0x73   :  { %932 = vmatprep.mubr.bf16.mxu0 %v330_v57  ;;  %1061 = vmatprep.mubr.bf16.mxu1 %v304_v58 }
  0x7a   :  { %933 = vmatmul.mubr.bf16.gmra.mrb[44].mxu0 %v329_v3  ;;  %1062 = vmatmul.mubr.bf16.gmra.mrb[44].mxu1 %v303_v4 }
  0x7b   :  { %1069 = vmatprep.mubr.bf16.mxu1 %v311_v5  ;;  %1166 = vmatprep.mubr.bf16.mxu0 %v257_v6 }
  0x82   :  { %1070 = vmatmul.mubr.bf16.gmra.mrb[48].mxu1 %v310_v15  ;;  %1167 = vmatmul.mubr.bf16.vlgmr.msra.gmra.mrb[48].mxu0 %v256_v16 }
  0x83   :  { %1077 = vmatprep.mubr.bf16.mxu1 %v318_v17  ;;  %1174 = vmatprep.mubr.bf16.mxu0 %v264_v18 }
  0x84   :  { %12 = vsyncpa [#allocation3], 0  ;;  %v325_v29 = vpack.c.bf16 %v178_v24, %v171_v23  ;;  %v271_v30 = vpack.c.bf16 %v68_v26, %v61_v25  ;;  %v170_v31 = vld [vmem:[%s4777_s0 + $0x470] sm:$0xff]  ;;  %v177_v32 = vld [vmem:[%s4777_s0 + $0x4a8] sm:$0xff]  ;;  %vm763_vm0 = vcmask 130048  }
  0x85   :  { %v60_v33 = vld [vmem:[%s4777_s0 + $0x100] sm:$0xff]  ;;  %v67_v34 = vld [vmem:[%s4777_s0 + $0x138] sm:$0xff]  ;;  %v185_v35 = vld [vmem:[%s4777_s0 + $0x4e8] sm:$0xff]  ;;  %v324_v39 = vpack.c.bf16 %v177_v32, %v170_v31 }
  0x86   :  { %v192_v36 = vld [vmem:[%s4777_s0 + $0x520] sm:$0xff]  ;;  %v75_v37 = vld [vmem:[%s4777_s0 + $0x178] sm:$0xff]  ;;  %v82_v38 = vld [vmem:[%s4777_s0 + $0x1b0] sm:$0xff]  ;;  %v270_v40 = vpack.c.bf16 %v67_v34, %v60_v33 }
  0x87   :  { %v332_v41 = vpack.c.bf16 %v192_v36, %v185_v35  ;;  %v278_v42 = vpack.c.bf16 %v82_v38, %v75_v37  ;;  %v184_v43 = vld [vmem:[%s4777_s0 + $0x4e0] sm:$0xff]  ;;  %v191_v44 = vld [vmem:[%s4777_s0 + $0x518] sm:$0xff]  ;;  %v74_v45 = vld [vmem:[%s4777_s0 + $0x170] sm:$0xff] }
  0x88   :  { %v81_v46 = vld [vmem:[%s4777_s0 + $0x1a8] sm:$0xff]  ;;  %v199_v47 = vld [vmem:[%s4777_s0 + $0x558] sm:$0xff]  ;;  %v206_v48 = vld [vmem:[%s4777_s0 + $0x590] sm:$0xff]  ;;  %v331_v51 = vpack.c.bf16 %v191_v44, %v184_v43 }
  0x89   :  { %v89_v49 = vld [vmem:[%s4777_s0 + $0x1e8] sm:$0xff]  ;;  %v96_v50 = vld [vmem:[%s4777_s0 + $0x220] sm:$0xff]  ;;  %v277_v52 = vpack.c.bf16 %v81_v46, %v74_v45  ;;  %v339_v53 = vpack.c.bf16 %v206_v48, %v199_v47  ;;  %v198_v55 = vld [vmem:[%s4777_s0 + $0x550] sm:$0xff] }
  0x8a   :  { %1078 = vmatmul.mubr.bf16.gmra.mrb[52].mxu1 %v317_v27  ;;  %1175 = vmatmul.mubr.bf16.gmra.mrb[52].mxu0 %v263_v28  ;;  %v285_v54 = vpack.c.bf16 %v96_v50, %v89_v49  ;;  %v205_v56 = vld [vmem:[%s4777_s0 + $0x588] sm:$0xff]  ;;  %v88_v57 = vld [vmem:[%s4777_s0 + $0x1e0] sm:$0xff]  ;;  %v95_v58 = vld [vmem:[%s4777_s0 + $0x218] sm:$0xff] }
  0x8b   :  { %1085 = vmatprep.mubr.bf16.mxu1 %v325_v29  ;;  %1182 = vmatprep.mubr.bf16.mxu0 %v271_v30  ;;  %v213_v59 = vld [vmem:[%s4777_s0 + $0x5c8] sm:$0xff]  ;;  %v220_v60 = vld [vmem:[%s4777_s0 + $0x600] sm:$0xff]  ;;  %v103_v61 = vld [vmem:[%s4777_s0 + $0x258] sm:$0xff]  ;;  %v338_v63 = vpack.c.bf16 %v205_v56, %v198_v55  ;;  %v284_v0 = vpack.c.bf16 %v95_v58, %v88_v57 }
  0x8c   :  { %v110_v62 = vld [vmem:[%s4777_s0 + $0x290] sm:$0xff]  ;;  %v346_v1 = vpack.c.bf16 %v220_v60, %v213_v59  ;;  %v212_v3 = vld [vmem:[%s4777_s0 + $0x5c0] sm:$0xff]  ;;  %v219_v4 = vld [vmem:[%s4777_s0 + $0x5f8] sm:$0xff] }
  0x8d   :  { %v292_v2 = vpack.c.bf16 %v110_v62, %v103_v61  ;;  %v102_v5 = vld [vmem:[%s4777_s0 + $0x250] sm:$0xff]  ;;  %v109_v6 = vld [vmem:[%s4777_s0 + $0x288] sm:$0xff]  ;;  %v227_v7 = vld [vmem:[%s4777_s0 + $0x638] sm:$0xff]  ;;  %v345_v11 = vpack.c.bf16 %v219_v4, %v212_v3 }
  0x8e   :  { %v234_v8 = vld [vmem:[%s4777_s0 + $0x670] sm:$0xff]  ;;  %v117_v9 = vld [vmem:[%s4777_s0 + $0x2c8] sm:$0xff]  ;;  %v124_v10 = vld [vmem:[%s4777_s0 + $0x300] sm:$0xff]  ;;  %v291_v12 = vpack.c.bf16 %v109_v6, %v102_v5 }
  0x8f   :  { %v353_v13 = vpack.c.bf16 %v234_v8, %v227_v7  ;;  %v299_v14 = vpack.c.bf16 %v124_v10, %v117_v9  ;;  %v226_v15 = vld [vmem:[%s4777_s0 + $0x630] sm:$0xff]  ;;  %v233_v16 = vld [vmem:[%s4777_s0 + $0x668] sm:$0xff]  ;;  %v116_v17 = vld [vmem:[%s4777_s0 + $0x2c0] sm:$0xff] }
  0x90   :  { %v123_v18 = vld [vmem:[%s4777_s0 + $0x2f8] sm:$0xff]  ;;  %v241_v19 = vld [vmem:[%s4777_s0 + $0x6a8] sm:$0xff]  ;;  %v248_v20 = vld [vmem:[%s4777_s0 + $0x6e0] sm:$0xff]  ;;  %v352_v23 = vpack.c.bf16 %v233_v16, %v226_v15 }
  0x91   :  { %v131_v21 = vld [vmem:[%s4777_s0 + $0x338] sm:$0xff]  ;;  %v138_v22 = vld [vmem:[%s4777_s0 + $0x370] sm:$0xff]  ;;  %v298_v24 = vpack.c.bf16 %v123_v18, %v116_v17  ;;  %v360_v25 = vpack.c.bf16 %v248_v20, %v241_v19  ;;  %v240_v27 = vld [vmem:[%s4777_s0 + $0x6a0] sm:$0xff] }
  0x92   :  { %1086 = vmatmul.mubr.bf16.gmra.mrb[56].mxu1 %v324_v39  ;;  %1183 = vmatmul.mubr.bf16.gmra.mrb[56].mxu0 %v270_v40  ;;  %v306_v26 = vpack.c.bf16 %v138_v22, %v131_v21  ;;  %v247_v28 = vld [vmem:[%s4777_s0 + $0x6d8] sm:$0xff]  ;;  %v130_v29 = vld [vmem:[%s4777_s0 + $0x330] sm:$0xff]  ;;  %v137_v30 = vld [vmem:[%s4777_s0 + $0x368] sm:$0xff] }
  0x93   :  { %1093 = vmatprep.mubr.bf16.mxu1 %v332_v41  ;;  %1190 = vmatprep.mubr.bf16.mxu0 %v278_v42  ;;  %v145_v31 = vld [vmem:[%s4777_s0 + $0x3a8] sm:$0xff]  ;;  %v152_v32 = vld [vmem:[%s4777_s0 + $0x3e0] sm:$0xff]  ;;  %v34_v33 = vld [vmem:[%s4777_s0 + $0x30] sm:$0xff]  ;;  %v359_v35 = vpack.c.bf16 %v247_v28, %v240_v27  ;;  %v305_v36 = vpack.c.bf16 %v137_v30, %v130_v29 }
  0x94   :  { %v41_v34 = vld [vmem:[%s4777_s0 + $0x68] sm:$0xff]  ;;  %v313_v37 = vpack.c.bf16 %v152_v32, %v145_v31  ;;  %v144_v39 = vld [vmem:[%s4777_s0 + $0x3a0] sm:$0xff]  ;;  %v151_v40 = vld [vmem:[%s4777_s0 + $0x3d8] sm:$0xff] }
  0x95   :  { %v258_v38 = vpack.c.bf16 %v41_v34, %v34_v33  ;;  %v48_v41 = vld [vmem:[%s4777_s0 + $0xa0] sm:$0xff]  ;;  %v55_v42 = vld [vmem:[%s4777_s0 + $0xd8] sm:$0xff]  ;;  %v166_v44 = vld [vmem:[%s4777_s0 + $0x450] sm:$0xff]  ;;  %v312_v47 = vpack.c.bf16 %v151_v40, %v144_v39 }
  0x96   :  { %v159_v43 = vld [vmem:[%s4777_s0 + $0x418] sm:$0xff]  ;;  %v62_v45 = vld [vmem:[%s4777_s0 + $0x110] sm:$0xff]  ;;  %v69_v46 = vld [vmem:[%s4777_s0 + $0x148] sm:$0xff]  ;;  %v265_v48 = vpack.c.bf16 %v55_v42, %v48_v41 }
  0x97   :  { %v320_v49 = vpack.c.bf16 %v166_v44, %v159_v43  ;;  %v272_v50 = vpack.c.bf16 %v69_v46, %v62_v45  ;;  %v173_v55 = vld [vmem:[%s4777_s0 + $0x488] sm:$0xff]  ;;  %v180_v56 = vld [vmem:[%s4777_s0 + $0x4c0] sm:$0xff]  ;;  %v90_v57 = vld [vmem:[%s4777_s0 + $0x1f0] sm:$0xff] }
  0x98   :  { %v97_v58 = vld [vmem:[%s4777_s0 + $0x228] sm:$0xff]  ;;  %v327_v61 = vpack.c.bf16 %v180_v56, %v173_v55  ;;  %v187_v3 = vld [vmem:[%s4777_s0 + $0x4f8] sm:$0xff]  ;;  %v194_v4 = vld [vmem:[%s4777_s0 + $0x530] sm:$0xff] }
  0x99   :  { %v286_v62 = vpack.c.bf16 %v97_v58, %v90_v57  ;;  %v118_v5 = vld [vmem:[%s4777_s0 + $0x2d0] sm:$0xff]  ;;  %v125_v6 = vld [vmem:[%s4777_s0 + $0x308] sm:$0xff]  ;;  %v334_v9 = vpack.c.bf16 %v194_v4, %v187_v3  ;;  %v208_v16 = vld [vmem:[%s4777_s0 + $0x5a0] sm:$0xff] }
  0x9a   :  { %1094 = vmatmul.mubr.bf16.gmra.mrb[60].mxu1 %v331_v51  ;;  %1191 = vmatmul.mubr.bf16.gmra.mrb[60].mxu0 %v277_v52  ;;  %v158_v51 = vld [vmem:[%s4777_s0 + $0x410] sm:$0xff]  ;;  %v165_v52 = vld [vmem:[%s4777_s0 + $0x448] sm:$0xff]  ;;  %v300_v10 = vpack.c.bf16 %v125_v6, %v118_v5  ;;  %v215_v27 = vld [vmem:[%s4777_s0 + $0x5d8] sm:$0xff] }
  0x9b   :  { %1101 = vmatprep.mubr.bf16.mxu1 %v339_v53  ;;  %1198 = vmatprep.mubr.bf16.mxu0 %v285_v54  ;;  %v76_v53 = vld [vmem:[%s4777_s0 + $0x180] sm:$0xff]  ;;  %v83_v54 = vld [vmem:[%s4777_s0 + $0x1b8] sm:$0xff]  ;;  %v319_v59 = vpack.c.bf16 %v165_v52, %v158_v51  ;;  %v201_v15 = vld [vmem:[%s4777_s0 + $0x568] sm:$0xff] }
  0x9c   :  { %v279_v60 = vpack.c.bf16 %v83_v54, %v76_v53  ;;  %v146_v17 = vld [vmem:[%s4777_s0 + $0x3b0] sm:$0xff]  ;;  %v153_v18 = vld [vmem:[%s4777_s0 + $0x3e8] sm:$0xff]  ;;  %v341_v21 = vpack.c.bf16 %v208_v16, %v201_v15  ;;  %v3067_v40 = vld [vmem:[%s4780_s3] sm:$0xff]  }
  0x9d   :  { %v314_v22 = vpack.c.bf16 %v153_v18, %v146_v17  ;;  %v222_v28 = vld [vmem:[%s4777_s0 + $0x610] sm:$0xff]  ;;  %v181_v30 = vld [vmem:[%s4777_s0 + $0x4c8] sm:$0xff]  ;;  %v236_v41 = vld [vmem:[%s4777_s0 + $0x680] sm:$0xff]  ;;  %2903 = vmatprep.subr.bf16.mxu1 %v3067_v40 }
  0x9e   :  { %v174_v29 = vld [vmem:[%s4777_s0 + $0x490] sm:$0xff]  ;;  %v348_v33 = vpack.c.bf16 %v222_v28, %v215_v27  ;;  %v229_v39 = vld [vmem:[%s4777_s0 + $0x648] sm:$0xff]  ;;  %v223_v51 = vld [vmem:[%s4777_s0 + $0x618] sm:$0xff] }
  0x9f   :  { %v328_v34 = vpack.c.bf16 %v181_v30, %v174_v29  ;;  %v202_v42 = vld [vmem:[%s4777_s0 + $0x570] sm:$0xff]  ;;  %v209_v43 = vld [vmem:[%s4777_s0 + $0x5a8] sm:$0xff]  ;;  %v355_v46 = vpack.c.bf16 %v236_v41, %v229_v39  ;;  %v243_v52 = vld [vmem:[%s4777_s0 + $0x6b8] sm:$0xff] }
  0xa0   :  { %v3068_v53 = vld [vmem:[%s4780_s3 + $0x8] sm:$0xff]   ;;  %v250_v54 = vld [vmem:[%s4777_s0 + $0x6f0] sm:$0xff]  ;;  %v3070_v16 = vld [vmem:[%s4780_s3 + $0x18] sm:$0xff]  }
  0xa1   :  { %v230_v55 = vld [vmem:[%s4777_s0 + $0x650] sm:$0xff]  ;;  %v237_v56 = vld [vmem:[%s4777_s0 + $0x688] sm:$0xff]  ;;  %v3071_v29 = vld [vmem:[%s4780_s3 + $0x20] sm:$0xff]  }
  0xa2   :  { %1102 = vmatmul.mubr.bf16.gmra.mrb[64].mxu1 %v338_v63  ;;  %1199 = vmatmul.mubr.bf16.gmra.mrb[64].mxu0 %v284_v0  ;;  %v172_v63 = vld [vmem:[%s4777_s0 + $0x480] sm:$0xff]  ;;  %v179_v0 = vld [vmem:[%s4777_s0 + $0x4b8] sm:$0xff] }
  0xa3   :  { %1109 = vmatprep.mubr.bf16.mxu1 %v346_v1  ;;  %1206 = vmatprep.mubr.bf16.mxu0 %v292_v2  ;;  %v104_v1 = vld [vmem:[%s4777_s0 + $0x260] sm:$0xff]  ;;  %v111_v2 = vld [vmem:[%s4777_s0 + $0x298] sm:$0xff]  ;;  %v326_v7 = vpack.c.bf16 %v179_v0, %v172_v63 }
  0xa4   :  { %v293_v8 = vpack.c.bf16 %v111_v2, %v104_v1  ;;  %v244_v63 = vld [vmem:[%s4777_s0 + $0x6c0] sm:$0xff]  ;;  %v251_v0 = vld [vmem:[%s4777_s0 + $0x6f8] sm:$0xff]  ;;  %v3069_v1 = vld [vmem:[%s4780_s3 + $0x10] sm:$0xff]  }
  0xaa   :  { %1110 = vmatmul.mubr.bf16.gmra.mrb[68].mxu1 %v345_v11  ;;  %1207 = vmatmul.mubr.bf16.gmra.mrb[68].mxu0 %v291_v12  ;;  %v186_v11 = vld [vmem:[%s4777_s0 + $0x4f0] sm:$0xff]  ;;  %v193_v12 = vld [vmem:[%s4777_s0 + $0x528] sm:$0xff] }
  0xab   :  { %1117 = vmatprep.mubr.bf16.mxu1 %v353_v13  ;;  %1214 = vmatprep.mubr.bf16.mxu0 %v299_v14  ;;  %v132_v13 = vld [vmem:[%s4777_s0 + $0x340] sm:$0xff]  ;;  %v139_v14 = vld [vmem:[%s4777_s0 + $0x378] sm:$0xff]  ;;  %v333_v19 = vpack.c.bf16 %v193_v12, %v186_v11 }
  0xac   :  { %v307_v20 = vpack.c.bf16 %v139_v14, %v132_v13 }
  0xb2   :  { %1118 = vmatmul.mubr.bf16.gmra.mrb[72].mxu1 %v352_v23  ;;  %1215 = vmatmul.mubr.bf16.gmra.mrb[72].mxu0 %v298_v24  ;;  %v200_v23 = vld [vmem:[%s4777_s0 + $0x560] sm:$0xff]  ;;  %v207_v24 = vld [vmem:[%s4777_s0 + $0x598] sm:$0xff] }
  0xb3   :  { %1125 = vmatprep.mubr.bf16.mxu1 %v360_v25  ;;  %1222 = vmatprep.mubr.bf16.mxu0 %v306_v26  ;;  %v160_v25 = vld [vmem:[%s4777_s0 + $0x420] sm:$0xff]  ;;  %v167_v26 = vld [vmem:[%s4777_s0 + $0x458] sm:$0xff]  ;;  %v340_v31 = vpack.c.bf16 %v207_v24, %v200_v23 }
  0xb4   :  { %v321_v32 = vpack.c.bf16 %v167_v26, %v160_v25 }
  0xba   :  { %1126 = vmatmul.mubr.bf16.gmra.mrb[76].mxu1 %v359_v35  ;;  %1223 = vmatmul.mubr.bf16.gmra.mrb[76].mxu0 %v305_v36  ;;  %v214_v35 = vld [vmem:[%s4777_s0 + $0x5d0] sm:$0xff]  ;;  %v221_v36 = vld [vmem:[%s4777_s0 + $0x608] sm:$0xff] }
  0xbb   :  { %1230 = vmatprep.mubr.bf16.mxu0 %v313_v37  ;;  %2871 = vmatprep.mubr.msk.bf16.mxu1 %vm763_vm0, %v258_v38  ;;  %v188_v37 = vld [vmem:[%s4777_s0 + $0x500] sm:$0xff]  ;;  %v195_v38 = vld [vmem:[%s4777_s0 + $0x538] sm:$0xff]  ;;  %v347_v44 = vpack.c.bf16 %v221_v36, %v214_v35 }
  0xbc   :  { %v335_v45 = vpack.c.bf16 %v195_v38, %v188_v37 }
  0xc2   :  { %1231 = vmatmul.mubr.bf16.gmra.mrb[80].mxu0 %v312_v47  ;;  %2872 = vmatmul.mubr.msk.bf16.vlgmr.msra.gmra.mrb[80].mxu1 %vm763_vm0, %v265_v48  ;;  %v342_v47 = vpack.c.bf16 %v209_v43, %v202_v42  ;;  %v228_v48 = vld [vmem:[%s4777_s0 + $0x640] sm:$0xff]  ;;  %v3072_v42 = vld [vmem:[%s4780_s3 + $0x28] sm:$0xff]  }
  0xc3   :  { %1238 = vmatprep.mubr.bf16.mxu0 %v320_v49  ;;  %2875 = vmatprep.mubr.msk.bf16.mxu1 %vm763_vm0, %v272_v50  ;;  %v235_v49 = vld [vmem:[%s4777_s0 + $0x678] sm:$0xff]  ;;  %v216_v50 = vld [vmem:[%s4777_s0 + $0x5e0] sm:$0xff] }
  0xc4   :  { %2904 = vmatpush3.bf16.msra.mxu1 %v3067_v40  ;;  %v354_v57 = vpack.c.bf16 %v235_v49, %v228_v48  ;;  %v349_v58 = vpack.c.bf16 %v223_v51, %v216_v50 }
  0xc5   :  { %2905 = vmatprep.subr.bf16.mxu1 %v3068_v53 }
  0xc8   :  { %2906 = vmatpush3.bf16.msra.mxu1 %v3068_v53 }
  0xc9   :  { %2907 = vmatprep.subr.bf16.mxu1 %v3069_v1 }
  0xca   :  { %1239 = vmatmul.mubr.bf16.gmra.mrb[84].mxu0 %v319_v59  ;;  %2876 = vmatmul.mubr.msk.bf16.gmra.mrb[84].mxu1 %vm763_vm0, %v279_v60  ;;  %v362_v59 = vpack.c.bf16 %v250_v54, %v243_v52  ;;  %v356_v60 = vpack.c.bf16 %v237_v56, %v230_v55  ;;  %v3073_v55 = vld [vmem:[%s4780_s3 + $0x30] sm:$0xff]   ;;  %v4169_v56 = vld [vmem:[%s4779_s2] ss:$0 sm:$0xff] }
  0xcb   :  { %1246 = vmatprep.mubr.bf16.mxu0 %v327_v61  ;;  %2879 = vmatprep.mubr.msk.bf16.mxu1 %vm763_vm0, %v286_v62  ;;  %v242_v61 = vld [vmem:[%s4777_s0 + $0x6b0] sm:$0xff]  ;;  %v249_v62 = vld [vmem:[%s4777_s0 + $0x6e8] sm:$0xff] }
  0xcc   :  { %v361_v6 = vpack.c.bf16 %v249_v62, %v242_v61  ;;  %2908 = vmatpush3.bf16.msra.mxu1 %v3069_v1 }
  0xcd   :  { %2909 = vmatprep.subr.bf16.mxu1 %v3070_v16 }
  0xd0   :  { %2910 = vmatpush3.bf16.msra.mxu1 %v3070_v16 }
  0xd1   :  { %2911 = vmatprep.subr.bf16.mxu1 %v3071_v29 }
  0xd2   :  { %1247 = vmatmul.mubr.bf16.gmra.mrb[88].mxu0 %v326_v7  ;;  %2880 = vmatmul.mubr.msk.bf16.gmra.mrb[88].mxu1 %vm763_vm0, %v293_v8  ;;  %v363_v7 = vpack.c.bf16 %v251_v0, %v244_v63 }
  0xd3   :  { %1254 = vmatprep.mubr.bf16.mxu0 %v334_v9  ;;  %2883 = vmatprep.mubr.msk.bf16.mxu1 %vm763_vm0, %v300_v10 }
  0xd4   :  { %2912 = vmatpush3.bf16.msra.mxu1 %v3071_v29 }
  0xd5   :  { %2913 = vmatprep.subr.bf16.mxu1 %v3072_v42 }
  0xd8   :  { %2914 = vmatpush3.bf16.msra.mxu1 %v3072_v42 }
  0xd9   :  { %2915 = vmatprep.subr.bf16.mxu1 %v3073_v55 }
  0xda   :  { %1255 = vmatmul.mubr.bf16.gmra.mrb[92].mxu0 %v333_v19  ;;  %2884 = vmatmul.mubr.msk.bf16.gmra.mrb[92].mxu1 %vm763_vm0, %v307_v20 }
  0xdb   :  { %1262 = vmatprep.mubr.bf16.mxu0 %v341_v21  ;;  %2887 = vmatprep.mubr.msk.bf16.mxu1 %vm763_vm0, %v314_v22 }
  0xdc   :  { %2916 = vmatpush3.bf16.msra.mxu1 %v3073_v55 }
  0xe2   :  { %1263 = vmatmul.mubr.bf16.gmra.mrb[96].mxu0 %v340_v31  ;;  %2888 = vmatmul.mubr.msk.bf16.gmra.mrb[96].mxu1 %vm763_vm0, %v321_v32 }
  0xe3   :  { %1270 = vmatprep.mubr.bf16.mxu0 %v348_v33  ;;  %2891 = vmatprep.mubr.msk.bf16.mxu1 %vm763_vm0, %v328_v34 }
  0xea   :  { %1271 = vmatmul.mubr.bf16.gmra.mrb[100].mxu0 %v347_v44  ;;  %2892 = vmatmul.mubr.msk.bf16.gmra.mrb[100].mxu1 %vm763_vm0, %v335_v45 }
  0xeb   :  { %1278 = vmatprep.mubr.bf16.mxu0 %v355_v46  ;;  %2895 = vmatprep.mubr.msk.bf16.mxu1 %vm763_vm0, %v342_v47 }
  0xf2   :  { %1279 = vmatmul.mubr.bf16.gmra.mrb[104].mxu0 %v354_v57  ;;  %2896 = vmatmul.mubr.msk.bf16.gmra.mrb[104].mxu1 %vm763_vm0, %v349_v58 }
  0xf3   :  { %1286 = vmatprep.mubr.bf16.mxu0 %v362_v59  ;;  %2899 = vmatprep.mubr.msk.bf16.mxu1 %vm763_vm0, %v356_v60 }
  0xf5   :  { %v2484_v2 = vpop.f32.mrb[0].mxu0  ;;  %v2556_v3 = vpop.f32.mrb[0].mxu1 }
  0xf6   :  { %v2485_v4 = vpop.f32.mrb[1].mxu0  ;;  %v2557_v5 = vpop.f32.mrb[1].mxu1 }
  0xf7   :  { %v4121_v8 = vadd.f32 %v2485_v4, %v2484_v2  ;;  %v4123_v9 = vadd.f32 %v2557_v5, %v2556_v3  ;;  %v2487_v10 = vpop.f32.mrb[2].mxu0  ;;  %v2559_v11 = vpop.f32.mrb[2].mxu1 }
  0xf8   :  { %v2488_v12 = vpop.f32.mrb[3].mxu0  ;;  %v2560_v13 = vpop.f32.mrb[3].mxu1 }
  0xf9   :  { %v4125_v14 = vadd.f32 %v2488_v12, %v2487_v10  ;;  %v4127_v15 = vadd.f32 %v2560_v13, %v2559_v11  ;;  %v847_v61 = vadd.f32 %v4121_v8, %v4169_v56  ;;  %v3074_v10 = vld [vmem:[%s4780_s3 + $0x38] sm:$0xff]  }
  0xfa   :  { %1287 = vmatmul.mubr.bf16.gmra.mrb[108].mxu0 %v361_v6  ;;  %2900 = vmatmul.mubr.msk.bf16.gmra.mrb[108].mxu1 %vm763_vm0, %v363_v7 }
  0xfb   :  { %v850_v4 = vadd.f32 %v4125_v14, %v4169_v56  ;;  %2917 = vmatprep.subr.bf16.mxu1 %v3074_v10 }
  0xfc   :  { %2918 = vmatpush3.bf16.msra.mxu1 %v3074_v10 }
  0xfd   :  { %v2490_v17 = vpop.f32.mrb[4].mxu0  ;;  %v2562_v18 = vpop.f32.mrb[4].mxu1 }
  0xfe   :  { %v2491_v19 = vpop.f32.mrb[5].mxu0  ;;  %v2563_v20 = vpop.f32.mrb[5].mxu1 }
  0xff   :  { %v4133_v21 = vadd.f32 %v2491_v19, %v2490_v17  ;;  %v4135_v22 = vadd.f32 %v2563_v20, %v2562_v18  ;;  %v2493_v23 = vpop.f32.mrb[6].mxu0  ;;  %v2565_v24 = vpop.f32.mrb[6].mxu1 }
 0x100   :  { %v2494_v25 = vpop.f32.mrb[7].mxu0  ;;  %v2566_v26 = vpop.f32.mrb[7].mxu1 }
 0x101   :  { %v4137_v27 = vadd.f32 %v2494_v25, %v2493_v23  ;;  %v4139_v28 = vadd.f32 %v2566_v26, %v2565_v24  ;;  %v855_v14 = vadd.f32 %v4133_v21, %v4169_v56 }
 0x103   :  { %v858_v25 = vadd.f32 %v4137_v27, %v4169_v56 }
 0x105   :  { %v2496_v30 = vpop.f32.mrb[8].mxu0  ;;  %v2568_v31 = vpop.f32.mrb[8].mxu1 }
 0x106   :  { %v2497_v32 = vpop.f32.mrb[9].mxu0  ;;  %v2569_v33 = vpop.f32.mrb[9].mxu1 }
 0x107   :  { %v4144_v34 = vadd.f32 %v2497_v32, %v2496_v30  ;;  %v4146_v35 = vadd.f32 %v2569_v33, %v2568_v31  ;;  %v2499_v36 = vpop.f32.mrb[10].mxu0  ;;  %v2571_v37 = vpop.f32.mrb[10].mxu1 }
 0x108   :  { %v2500_v38 = vpop.f32.mrb[11].mxu0  ;;  %v2572_v39 = vpop.f32.mrb[11].mxu1 }
 0x109   :  { %v4148_v40 = vadd.f32 %v2500_v38, %v2499_v36  ;;  %v4150_v41 = vadd.f32 %v2572_v39, %v2571_v37  ;;  %v863_v37 = vadd.f32 %v4144_v34, %v4169_v56 }
 0x10d   :  { %v2502_v43 = vpop.f32.mrb[12].mxu0  ;;  %v2574_v44 = vpop.f32.mrb[12].mxu1 }
 0x10e   :  { %v2503_v45 = vpop.f32.mrb[13].mxu0  ;;  %v2575_v46 = vpop.f32.mrb[13].mxu1 }
 0x10f   :  { %v4155_v47 = vadd.f32 %v2503_v45, %v2502_v43  ;;  %v4157_v48 = vadd.f32 %v2575_v46, %v2574_v44  ;;  %v2505_v49 = vpop.f32.mrb[14].mxu0  ;;  %v2577_v50 = vpop.f32.mrb[14].mxu1  ;;  %v866_v45 = vadd.f32 %v4148_v40, %v4169_v56 }
 0x110   :  { %v2506_v51 = vpop.f32.mrb[15].mxu0  ;;  %v2578_v52 = vpop.f32.mrb[15].mxu1 }
 0x111   :  { %v4159_v53 = vadd.f32 %v2506_v51, %v2505_v49  ;;  %v4161_v54 = vadd.f32 %v2578_v52, %v2577_v50 }
 0x115   :  { %v2508_v57 = vpop.f32.mrb[16].mxu0  ;;  %v2596_v58 = vpop.f32.mrb[16].mxu1 }
 0x116   :  { %v2509_v59 = vpop.f32.mrb[17].mxu0  ;;  %v2597_v60 = vpop.f32.mrb[17].mxu1 }
 0x117   :  { %v4173_v62 = vadd.f32 %v2509_v59, %v2508_v57  ;;  %v2598_v63 = vadd.f32 %v2597_v60, %v2596_v58  ;;  %v2511_v0 = vpop.f32.mrb[18].mxu0  ;;  %v2599_v1 = vpop.f32.mrb[18].mxu1  ;;  %v871_v58 = vadd.f32 %v4155_v47, %v4169_v56 }
 0x118   :  { %v2512_v2 = vpop.f32.mrb[19].mxu0  ;;  %v2600_v3 = vpop.f32.mrb[19].mxu1 }
 0x119   :  { %v4177_v5 = vadd.f32 %v2598_v63, %v847_v61  ;;  %v4179_v6 = vadd.f32 %v2512_v2, %v2511_v0  ;;  %v2601_v7 = vadd.f32 %v2600_v3, %v2599_v1  ;;  %v874_v1 = vadd.f32 %v4159_v53, %v4169_v56 }
 0x11b   :  { %v4184_v8 = vadd.f32 %v2601_v7, %v850_v4 }
 0x11d   :  { %v2514_v11 = vpop.f32.mrb[20].mxu0  ;;  %v2602_v12 = vpop.f32.mrb[20].mxu1 }
 0x11e   :  { %v2515_v13 = vpop.f32.mrb[21].mxu0  ;;  %v2603_v16 = vpop.f32.mrb[21].mxu1 }
 0x11f   :  { %v4188_v17 = vadd.f32 %v2515_v13, %v2514_v11  ;;  %v2604_v18 = vadd.f32 %v2603_v16, %v2602_v12  ;;  %v2517_v19 = vpop.f32.mrb[22].mxu0  ;;  %v2605_v20 = vpop.f32.mrb[22].mxu1  ;;  %v879_v13 = vadd.f32 %v4173_v62, %v4169_v56 }
 0x120   :  { %v2518_v23 = vpop.f32.mrb[23].mxu0  ;;  %v2606_v24 = vpop.f32.mrb[23].mxu1 }
 0x121   :  { %v4192_v26 = vadd.f32 %v2604_v18, %v855_v14  ;;  %v2519_v29 = vadd.f32 %v2518_v23, %v2517_v19  ;;  %v2607_v30 = vadd.f32 %v2606_v24, %v2605_v20  ;;  %v882_v23 = vadd.f32 %v4179_v6, %v4169_v56 }
 0x123   :  { %v4194_v31 = vadd.f32 %v2607_v30, %v858_v25 }
 0x125   :  { %v2520_v32 = vpop.f32.mrb[24].mxu0  ;;  %v2608_v33 = vpop.f32.mrb[24].mxu1 }
 0x126   :  { %v2521_v36 = vpop.f32.mrb[25].mxu0  ;;  %v2609_v21 = vpop.f32.mrb[25].mxu1 }
 0x127   :  { %v4198_v38 = vadd.f32 %v2521_v36, %v2520_v32  ;;  %v2610_v39 = vadd.f32 %v2609_v21, %v2608_v33  ;;  %v2523_v42 = vpop.f32.mrb[26].mxu0  ;;  %v2611_v43 = vpop.f32.mrb[26].mxu1 }
 0x128   :  { %v2524_v44 = vpop.f32.mrb[27].mxu0  ;;  %v2612_v27 = vpop.f32.mrb[27].mxu1 }
 0x129   :  { %v4202_v46 = vadd.f32 %v2610_v39, %v863_v37  ;;  %v2525_v49 = vadd.f32 %v2524_v44, %v2523_v42  ;;  %v2613_v50 = vadd.f32 %v2612_v27, %v2611_v43  ;;  %v887_v37 = vadd.f32 %v4188_v17, %v4169_v56 }
 0x12b   :  { %v4204_v51 = vadd.f32 %v2613_v50, %v866_v45  ;;  %v890_v45 = vadd.f32 %v2519_v29, %v4169_v56 }
 0x12d   :  { %v2526_v52 = vpop.f32.mrb[28].mxu0  ;;  %v2614_v55 = vpop.f32.mrb[28].mxu1 }
 0x12e   :  { %v2527_v57 = vpop.f32.mrb[29].mxu0  ;;  %v2615_v34 = vpop.f32.mrb[29].mxu1 }
 0x12f   :  { %v4208_v59 = vadd.f32 %v2527_v57, %v2526_v52  ;;  %v2616_v60 = vadd.f32 %v2615_v34, %v2614_v55  ;;  %v2529_v61 = vpop.f32.mrb[30].mxu0  ;;  %v2617_v63 = vpop.f32.mrb[30].mxu1 }
 0x130   :  { %v2530_v0 = vpop.f32.mrb[31].mxu0  ;;  %v2618_v40 = vpop.f32.mrb[31].mxu1 }
 0x131   :  { %v4212_v2 = vadd.f32 %v2616_v60, %v871_v58  ;;  %v2531_v3 = vadd.f32 %v2530_v0, %v2529_v61  ;;  %v2619_v4 = vadd.f32 %v2618_v40, %v2617_v63  ;;  %v895_v61 = vadd.f32 %v4198_v38, %v4169_v56 }
 0x133   :  { %v4214_v7 = vadd.f32 %v2619_v4, %v874_v1 }
 0x135   :  { %v2532_v10 = vpop.f32.mrb[32].mxu0  ;;  %v2620_v11 = vpop.f32.mrb[32].mxu1 }
 0x136   :  { %v2533_v12 = vpop.f32.mrb[33].mxu0  ;;  %v2621_v47 = vpop.f32.mrb[33].mxu1 }
 0x137   :  { %v4218_v16 = vadd.f32 %v2533_v12, %v2532_v10  ;;  %v2622_v14 = vadd.f32 %v2621_v47, %v2620_v11  ;;  %v2535_v18 = vpop.f32.mrb[34].mxu0  ;;  %v2623_v19 = vpop.f32.mrb[34].mxu1  ;;  %v898_v10 = vadd.f32 %v2525_v49, %v4169_v56 }
 0x138   :  { %v2536_v20 = vpop.f32.mrb[35].mxu0  ;;  %v2624_v53 = vpop.f32.mrb[35].mxu1 }
 0x139   :  { %v4222_v24 = vadd.f32 %v2622_v14, %v879_v13  ;;  %v2537_v25 = vadd.f32 %v2536_v20, %v2535_v18  ;;  %v2625_v30 = vadd.f32 %v2624_v53, %v2623_v19  ;;  %v903_v20 = vadd.f32 %v4208_v59, %v4169_v56 }
 0x13b   :  { %v4224_v32 = vadd.f32 %v2625_v30, %v882_v23 }
 0x13d   :  { %v2538_v33 = vpop.f32.mrb[36].mxu0  ;;  %v2626_v36 = vpop.f32.mrb[36].mxu1 }
 0x13e   :  { %v2539_v21 = vpop.f32.mrb[37].mxu0  ;;  %v2627_v62 = vpop.f32.mrb[37].mxu1 }
 0x13f   :  { %v4228_v39 = vadd.f32 %v2539_v21, %v2538_v33  ;;  %v2628_v42 = vadd.f32 %v2627_v62, %v2626_v36  ;;  %v2541_v43 = vpop.f32.mrb[38].mxu0  ;;  %v2629_v44 = vpop.f32.mrb[38].mxu1  ;;  %v906_v21 = vadd.f32 %v2531_v3, %v4169_v56  ;;  %v914_v3 = vadd.f32 %v2537_v25, %v4169_v56  ;;  %v3076_v25 = vld [vmem:[%s4782_s5 + $0x8] sm:$0xff]  }
 0x140   :  { %v2542_v27 = vpop.f32.mrb[39].mxu0  ;;  %v2630_v6 = vpop.f32.mrb[39].mxu1 }
 0x141   :  { %v4231_v50 = vadd.f32 %v2628_v42, %v887_v37  ;;  %v4233_v52 = vadd.f32 %v2542_v27, %v2541_v43  ;;  %v2631_v55 = vadd.f32 %v2630_v6, %v2629_v44 }
 0x143   :  { %v4235_v57 = vadd.f32 %v2631_v55, %v890_v45  ;;  %v911_v45 = vadd.f32 %v4218_v16, %v4169_v56  ;;  %v3075_v16 = vld [vmem:[%s4782_s5] sm:$0xff]  }
 0x144   :  { %2951 = vmatprep.subr.bf16.mxu0 %v3075_v16 }
 0x145   :  { %v2544_v34 = vpop.f32.mrb[40].mxu0  ;;  %v2632_v58 = vpop.f32.mrb[40].mxu1  ;;  %2952 = vmatpush3.bf16.msra.mxu0 %v3075_v16 }
 0x146   :  { %v2545_v60 = vpop.f32.mrb[41].mxu0  ;;  %v2633_v17 = vpop.f32.mrb[41].mxu1  ;;  %2953 = vmatprep.subr.bf16.mxu0 %v3076_v25 }
 0x147   :  { %v4239_v63 = vadd.f32 %v2545_v60, %v2544_v34  ;;  %v2634_v0 = vadd.f32 %v2633_v17, %v2632_v58  ;;  %v2547_v40 = vpop.f32.mrb[42].mxu0  ;;  %v2635_v1 = vpop.f32.mrb[42].mxu1 }
 0x148   :  { %v2548_v29 = vpop.f32.mrb[43].mxu0  ;;  %v2636_v4 = vpop.f32.mrb[43].mxu1 }
 0x149   :  { %v4242_v11 = vadd.f32 %v2634_v0, %v895_v61  ;;  %v4244_v12 = vadd.f32 %v2548_v29, %v2547_v40  ;;  %v2637_v47 = vadd.f32 %v2636_v4, %v2635_v1  ;;  %2954 = vmatpush3.bf16.msra.mxu0 %v3076_v25 }
 0x14b   :  { %v4246_v13 = vadd.f32 %v2637_v47, %v898_v10 }
 0x14d   :  { %v2550_v14 = vpop.f32.mrb[44].mxu0  ;;  %v2638_v18 = vpop.f32.mrb[44].mxu1 }
 0x14e   :  { %v2551_v19 = vpop.f32.mrb[45].mxu0  ;;  %v2639_v38 = vpop.f32.mrb[45].mxu1 }
 0x14f   :  { %v4250_v53 = vadd.f32 %v2551_v19, %v2550_v14  ;;  %v2640_v23 = vadd.f32 %v2639_v38, %v2638_v18  ;;  %v2553_v30 = vpop.f32.mrb[46].mxu0  ;;  %v2641_v33 = vpop.f32.mrb[46].mxu1 }
 0x150   :  { %v2554_v49 = vpop.f32.mrb[47].mxu0  ;;  %v2642_v36 = vpop.f32.mrb[47].mxu1 }
 0x151   :  { %v4253_v62 = vadd.f32 %v2640_v23, %v903_v20  ;;  %v4255_v37 = vadd.f32 %v2554_v49, %v2553_v30  ;;  %v2643_v42 = vadd.f32 %v2642_v36, %v2641_v33  ;;  %v3077_v30 = vld [vmem:[%s4782_s5 + $0x10] sm:$0xff]   ;;  %v922_v33 = vadd.f32 %v4233_v52, %v4169_v56  ;;  %v3078_v52 = vld [vmem:[%s4782_s5 + $0x18] sm:$0xff]  }
 0x152   :  { %2955 = vmatprep.subr.bf16.mxu0 %v3077_v30 }
 0x153   :  { %v4257_v43 = vadd.f32 %v2643_v42, %v906_v21  ;;  %2956 = vmatpush3.bf16.msra.mxu0 %v3077_v30 }
 0x154   :  { %2957 = vmatprep.subr.bf16.mxu0 %v3078_v52 }
 0x155   :  { %v2644_v44 = vpop.f32.mrb[48].mxu1  ;;  %v2708_v27 = vpop.f32.mrb[48].mxu0 }
 0x156   :  { %v2645_v6 = vpop.f32.mrb[49].mxu1  ;;  %v2709_v59 = vpop.f32.mrb[49].mxu0 }
 0x157   :  { %v2646_v55 = vadd.f32 %v2645_v6, %v2644_v44  ;;  %v2710_v34 = vadd.f32 %v2709_v59, %v2708_v27  ;;  %v2647_v58 = vpop.f32.mrb[50].mxu1  ;;  %v2711_v60 = vpop.f32.mrb[50].mxu0  ;;  %2958 = vmatpush3.bf16.msra.mxu0 %v3078_v52 }
 0x158   :  { %v2648_v17 = vpop.f32.mrb[51].mxu1  ;;  %v2712_v61 = vpop.f32.mrb[51].mxu0 }
 0x159   :  { %v4262_v0 = vadd.f32 %v2646_v55, %v911_v45  ;;  %v2649_v40 = vadd.f32 %v2648_v17, %v2647_v58  ;;  %v2713_v1 = vadd.f32 %v2712_v61, %v2711_v60  ;;  %v4265_v29 = vadd.f32 %v2710_v34, %v4177_v5 }
 0x15a   :  { %v919_v5 = vadd.f32 %v4228_v39, %v4169_v56  ;;  %v930_v61 = vadd.f32 %v4244_v12, %v4169_v56  ;;  %v3080_v12 = vld [vmem:[%s4782_s5 + $0x28] sm:$0xff]  }
 0x15b   :  { %v4267_v4 = vadd.f32 %v2649_v40, %v914_v3  ;;  %v4270_v10 = vadd.f32 %v2713_v1, %v4184_v8 }
 0x15d   :  { %v2650_v47 = vpop.f32.mrb[52].mxu1  ;;  %v2714_v14 = vpop.f32.mrb[52].mxu0 }
 0x15e   :  { %v2651_v18 = vpop.f32.mrb[53].mxu1  ;;  %v2715_v19 = vpop.f32.mrb[53].mxu0 }
 0x15f   :  { %v2652_v38 = vadd.f32 %v2651_v18, %v2650_v47  ;;  %v2716_v8 = vadd.f32 %v2715_v19, %v2714_v14  ;;  %v2653_v20 = vpop.f32.mrb[54].mxu1  ;;  %v2717_v23 = vpop.f32.mrb[54].mxu0 }
 0x160   :  { %v2654_v49 = vpop.f32.mrb[55].mxu1  ;;  %v2718_v36 = vpop.f32.mrb[55].mxu0 }
 0x161   :  { %v4285_v21 = vadd.f32 %v2652_v38, %v919_v5  ;;  %v2655_v42 = vadd.f32 %v2654_v49, %v2653_v20  ;;  %v2719_v44 = vadd.f32 %v2718_v36, %v2717_v23  ;;  %v4288_v39 = vadd.f32 %v2716_v8, %v4192_v26 }
 0x162   :  { %v927_v26 = vadd.f32 %v4239_v63, %v4169_v56  ;;  %v938_v49 = vadd.f32 %v4255_v37, %v4169_v56  ;;  %v3082_v37 = vld [vmem:[%s4782_s5 + $0x38] sm:$0xff]  }
 0x163   :  { %v4290_v27 = vadd.f32 %v2655_v42, %v922_v33  ;;  %v4293_v6 = vadd.f32 %v2719_v44, %v4194_v31  ;;  %v3079_v31 = vld [vmem:[%s4782_s5 + $0x20] sm:$0xff]  }
 0x164   :  { %2959 = vmatprep.subr.bf16.mxu0 %v3079_v31 }
 0x165   :  { %v2656_v59 = vpop.f32.mrb[56].mxu1  ;;  %v2720_v45 = vpop.f32.mrb[56].mxu0  ;;  %2960 = vmatpush3.bf16.msra.mxu0 %v3079_v31 }
 0x166   :  { %v2657_v55 = vpop.f32.mrb[57].mxu1  ;;  %v2721_v34 = vpop.f32.mrb[57].mxu0  ;;  %2961 = vmatprep.subr.bf16.mxu0 %v3080_v12 }
 0x167   :  { %v2658_v58 = vadd.f32 %v2657_v55, %v2656_v59  ;;  %v2722_v60 = vadd.f32 %v2721_v34, %v2720_v45  ;;  %v2659_v3 = vpop.f32.mrb[58].mxu1  ;;  %v2723_v17 = vpop.f32.mrb[58].mxu0 }
 0x168   :  { %v2660_v40 = vpop.f32.mrb[59].mxu1  ;;  %v2724_v1 = vpop.f32.mrb[59].mxu0 }
 0x169   :  { %v4305_v16 = vadd.f32 %v2658_v58, %v927_v26  ;;  %v2661_v25 = vadd.f32 %v2660_v40, %v2659_v3  ;;  %v2725_v47 = vadd.f32 %v2724_v1, %v2723_v17  ;;  %v4308_v63 = vadd.f32 %v2722_v60, %v4202_v46  ;;  %2962 = vmatpush3.bf16.msra.mxu0 %v3080_v12 }
 0x16a   :  { %v935_v46 = vadd.f32 %v4250_v53, %v4169_v56 }
 0x16b   :  { %v4310_v14 = vadd.f32 %v2661_v25, %v930_v61  ;;  %v4313_v18 = vadd.f32 %v2725_v47, %v4204_v51  ;;  %v3081_v51 = vld [vmem:[%s4782_s5 + $0x30] sm:$0xff]  }
 0x16c   :  { %2963 = vmatprep.subr.bf16.mxu0 %v3081_v51 }
 0x16d   :  { %v2662_v19 = vpop.f32.mrb[60].mxu1  ;;  %v2726_v5 = vpop.f32.mrb[60].mxu0  ;;  %2964 = vmatpush3.bf16.msra.mxu0 %v3081_v51 }
 0x16e   :  { %v2663_v38 = vpop.f32.mrb[61].mxu1  ;;  %v2727_v8 = vpop.f32.mrb[61].mxu0  ;;  %2965 = vmatprep.subr.bf16.mxu0 %v3082_v37 }
 0x16f   :  { %v2664_v20 = vadd.f32 %v2663_v38, %v2662_v19  ;;  %v2728_v23 = vadd.f32 %v2727_v8, %v2726_v5  ;;  %v2665_v30 = vpop.f32.mrb[62].mxu1  ;;  %v2729_v33 = vpop.f32.mrb[62].mxu0 }
 0x170   :  { %v2666_v36 = vpop.f32.mrb[63].mxu1  ;;  %v2730_v42 = vpop.f32.mrb[63].mxu0 }
 0x171   :  { %v4325_v44 = vadd.f32 %v2664_v20, %v935_v46  ;;  %v2667_v52 = vadd.f32 %v2666_v36, %v2665_v30  ;;  %v2731_v59 = vadd.f32 %v2730_v42, %v2729_v33  ;;  %v4328_v53 = vadd.f32 %v2728_v23, %v4212_v2  ;;  %2966 = vmatpush3.bf16.msra.mxu0 %v3082_v37 }
 0x172   :  { %v943_v2 = vadd.f32 %v4123_v9, %v4169_v56 }
 0x173   :  { %v4330_v45 = vadd.f32 %v2667_v52, %v938_v49  ;;  %v4333_v55 = vadd.f32 %v2731_v59, %v4214_v7  ;;  %v946_v7 = vadd.f32 %v4127_v15, %v4169_v56  ;;  %v951_v15 = vadd.f32 %v4135_v22, %v4169_v56 }
 0x175   :  { %v2668_v34 = vpop.f32.mrb[64].mxu1  ;;  %v2732_v26 = vpop.f32.mrb[64].mxu0 }
 0x176   :  { %v2669_v58 = vpop.f32.mrb[65].mxu1  ;;  %v2733_v60 = vpop.f32.mrb[65].mxu0 }
 0x177   :  { %v2670_v3 = vadd.f32 %v2669_v58, %v2668_v34  ;;  %v2734_v17 = vadd.f32 %v2733_v60, %v2732_v26  ;;  %v2671_v31 = vpop.f32.mrb[66].mxu1  ;;  %v2735_v61 = vpop.f32.mrb[66].mxu0 }
 0x178   :  { %v2672_v40 = vpop.f32.mrb[67].mxu1  ;;  %v2736_v1 = vpop.f32.mrb[67].mxu0 }
 0x179   :  { %v4342_v25 = vadd.f32 %v2670_v3, %v943_v2  ;;  %v2673_v47 = vadd.f32 %v2672_v40, %v2671_v31  ;;  %v2737_v12 = vadd.f32 %v2736_v1, %v2735_v61  ;;  %v4345_v19 = vadd.f32 %v2734_v17, %v4222_v24 }
 0x17a   :  { %v954_v24 = vadd.f32 %v4139_v28, %v4169_v56  ;;  %v959_v28 = vadd.f32 %v4146_v35, %v4169_v56 }
 0x17b   :  { %v4347_v5 = vadd.f32 %v2673_v47, %v946_v7  ;;  %v4350_v9 = vadd.f32 %v2737_v12, %v4224_v32 }
 0x17d   :  { %v2674_v38 = vpop.f32.mrb[68].mxu1  ;;  %v2738_v8 = vpop.f32.mrb[68].mxu0 }
 0x17e   :  { %v2675_v46 = vpop.f32.mrb[69].mxu1  ;;  %v2739_v20 = vpop.f32.mrb[69].mxu0 }
 0x17f   :  { %v2676_v23 = vadd.f32 %v2675_v46, %v2674_v38  ;;  %v2740_v30 = vadd.f32 %v2739_v20, %v2738_v8  ;;  %v2677_v33 = vpop.f32.mrb[70].mxu1  ;;  %v2741_v51 = vpop.f32.mrb[70].mxu0 }
 0x180   :  { %v2678_v49 = vpop.f32.mrb[71].mxu1  ;;  %v2742_v36 = vpop.f32.mrb[71].mxu0 }
 0x181   :  { %v4356_v42 = vadd.f32 %v2676_v23, %v951_v15  ;;  %v2679_v32 = vadd.f32 %v2678_v49, %v2677_v33  ;;  %v2743_v52 = vadd.f32 %v2742_v36, %v2741_v51  ;;  %v4359_v59 = vadd.f32 %v2740_v30, %v4231_v50 }
 0x182   :  { %v962_v50 = vadd.f32 %v4150_v41, %v4169_v56  ;;  %v967_v41 = vadd.f32 %v4157_v48, %v4169_v56 }
 0x183   :  { %v4361_v37 = vadd.f32 %v2679_v32, %v954_v24  ;;  %v4364_v22 = vadd.f32 %v2743_v52, %v4235_v57 }
 0x185   :  { %v2680_v34 = vpop.f32.mrb[72].mxu1  ;;  %v2744_v26 = vpop.f32.mrb[72].mxu0 }
 0x186   :  { %v2681_v58 = vpop.f32.mrb[73].mxu1  ;;  %v2745_v60 = vpop.f32.mrb[73].mxu0 }
 0x187   :  { %v2682_v2 = vadd.f32 %v2681_v58, %v2680_v34  ;;  %v2746_v3 = vadd.f32 %v2745_v60, %v2744_v26  ;;  %v2683_v17 = vpop.f32.mrb[74].mxu1  ;;  %v2747_v31 = vpop.f32.mrb[74].mxu0 }
 0x188   :  { %v2684_v61 = vpop.f32.mrb[75].mxu1  ;;  %v2748_v7 = vpop.f32.mrb[75].mxu0 }
 0x189   :  { %v4370_v40 = vadd.f32 %v2682_v2, %v959_v28  ;;  %v2685_v57 = vadd.f32 %v2684_v61, %v2683_v17  ;;  %v2749_v1 = vadd.f32 %v2748_v7, %v2747_v31  ;;  %v4373_v47 = vadd.f32 %v2746_v3, %v4242_v11 }
 0x18a   :  { %v970_v11 = vadd.f32 %v4161_v54, %v4169_v56 }
 0x18b   :  { %v4375_v12 = vadd.f32 %v2685_v57, %v962_v50  ;;  %v4378_v35 = vadd.f32 %v2749_v1, %v4246_v13 }
 0x18d   :  { %v2686_v38 = vpop.f32.mrb[76].mxu1  ;;  %v2750_v8 = vpop.f32.mrb[76].mxu0 }
 0x18e   :  { %v2687_v46 = vpop.f32.mrb[77].mxu1  ;;  %v2751_v20 = vpop.f32.mrb[77].mxu0 }
 0x18f   :  { %v2688_v15 = vadd.f32 %v2687_v46, %v2686_v38  ;;  %v2752_v23 = vadd.f32 %v2751_v20, %v2750_v8  ;;  %v2689_v30 = vpop.f32.mrb[78].mxu1  ;;  %v2753_v33 = vpop.f32.mrb[78].mxu0 }
 0x190   :  { %v2690_v51 = vpop.f32.mrb[79].mxu1  ;;  %v2754_v24 = vpop.f32.mrb[79].mxu0 }
 0x191   :  { %v4384_v49 = vadd.f32 %v2688_v15, %v967_v41  ;;  %v2691_v13 = vadd.f32 %v2690_v51, %v2689_v30  ;;  %v2755_v36 = vadd.f32 %v2754_v24, %v2753_v33  ;;  %v4387_v32 = vadd.f32 %v2752_v23, %v4253_v62 }
 0x193   :  { %v4389_v52 = vadd.f32 %v2691_v13, %v970_v11  ;;  %v4392_v48 = vadd.f32 %v2755_v36, %v4257_v43 }
 0x195   :  { %v2756_v34 = vpop.f32.mrb[80].mxu0  ;;  %v2873_v26 = vpop.f32.mrb[80].mxu1 }
 0x196   :  { %v1338_v58 = vadd.f32 %v2873_v26, %v4288_v39  ;;  %v2757_v60 = vpop.f32.mrb[81].mxu0  ;;  %v1329_v54 = vpop.f32.mrb[81].mxu1 }
 0x197   :  { %v2758_v56 = vadd.f32 %v2757_v60, %v2756_v34  ;;  %v1330_v28 = vadd.f32 %v1329_v54, %v4265_v29  ;;  %v2759_v2 = vpop.f32.mrb[82].mxu0  ;;  %v2874_v3 = vpop.f32.mrb[82].mxu1 }
 0x198   :  { %v1341_v17 = vadd.f32 %v2874_v3, %v4293_v6  ;;  %v2760_v62 = vpop.f32.mrb[83].mxu0  ;;  %v1332_v31 = vpop.f32.mrb[83].mxu1  ;;  %v1458_v7 = vmax.f32 %v1338_v58, 0.0 }
 0x199   :  { %v2761_v50 = vadd.f32 %v2760_v62, %v2759_v2  ;;  %v1333_v61 = vadd.f32 %v1332_v31, %v4270_v10  ;;  %v4399_v43 = vadd.f32 %v2758_v56, %v4262_v0  ;;  %v1456_v39 = vmax.f32 %v1330_v28, 0.0 }
 0x19a   :  { %v1459_v57 = vmax.f32 %v1341_v17, 0.0 }
 0x19b   :  { %v1457_v1 = vmax.f32 %v1333_v61, 0.0  ;;  %v4402_v38 = vadd.f32 %v2761_v50, %v4267_v4 }
 0x19c   :  { %v1489_v29 = vpack.c.bf16 %v1459_v57, %v1458_v7 }
 0x19d   :  { %v1488_v8 = vpack.c.bf16 %v1457_v1, %v1456_v39  ;;  %v2762_v46 = vpop.f32.mrb[84].mxu0  ;;  %v2877_v20 = vpop.f32.mrb[84].mxu1 }
 0x19e   :  { %v1354_v6 = vadd.f32 %v2877_v20, %v4328_v53  ;;  %v2763_v41 = vpop.f32.mrb[85].mxu0  ;;  %v1345_v15 = vpop.f32.mrb[85].mxu1 }
 0x19f   :  { %v2764_v23 = vadd.f32 %v2763_v41, %v2762_v46  ;;  %v1346_v10 = vadd.f32 %v1345_v15, %v4308_v63  ;;  %v2765_v0 = vpop.f32.mrb[86].mxu0  ;;  %v2878_v30 = vpop.f32.mrb[86].mxu1  ;;  %2919 = vmatprep.mubr.bf16.mxu1 %v1488_v8 }
 0x1a0   :  { %v1357_v33 = vadd.f32 %v2878_v30, %v4333_v55  ;;  %v2766_v11 = vpop.f32.mrb[87].mxu0  ;;  %v1348_v51 = vpop.f32.mrb[87].mxu1  ;;  %2920 = vmatmul.mubr.bf16.vlgmr.msra.gmra.mrb[112].mxu1 %v1489_v29  ;;  %v1462_v36 = vmax.f32 %v1354_v6, 0.0 }
 0x1a1   :  { %v2767_v4 = vadd.f32 %v2766_v11, %v2765_v0  ;;  %v1349_v24 = vadd.f32 %v1348_v51, %v4313_v18  ;;  %v1241_v13 = vadd.f32 %v2764_v23, %v4285_v21  ;;  %v1460_v34 = vmax.f32 %v1346_v10, 0.0 }
 0x1a2   :  { %v1463_v53 = vmax.f32 %v1357_v33, 0.0 }
 0x1a3   :  { %v1461_v26 = vmax.f32 %v1349_v24, 0.0  ;;  %v1244_v58 = vadd.f32 %v2767_v4, %v4290_v27 }
 0x1a4   :  { %v1491_v63 = vpack.c.bf16 %v1463_v53, %v1462_v36 }
 0x1a5   :  { %v1490_v60 = vpack.c.bf16 %v1461_v26, %v1460_v34  ;;  %v2768_v54 = vpop.f32.mrb[88].mxu0  ;;  %v2881_v56 = vpop.f32.mrb[88].mxu1 }
 0x1a6   :  { %v1370_v55 = vadd.f32 %v2881_v56, %v4359_v59  ;;  %v2769_v28 = vpop.f32.mrb[89].mxu0  ;;  %v1361_v2 = vpop.f32.mrb[89].mxu1 }
 0x1a7   :  { %v2770_v3 = vadd.f32 %v2769_v28, %v2768_v54  ;;  %v1362_v17 = vadd.f32 %v1361_v2, %v4345_v19  ;;  %v2771_v18 = vpop.f32.mrb[90].mxu0  ;;  %v2882_v62 = vpop.f32.mrb[90].mxu1  ;;  %2923 = vmatprep.mubr.bf16.mxu1 %v1490_v60 }
 0x1a8   :  { %v1373_v21 = vadd.f32 %v2882_v62, %v4364_v22  ;;  %v2772_v31 = vpop.f32.mrb[91].mxu0  ;;  %v1364_v50 = vpop.f32.mrb[91].mxu1  ;;  %2924 = vmatmul.mubr.bf16.gmra.mrb[116].mxu1 %v1491_v63  ;;  %v1466_v57 = vmax.f32 %v1370_v55, 0.0 }
 0x1a9   :  { %v2773_v27 = vadd.f32 %v2772_v31, %v2771_v18  ;;  %v1365_v61 = vadd.f32 %v1364_v50, %v4350_v9  ;;  %v1249_v7 = vadd.f32 %v2770_v3, %v4305_v16  ;;  %v1464_v39 = vmax.f32 %v1362_v17, 0.0 }
 0x1aa   :  { %v1467_v59 = vmax.f32 %v1373_v21, 0.0 }
 0x1ab   :  { %v1465_v1 = vmax.f32 %v1365_v61, 0.0  ;;  %v4416_v29 = vadd.f32 %v2773_v27, %v4310_v14 }
 0x1ac   :  { %v1493_v19 = vpack.c.bf16 %v1467_v59, %v1466_v57 }
 0x1ad   :  { %v1492_v8 = vpack.c.bf16 %v1465_v1, %v1464_v39  ;;  %v2774_v46 = vpop.f32.mrb[92].mxu0  ;;  %v2885_v20 = vpop.f32.mrb[92].mxu1 }
 0x1ae   :  { %v1386_v22 = vadd.f32 %v2885_v20, %v4387_v32  ;;  %v2775_v6 = vpop.f32.mrb[93].mxu0  ;;  %v1377_v41 = vpop.f32.mrb[93].mxu1 }
 0x1af   :  { %v2776_v15 = vadd.f32 %v2775_v6, %v2774_v46  ;;  %v1378_v9 = vadd.f32 %v1377_v41, %v4373_v47  ;;  %v2777_v23 = vpop.f32.mrb[94].mxu0  ;;  %v2886_v16 = vpop.f32.mrb[94].mxu1  ;;  %2927 = vmatprep.mubr.bf16.mxu1 %v1492_v8 }
 0x1b0   :  { %v1389_v10 = vadd.f32 %v2886_v16, %v4392_v48  ;;  %v2778_v0 = vpop.f32.mrb[95].mxu0  ;;  %v1380_v30 = vpop.f32.mrb[95].mxu1  ;;  %2928 = vmatmul.mubr.bf16.gmra.mrb[120].mxu1 %v1493_v19  ;;  %v1470_v51 = vmax.f32 %v1386_v22, 0.0 }
 0x1b1   :  { %v2779_v14 = vadd.f32 %v2778_v0, %v2777_v23  ;;  %v1381_v33 = vadd.f32 %v1380_v30, %v4378_v35  ;;  %v1257_v11 = vadd.f32 %v2776_v15, %v4325_v44  ;;  %v1468_v4 = vmax.f32 %v1378_v9, 0.0 }
 0x1b2   :  { %v1471_v32 = vmax.f32 %v1389_v10, 0.0 }
 0x1b3   :  { %v1469_v24 = vmax.f32 %v1381_v33, 0.0  ;;  %v1260_v36 = vadd.f32 %v2779_v14, %v4330_v45 }
 0x1b4   :  { %v1495_v47 = vpack.c.bf16 %v1471_v32, %v1470_v51 }
 0x1b5   :  { %v1494_v53 = vpack.c.bf16 %v1469_v24, %v1468_v4  ;;  %v2780_v34 = vpop.f32.mrb[96].mxu0  ;;  %v2889_v26 = vpop.f32.mrb[96].mxu1 }
 0x1b6   :  { %v1402_v63 = vadd.f32 %v2889_v26, %v1241_v13  ;;  %v2781_v48 = vpop.f32.mrb[97].mxu0  ;;  %v1393_v60 = vpop.f32.mrb[97].mxu1 }
 0x1b7   :  { %v2782_v54 = vadd.f32 %v2781_v48, %v2780_v34  ;;  %v1394_v56 = vadd.f32 %v1393_v60, %v4399_v43  ;;  %v2783_v55 = vpop.f32.mrb[98].mxu0  ;;  %v2890_v35 = vpop.f32.mrb[98].mxu1  ;;  %2931 = vmatprep.mubr.bf16.mxu1 %v1494_v53 }
 0x1b8   :  { %v1405_v44 = vadd.f32 %v2890_v35, %v1244_v58  ;;  %v2784_v28 = vpop.f32.mrb[99].mxu0  ;;  %v1396_v2 = vpop.f32.mrb[99].mxu1  ;;  %2932 = vmatmul.mubr.bf16.gmra.mrb[124].mxu1 %v1495_v47  ;;  %v1474_v18 = vmax.f32 %v1402_v63, 0.0 }
 0x1b9   :  { %v2785_v3 = vadd.f32 %v2784_v28, %v2783_v55  ;;  %v1397_v45 = vadd.f32 %v1396_v2, %v4402_v38  ;;  %v1265_v17 = vadd.f32 %v2782_v54, %v4342_v25  ;;  %v1472_v13 = vmax.f32 %v1394_v56, 0.0 }
 0x1ba   :  { %v1475_v62 = vmax.f32 %v1405_v44, 0.0 }
 0x1bb   :  { %v1473_v21 = vmax.f32 %v1397_v45, 0.0  ;;  %v1268_v31 = vadd.f32 %v2785_v3, %v4347_v5 }
 0x1bc   :  { %v1497_v50 = vpack.c.bf16 %v1475_v62, %v1474_v18 }
 0x1bd   :  { %v1496_v43 = vpack.c.bf16 %v1473_v21, %v1472_v13  ;;  %v2786_v27 = vpop.f32.mrb[100].mxu0  ;;  %v2893_v61 = vpop.f32.mrb[100].mxu1 }
 0x1be   :  { %v1418_v57 = vadd.f32 %v2893_v61, %v1257_v11  ;;  %v2787_v58 = vpop.f32.mrb[101].mxu0  ;;  %v1409_v59 = vpop.f32.mrb[101].mxu1 }
 0x1bf   :  { %v2788_v39 = vadd.f32 %v2787_v58, %v2786_v27  ;;  %v1410_v1 = vadd.f32 %v1409_v59, %v1249_v7  ;;  %v2789_v19 = vpop.f32.mrb[102].mxu0  ;;  %v2894_v8 = vpop.f32.mrb[102].mxu1  ;;  %2935 = vmatprep.mubr.bf16.mxu1 %v1496_v43  ;;  %v4438_v59 = vld [vmem:[%s4781_s4] ss:$0 sm:$0xff] }
 0x1c0   :  { %v1421_v38 = vadd.f32 %v2894_v8, %v1260_v36  ;;  %v2790_v25 = vpop.f32.mrb[103].mxu0  ;;  %v1412_v46 = vpop.f32.mrb[103].mxu1  ;;  %2936 = vmatmul.mubr.bf16.gmra.mrb[128].mxu1 %v1497_v50  ;;  %v1478_v6 = vmax.f32 %v1418_v57, 0.0 }
 0x1c1   :  { %v2791_v20 = vadd.f32 %v2790_v25, %v2789_v19  ;;  %v1413_v22 = vadd.f32 %v1412_v46, %v4416_v29  ;;  %v1273_v5 = vadd.f32 %v2788_v39, %v4356_v42  ;;  %v1476_v15 = vmax.f32 %v1410_v1, 0.0 }
 0x1c2   :  { %v1479_v41 = vmax.f32 %v1421_v38, 0.0 }
 0x1c3   :  { %v1477_v9 = vmax.f32 %v1413_v22, 0.0  ;;  %v1276_v23 = vadd.f32 %v2791_v20, %v4361_v37 }
 0x1c4   :  { %v1499_v16 = vpack.c.bf16 %v1479_v41, %v1478_v6 }
 0x1c5   :  { %v1498_v7 = vpack.c.bf16 %v1477_v9, %v1476_v15  ;;  %v2792_v10 = vpop.f32.mrb[104].mxu0  ;;  %v2897_v0 = vpop.f32.mrb[104].mxu1 }
 0x1c6   :  { %v1434_v30 = vadd.f32 %v2897_v0, %v1273_v5  ;;  %v2793_v14 = vpop.f32.mrb[105].mxu0  ;;  %v1425_v33 = vpop.f32.mrb[105].mxu1 }
 0x1c7   :  { %v2794_v11 = vadd.f32 %v2793_v14, %v2792_v10  ;;  %v1426_v51 = vadd.f32 %v1425_v33, %v1265_v17  ;;  %v2795_v32 = vpop.f32.mrb[106].mxu0  ;;  %v2898_v4 = vpop.f32.mrb[106].mxu1  ;;  %2939 = vmatprep.mubr.bf16.mxu1 %v1498_v7 }
 0x1c8   :  { %v1437_v29 = vadd.f32 %v2898_v4, %v1276_v23  ;;  %v2796_v42 = vpop.f32.mrb[107].mxu0  ;;  %v1428_v24 = vpop.f32.mrb[107].mxu1  ;;  %2940 = vmatmul.mubr.bf16.gmra.mrb[132].mxu1 %v1499_v16  ;;  %v1482_v53 = vmax.f32 %v1434_v30, 0.0 }
 0x1c9   :  { %v2797_v36 = vadd.f32 %v2796_v42, %v2795_v32  ;;  %v1429_v47 = vadd.f32 %v1428_v24, %v1268_v31  ;;  %v1281_v37 = vadd.f32 %v2794_v11, %v4370_v40  ;;  %v1480_v26 = vmax.f32 %v1426_v51, 0.0 }
 0x1ca   :  { %v1483_v34 = vmax.f32 %v1437_v29, 0.0 }
 0x1cb   :  { %v1481_v63 = vmax.f32 %v1429_v47, 0.0  ;;  %v1284_v48 = vadd.f32 %v2797_v36, %v4375_v12 }
 0x1cc   :  { %v1501_v60 = vpack.c.bf16 %v1483_v34, %v1482_v53 }
 0x1cd   :  { %v1500_v54 = vpack.c.bf16 %v1481_v63, %v1480_v26  ;;  %v2798_v56 = vpop.f32.mrb[108].mxu0  ;;  %v2901_v55 = vpop.f32.mrb[108].mxu1 }
 0x1ce   :  { %v2799_v35 = vpop.f32.mrb[109].mxu0  ;;  %v1441_v44 = vpop.f32.mrb[109].mxu1 }
 0x1cf   :  { %v2800_v28 = vadd.f32 %v2799_v35, %v2798_v56  ;;  %v1442_v2 = vadd.f32 %v1441_v44, %v1281_v37  ;;  %v2801_v3 = vpop.f32.mrb[110].mxu0  ;;  %v2902_v45 = vpop.f32.mrb[110].mxu1  ;;  %2943 = vmatprep.mubr.bf16.mxu1 %v1500_v54 }
 0x1d0   :  { %v2802_v17 = vpop.f32.mrb[111].mxu0  ;;  %v1444_v18 = vpop.f32.mrb[111].mxu1  ;;  %2944 = vmatmul.mubr.bf16.gmra.mrb[136].mxu1 %v1501_v60 }
 0x1d1   :  { %v1289_v40 = vadd.f32 %v2800_v28, %v4384_v49  ;;  %v2803_v62 = vadd.f32 %v2802_v17, %v2801_v3  ;;  %v1445_v13 = vadd.f32 %v1444_v18, %v1284_v48  ;;  %v1484_v12 = vmax.f32 %v1442_v2, 0.0 }
 0x1d3   :  { %v1450_v21 = vadd.f32 %v2901_v55, %v1289_v40  ;;  %v1292_v31 = vadd.f32 %v2803_v62, %v4389_v52  ;;  %v1485_v50 = vmax.f32 %v1445_v13, 0.0 }
 0x1d5   :  { %v1453_v43 = vadd.f32 %v2902_v45, %v1292_v31  ;;  %v1502_v27 = vpack.c.bf16 %v1485_v50, %v1484_v12  ;;  %v1486_v61 = vmax.f32 %v1450_v21, 0.0 }
 0x1d7   :  { %v1487_v57 = vmax.f32 %v1453_v43, 0.0  ;;  %2947 = vmatprep.mubr.bf16.mxu1 %v1502_v27 }
 0x1d9   :  { %v1503_v58 = vpack.c.bf16 %v1487_v57, %v1486_v61 }
 0x1db   :  { %2948 = vmatmul.mubr.bf16.gmra.mrb[140].mxu1 %v1503_v58 }
 0x273   :  { %v2921_v49 = vpop.f32.mrb[112].mxu1 }
 0x274   :  { %v1618_v39 = vadd.f32 %v2921_v49, %v4438_v59  ;;  %v1609_v1 = vpop.f32.mrb[113].mxu1 }
 0x275   :  { %v1610_v19 = vadd.f32 %v4438_v59, %v1609_v1  ;;  %v2922_v52 = vpop.f32.mrb[114].mxu1 }
 0x276   :  { %v1621_v8 = vadd.f32 %v2922_v52, %v4438_v59  ;;  %v1612_v38 = vpop.f32.mrb[115].mxu1  ;;  %v1738_v46 = vmax.f32 %v1618_v39, 0.0 }
 0x277   :  { %v1613_v25 = vadd.f32 %v4438_v59, %v1612_v38  ;;  %v1736_v22 = vmax.f32 %v1610_v19, 0.0 }
 0x278   :  { %v1739_v20 = vmax.f32 %v1621_v8, 0.0 }
 0x279   :  { %v1737_v5 = vmax.f32 %v1613_v25, 0.0 }
 0x27a   :  { %v1769_v6 = vpack.c.bf16 %v1739_v20, %v1738_v46 }
 0x27b   :  { %v1768_v41 = vpack.c.bf16 %v1737_v5, %v1736_v22  ;;  %v2925_v15 = vpop.f32.mrb[116].mxu1 }
 0x27c   :  { %v1634_v9 = vadd.f32 %v2925_v15, %v4438_v59  ;;  %v1625_v23 = vpop.f32.mrb[117].mxu1 }
 0x27d   :  { %v1626_v16 = vadd.f32 %v4438_v59, %v1625_v23  ;;  %v2926_v7 = vpop.f32.mrb[118].mxu1  ;;  %2967 = vmatprep.mubr.bf16.mxu0 %v1768_v41 }
 0x27e   :  { %v1637_v10 = vadd.f32 %v2926_v7, %v4438_v59  ;;  %v1628_v0 = vpop.f32.mrb[119].mxu1  ;;  %2968 = vmatmul.mubr.bf16.vlgmr.msra.gmra.mrb[112].mxu0 %v1769_v6  ;;  %v1742_v14 = vmax.f32 %v1634_v9, 0.0 }
 0x27f   :  { %v1629_v30 = vadd.f32 %v4438_v59, %v1628_v0  ;;  %v1740_v11 = vmax.f32 %v1626_v16, 0.0 }
 0x280   :  { %v1743_v33 = vmax.f32 %v1637_v10, 0.0 }
 0x281   :  { %v1741_v51 = vmax.f32 %v1629_v30, 0.0 }
 0x282   :  { %v1771_v32 = vpack.c.bf16 %v1743_v33, %v1742_v14 }
 0x283   :  { %v1770_v4 = vpack.c.bf16 %v1741_v51, %v1740_v11  ;;  %v2929_v29 = vpop.f32.mrb[120].mxu1 }
 0x284   :  { %v1650_v42 = vadd.f32 %v2929_v29, %v4438_v59  ;;  %v1641_v24 = vpop.f32.mrb[121].mxu1 }
 0x285   :  { %v1642_v36 = vadd.f32 %v4438_v59, %v1641_v24  ;;  %v2930_v47 = vpop.f32.mrb[122].mxu1  ;;  %2971 = vmatprep.mubr.bf16.mxu0 %v1770_v4 }
 0x286   :  { %v1653_v37 = vadd.f32 %v2930_v47, %v4438_v59  ;;  %v1644_v53 = vpop.f32.mrb[123].mxu1  ;;  %2972 = vmatmul.mubr.bf16.gmra.mrb[116].mxu0 %v1771_v32  ;;  %v1746_v26 = vmax.f32 %v1650_v42, 0.0 }
 0x287   :  { %v1645_v34 = vadd.f32 %v4438_v59, %v1644_v53  ;;  %v1744_v48 = vmax.f32 %v1642_v36, 0.0 }
 0x288   :  { %v1747_v63 = vmax.f32 %v1653_v37, 0.0 }
 0x289   :  { %v1745_v60 = vmax.f32 %v1645_v34, 0.0 }
 0x28a   :  { %v1773_v54 = vpack.c.bf16 %v1747_v63, %v1746_v26 }
 0x28b   :  { %v1772_v56 = vpack.c.bf16 %v1745_v60, %v1744_v48  ;;  %v2933_v55 = vpop.f32.mrb[124].mxu1 }
 0x28c   :  { %v1666_v35 = vadd.f32 %v2933_v55, %v4438_v59  ;;  %v1657_v44 = vpop.f32.mrb[125].mxu1 }
 0x28d   :  { %v1658_v28 = vadd.f32 %v4438_v59, %v1657_v44  ;;  %v2934_v2 = vpop.f32.mrb[126].mxu1  ;;  %2975 = vmatprep.mubr.bf16.mxu0 %v1772_v56 }
 0x28e   :  { %v1669_v3 = vadd.f32 %v2934_v2, %v4438_v59  ;;  %v1660_v45 = vpop.f32.mrb[127].mxu1  ;;  %2976 = vmatmul.mubr.bf16.gmra.mrb[120].mxu0 %v1773_v54  ;;  %v1750_v18 = vmax.f32 %v1666_v35, 0.0 }
 0x28f   :  { %v1661_v17 = vadd.f32 %v4438_v59, %v1660_v45  ;;  %v1748_v62 = vmax.f32 %v1658_v28, 0.0 }
 0x290   :  { %v1751_v40 = vmax.f32 %v1669_v3, 0.0 }
 0x291   :  { %v1749_v13 = vmax.f32 %v1661_v17, 0.0  ;;  %v4475_v17 = vld [vmem:[%s4783_s6] ss:$0 sm:$0xff]  ;;  %s3235_s6 = smov [#allocation2]  }
 0x292   :  { %v1775_v21 = vpack.c.bf16 %v1751_v40, %v1750_v18  ;;  %s2373_s12 = sshll.u32 %s3235_s6, 4  ;;  %s2374_s12 = int_to_ptr.vmem [resolvable:$true] %s2373_s12 }
 0x293   :  { %v1774_v12 = vpack.c.bf16 %v1749_v13, %v1748_v62  ;;  %v2937_v31 = vpop.f32.mrb[128].mxu1  ;;  %s3211_s13 = scalar_lea.vmem %s2374_s12, 4096  ;;  %p3216_p1 = scmp.lt.s32.totalorder %s2374_s12, %s2374_s12 }
 0x294   :  { %v1682_v50 = vadd.f32 %v2937_v31, %v4438_v59  ;;  %v1673_v43 = vpop.f32.mrb[129].mxu1  ;;  %p3212_p0 = scmp.ne.s32.totalorder %s2374_s12, %s3211_s13  ;;  %p3217_p2 = scmp.lt.s32.totalorder %s3211_s13, %s3211_s13 }
 0x295   :  { %v1674_v27 = vadd.f32 %v4438_v59, %v1673_v43  ;;  %v2938_v61 = vpop.f32.mrb[130].mxu1  ;;  %2979 = vmatprep.mubr.bf16.mxu0 %v1774_v12 }
 0x296   :  { %v1685_v57 = vadd.f32 %v2938_v61, %v4438_v59  ;;  %v1676_v58 = vpop.f32.mrb[131].mxu1  ;;  %2980 = vmatmul.mubr.bf16.gmra.mrb[124].mxu0 %v1775_v21  ;;  %v1754_v39 = vmax.f32 %v1682_v50, 0.0  ;;  %p3218_p3 = por %p3217_p2, %p3216_p1 }
 0x297   :  { %v1677_v49 = vadd.f32 %v4438_v59, %v1676_v58  ;;  %v1752_v19 = vmax.f32 %v1674_v27, 0.0 }
 0x298   :  { %v1755_v1 = vmax.f32 %v1685_v57, 0.0  ;;  %p3219_p4 = pnand %p3218_p3, %p3212_p0 }
 0x299   :  { %v1753_v52 = vmax.f32 %v1677_v49, 0.0 }
 0x29a   :  { %v1777_v8 = vpack.c.bf16 %v1755_v1, %v1754_v39 }
 0x29b   :  { %v1776_v38 = vpack.c.bf16 %v1753_v52, %v1752_v19  ;;  %v2941_v25 = vpop.f32.mrb[132].mxu1 }
 0x29c   :  { %v1698_v46 = vadd.f32 %v2941_v25, %v4438_v59  ;;  %v1689_v20 = vpop.f32.mrb[133].mxu1 }
 0x29d   :  { %v1690_v22 = vadd.f32 %v4438_v59, %v1689_v20  ;;  %v2942_v5 = vpop.f32.mrb[134].mxu1  ;;  %2983 = vmatprep.mubr.bf16.mxu0 %v1776_v38 }
 0x29e   :  { %v1701_v6 = vadd.f32 %v2942_v5, %v4438_v59  ;;  %v1692_v41 = vpop.f32.mrb[135].mxu1  ;;  %2984 = vmatmul.mubr.bf16.gmra.mrb[128].mxu0 %v1777_v8  ;;  %v1758_v9 = vmax.f32 %v1698_v46, 0.0 }
 0x29f   :  { %v1693_v15 = vadd.f32 %v4438_v59, %v1692_v41  ;;  %v1756_v16 = vmax.f32 %v1690_v22, 0.0 }
 0x2a0   :  { %v1759_v23 = vmax.f32 %v1701_v6, 0.0 }
 0x2a1   :  { %v1757_v7 = vmax.f32 %v1693_v15, 0.0 }
 0x2a2   :  { %v1779_v10 = vpack.c.bf16 %v1759_v23, %v1758_v9 }
 0x2a3   :  { %v1778_v0 = vpack.c.bf16 %v1757_v7, %v1756_v16  ;;  %v2945_v30 = vpop.f32.mrb[136].mxu1 }
 0x2a4   :  { %v1714_v14 = vadd.f32 %v2945_v30, %v4438_v59  ;;  %v1705_v33 = vpop.f32.mrb[137].mxu1 }
 0x2a5   :  { %v1706_v11 = vadd.f32 %v4438_v59, %v1705_v33  ;;  %v2946_v51 = vpop.f32.mrb[138].mxu1  ;;  %2987 = vmatprep.mubr.bf16.mxu0 %v1778_v0 }
 0x2a6   :  { %v1717_v32 = vadd.f32 %v2946_v51, %v4438_v59  ;;  %v1708_v4 = vpop.f32.mrb[139].mxu1  ;;  %2988 = vmatmul.mubr.bf16.gmra.mrb[132].mxu0 %v1779_v10  ;;  %v1762_v42 = vmax.f32 %v1714_v14, 0.0 }
 0x2a7   :  { %v1709_v29 = vadd.f32 %v4438_v59, %v1708_v4  ;;  %v1760_v36 = vmax.f32 %v1706_v11, 0.0 }
 0x2a8   :  { %v1763_v24 = vmax.f32 %v1717_v32, 0.0 }
 0x2a9   :  { %v1761_v47 = vmax.f32 %v1709_v29, 0.0 }
 0x2aa   :  { %v1781_v37 = vpack.c.bf16 %v1763_v24, %v1762_v42 }
 0x2ab   :  { %v1780_v53 = vpack.c.bf16 %v1761_v47, %v1760_v36 }
 0x2ad   :  { %2991 = vmatprep.mubr.bf16.mxu0 %v1780_v53 }
 0x2ae   :  { %v2949_v34 = vpop.f32.mrb[140].mxu1  ;;  %2992 = vmatmul.mubr.bf16.gmra.mrb[136].mxu0 %v1781_v37 }
 0x2af   :  { %v1730_v26 = vadd.f32 %v2949_v34, %v4438_v59  ;;  %v1721_v63 = vpop.f32.mrb[141].mxu1 }
 0x2b0   :  { %v1722_v48 = vadd.f32 %v4438_v59, %v1721_v63  ;;  %v2950_v60 = vpop.f32.mrb[142].mxu1 }
 0x2b1   :  { %v1733_v54 = vadd.f32 %v2950_v60, %v4438_v59  ;;  %v1724_v56 = vpop.f32.mrb[143].mxu1  ;;  %v1766_v35 = vmax.f32 %v1730_v26, 0.0 }
 0x2b2   :  { %v1725_v55 = vadd.f32 %v4438_v59, %v1724_v56  ;;  %v1764_v28 = vmax.f32 %v1722_v48, 0.0 }
 0x2b3   :  { %v1767_v44 = vmax.f32 %v1733_v54, 0.0 }
 0x2b4   :  { %v1765_v2 = vmax.f32 %v1725_v55, 0.0 }
 0x2b5   :  { %v1783_v3 = vpack.c.bf16 %v1767_v44, %v1766_v35 }
 0x2b6   :  { %v1782_v45 = vpack.c.bf16 %v1765_v2, %v1764_v28 }
 0x2b8   :  { %2995 = vmatprep.mubr.bf16.mxu0 %v1782_v45 }
 0x2b9   :  { %2996 = vmatmul.mubr.bf16.gmra.mrb[140].mxu0 %v1783_v3 }
 0x351   :  { %v2969_v18 = vpop.f32.mrb[112].mxu0 }
 0x352   :  { %v4478_v40 = vadd.f32 %v2969_v18, %v4475_v17  ;;  %v1889_v62 = vpop.f32.mrb[113].mxu0 }
 0x353   :  { %v4481_v59 = vadd.f32 %v4475_v17, %v1889_v62  ;;  %v2970_v13 = vpop.f32.mrb[114].mxu0 }
 0x354   :  { %2020 = vmax.xlane.f32.xlu1 %v4478_v40  ;;  %v1892_v21 = vpop.f32.mrb[115].mxu0  ;;  %v4486_v12 = vadd.f32 %v2970_v13, %v4475_v17 }
 0x355   :  { %2016 = vmax.xlane.f32.xlu0 %v4481_v59  ;;  %v4489_v31 = vadd.f32 %v4475_v17, %v1892_v21 }
 0x358   :  { %2022 = vmax.xlane.f32.xlu1 %v4486_v12 }
 0x359   :  { %v2973_v50 = vpop.f32.mrb[116].mxu0  ;;  %2018 = vmax.xlane.f32.xlu0 %v4489_v31 }
 0x35a   :  { %v4494_v43 = vadd.f32 %v2973_v50, %v4475_v17  ;;  %v1905_v27 = vpop.f32.mrb[117].mxu0 }
 0x35b   :  { %v2974_v61 = vpop.f32.mrb[118].mxu0  ;;  %v4502_v49 = vadd.f32 %v4475_v17, %v1905_v27 }
 0x35c   :  { %v4497_v57 = vadd.f32 %v2974_v61, %v4475_v17  ;;  %v1908_v58 = vpop.f32.mrb[119].mxu0 }
 0x35d   :  { %2028 = vmax.xlane.f32.xlu0 %v4494_v43  ;;  %v4505_v39 = vadd.f32 %v4475_v17, %v1908_v58 }
 0x35e   :  { %2030 = vmax.xlane.f32.xlu1 %v4497_v57 }
 0x361   :  { %v2977_v1 = vpop.f32.mrb[120].mxu0  ;;  %2024 = vmax.xlane.f32.xlu0 %v4502_v49 }
 0x362   :  { %v4509_v19 = vadd.f32 %v2977_v1, %v4475_v17  ;;  %v1921_v52 = vpop.f32.mrb[121].mxu0  ;;  %2026 = vmax.xlane.f32.xlu1 %v4505_v39 }
 0x363   :  { %v2978_v8 = vpop.f32.mrb[122].mxu0  ;;  %v4518_v46 = vadd.f32 %v4475_v17, %v1921_v52 }
 0x364   :  { %v4513_v38 = vadd.f32 %v2978_v8, %v4475_v17  ;;  %v1924_v25 = vpop.f32.mrb[123].mxu0 }
 0x365   :  { %2036 = vmax.xlane.f32.xlu0 %v4509_v19  ;;  %v4521_v20 = vadd.f32 %v4475_v17, %v1924_v25 }
 0x366   :  { %2038 = vmax.xlane.f32.xlu1 %v4513_v38 }
 0x369   :  { %v2981_v22 = vpop.f32.mrb[124].mxu0  ;;  %2032 = vmax.xlane.f32.xlu0 %v4518_v46 }
 0x36a   :  { %v4525_v5 = vadd.f32 %v2981_v22, %v4475_v17  ;;  %v1937_v6 = vpop.f32.mrb[125].mxu0  ;;  %2034 = vmax.xlane.f32.xlu1 %v4521_v20 }
 0x36b   :  { %v2982_v41 = vpop.f32.mrb[126].mxu0  ;;  %v4534_v23 = vadd.f32 %v4475_v17, %v1937_v6 }
 0x36c   :  { %v4529_v15 = vadd.f32 %v2982_v41, %v4475_v17  ;;  %v1940_v9 = vpop.f32.mrb[127].mxu0 }
 0x36d   :  { %2044 = vmax.xlane.f32.xlu0 %v4525_v5  ;;  %v4537_v16 = vadd.f32 %v4475_v17, %v1940_v9 }
 0x36e   :  { %2046 = vmax.xlane.f32.xlu1 %v4529_v15 }
 0x371   :  { %v2985_v7 = vpop.f32.mrb[128].mxu0  ;;  %2040 = vmax.xlane.f32.xlu0 %v4534_v23 }
 0x372   :  { %v4541_v10 = vadd.f32 %v2985_v7, %v4475_v17  ;;  %v1953_v0 = vpop.f32.mrb[129].mxu0  ;;  %2042 = vmax.xlane.f32.xlu1 %v4537_v16 }
 0x373   :  { %v2986_v30 = vpop.f32.mrb[130].mxu0  ;;  %v4550_v11 = vadd.f32 %v4475_v17, %v1953_v0 }
 0x374   :  { %v4545_v14 = vadd.f32 %v2986_v30, %v4475_v17  ;;  %v1956_v33 = vpop.f32.mrb[131].mxu0 }
 0x375   :  { %2052 = vmax.xlane.f32.xlu0 %v4541_v10  ;;  %v4553_v51 = vadd.f32 %v4475_v17, %v1956_v33 }
 0x376   :  { %2054 = vmax.xlane.f32.xlu1 %v4545_v14 }
 0x379   :  { %v2989_v32 = vpop.f32.mrb[132].mxu0  ;;  %2048 = vmax.xlane.f32.xlu0 %v4550_v11 }
 0x37a   :  { %v4557_v4 = vadd.f32 %v2989_v32, %v4475_v17  ;;  %v1969_v29 = vpop.f32.mrb[133].mxu0  ;;  %2050 = vmax.xlane.f32.xlu1 %v4553_v51 }
 0x37b   :  { %v2990_v42 = vpop.f32.mrb[134].mxu0  ;;  %v4566_v47 = vadd.f32 %v4475_v17, %v1969_v29 }
 0x37c   :  { %v4561_v24 = vadd.f32 %v2990_v42, %v4475_v17  ;;  %v1972_v36 = vpop.f32.mrb[135].mxu0 }
 0x37d   :  { %2060 = vmax.xlane.f32.xlu0 %v4557_v4  ;;  %v4569_v37 = vadd.f32 %v4475_v17, %v1972_v36 }
 0x37e   :  { %2062 = vmax.xlane.f32.xlu1 %v4561_v24 }
 0x381   :  { %v2993_v53 = vpop.f32.mrb[136].mxu0  ;;  %2056 = vmax.xlane.f32.xlu0 %v4566_v47 }
 0x382   :  { %v4573_v34 = vadd.f32 %v2993_v53, %v4475_v17  ;;  %v1985_v26 = vpop.f32.mrb[137].mxu0  ;;  %2058 = vmax.xlane.f32.xlu1 %v4569_v37 }
 0x383   :  { %v2994_v63 = vpop.f32.mrb[138].mxu0  ;;  %v4582_v54 = vadd.f32 %v4475_v17, %v1985_v26 }
 0x384   :  { %v4577_v48 = vadd.f32 %v2994_v63, %v4475_v17  ;;  %v1988_v60 = vpop.f32.mrb[139].mxu0 }
 0x385   :  { %2068 = vmax.xlane.f32.xlu0 %v4573_v34  ;;  %v4585_v56 = vadd.f32 %v4475_v17, %v1988_v60 }
 0x386   :  { %2070 = vmax.xlane.f32.xlu1 %v4577_v48 }
 0x389   :  { %2064 = vmax.xlane.f32.xlu0 %v4582_v54 }
 0x38a   :  { %2066 = vmax.xlane.f32.xlu1 %v4585_v56 }
 0x38c   :  { %v2997_v55 = vpop.f32.mrb[140].mxu0 }
 0x38d   :  { %v4590_v35 = vadd.f32 %v2997_v55, %v4475_v17  ;;  %v2001_v44 = vpop.f32.mrb[141].mxu0 }
 0x38e   :  { %v4593_v28 = vadd.f32 %v4475_v17, %v2001_v44  ;;  %v2998_v2 = vpop.f32.mrb[142].mxu0 }
 0x38f   :  { %v4596_v3 = vadd.f32 %v2998_v2, %v4475_v17  ;;  %v2004_v45 = vpop.f32.mrb[143].mxu0 }
 0x390   :  { %v4599_v18 = vadd.f32 %v4475_v17, %v2004_v45  ;;  %2072 = vmax.xlane.f32.xlu0 %v4593_v28 }
 0x392   :  { %2074 = vmax.xlane.f32.xlu1 %v4599_v18 }
 0x394   :  { %2076 = vmax.xlane.f32.xlu0 %v4590_v35 }
 0x396   :  { %2078 = vmax.xlane.f32.xlu1 %v4596_v3 }
 0x3e1   :  { %v2021_v62 = vpop.xlane.xlu1 %2020 }
 0x3e2   :  { %v4606_v13 = vsub.f32 %v4478_v40, %v2021_v62  ;;  %v2017_v21 = vpop.xlane.xlu0 %2016 }
 0x3e3   :  { %v4609_v50 = vsub.f32 %v4481_v59, %v2017_v21 }
 0x3e4   :  { %v2116_v27 = vmul.f32 1.442695, %v4606_v13 }
 0x3e5   :  { %v2112_v17 = vmul.f32 1.442695, %v4609_v50  ;;  %v2023_v61 = vpop.xlane.xlu1 %2022 }
 0x3e6   :  { %3083 = vpow2.f32 %v2116_v27  ;;  %v4614_v58 = vsub.f32 %v4486_v12, %v2023_v61  ;;  %v2019_v1 = vpop.xlane.xlu0 %2018 }
 0x3e7   :  { %v4617_v52 = vsub.f32 %v4489_v31, %v2019_v1  ;;  %3085 = vpow2.f32 %v2112_v17 }
 0x3e8   :  { %v2118_v40 = vmul.f32 1.442695, %v4614_v58 }
 0x3e9   :  { %v2114_v59 = vmul.f32 1.442695, %v4617_v52 }
 0x3ea   :  { %3087 = vpow2.f32 %v2118_v40  ;;  %v2029_v8 = vpop.xlane.xlu0 %2028 }
 0x3eb   :  { %v4622_v25 = vsub.f32 %v4494_v43, %v2029_v8  ;;  %v2031_v22 = vpop.xlane.xlu1 %2030  ;;  %3089 = vpow2.f32 %v2114_v59 }
 0x3ec   :  { %v4625_v6 = vsub.f32 %v4497_v57, %v2031_v22 }
 0x3ed   :  { %v2124_v12 = vmul.f32 1.442695, %v4622_v25 }
 0x3ee   :  { %v2126_v31 = vmul.f32 1.442695, %v4625_v6  ;;  %v2025_v41 = vpop.xlane.xlu0 %2024 }
 0x3ef   :  { %3091 = vpow2.f32 %v2124_v12  ;;  %v4630_v9 = vsub.f32 %v4502_v49, %v2025_v41  ;;  %v2027_v7 = vpop.xlane.xlu1 %2026 }
 0x3f0   :  { %v3084_v0 = vpop.eup %3083  ;;  %v4633_v30 = vsub.f32 %v4505_v39, %v2027_v7  ;;  %3093 = vpow2.f32 %v2126_v31 }
 0x3f1   :  { %v2120_v43 = vmul.f32 1.442695, %v4630_v9  ;;  %2180 = vadd.xlane.f32.xlu0 %v3084_v0  ;;  %v3086_v32 = vpop.eup %3085 }
 0x3f2   :  { %v2122_v57 = vmul.f32 1.442695, %v4633_v30  ;;  %v2037_v33 = vpop.xlane.xlu0 %2036 }
 0x3f3   :  { %3095 = vpow2.f32 %v2120_v43  ;;  %v4638_v29 = vsub.f32 %v4509_v19, %v2037_v33  ;;  %v2039_v42 = vpop.xlane.xlu1 %2038 }
 0x3f4   :  { %v3088_v49 = vpop.eup %3087  ;;  %v4641_v36 = vsub.f32 %v4513_v38, %v2039_v42  ;;  %3097 = vpow2.f32 %v2122_v57 }
 0x3f5   :  { %v2132_v39 = vmul.f32 1.442695, %v4638_v29  ;;  %2182 = vadd.xlane.f32.xlu1 %v3088_v49  ;;  %2176 = vadd.xlane.f32.xlu0 %v3086_v32  ;;  %v3090_v19 = vpop.eup %3089 }
 0x3f6   :  { %v2134_v53 = vmul.f32 1.442695, %v4641_v36  ;;  %v2033_v26 = vpop.xlane.xlu0 %2032 }
 0x3f7   :  { %3099 = vpow2.f32 %v2132_v39  ;;  %v4646_v63 = vsub.f32 %v4518_v46, %v2033_v26  ;;  %v2035_v60 = vpop.xlane.xlu1 %2034 }
 0x3f8   :  { %v4649_v55 = vsub.f32 %v4521_v20, %v2035_v60  ;;  %3101 = vpow2.f32 %v2134_v53 }
 0x3f9   :  { %v3092_v44 = vpop.eup %3091  ;;  %v2128_v38 = vmul.f32 1.442695, %v4646_v63  ;;  %2178 = vadd.xlane.f32.xlu1 %v3090_v19 }
 0x3fa   :  { %v2130_v2 = vmul.f32 1.442695, %v4649_v55  ;;  %2188 = vadd.xlane.f32.xlu0 %v3092_v44  ;;  %v2045_v45 = vpop.xlane.xlu0 %2044  ;;  %v3094_v21 = vpop.eup %3093 }
 0x3fb   :  { %3103 = vpow2.f32 %v2128_v38  ;;  %v4654_v62 = vsub.f32 %v4525_v5, %v2045_v45  ;;  %v2047_v46 = vpop.xlane.xlu1 %2046 }
 0x3fc   :  { %v4657_v27 = vsub.f32 %v4529_v15, %v2047_v46  ;;  %3105 = vpow2.f32 %v2130_v2 }
 0x3fd   :  { %v3096_v20 = vpop.eup %3095  ;;  %v2140_v17 = vmul.f32 1.442695, %v4654_v62  ;;  %2190 = vadd.xlane.f32.xlu1 %v3094_v21 }
 0x3fe   :  { %v2142_v61 = vmul.f32 1.442695, %v4657_v27  ;;  %2184 = vadd.xlane.f32.xlu0 %v3096_v20  ;;  %v2041_v1 = vpop.xlane.xlu0 %2040  ;;  %v3098_v59 = vpop.eup %3097 }
 0x3ff   :  { %3107 = vpow2.f32 %v2140_v17  ;;  %v4662_v40 = vsub.f32 %v4534_v23, %v2041_v1  ;;  %v2043_v5 = vpop.xlane.xlu1 %2042 }
 0x400   :  { %v4665_v8 = vsub.f32 %v4537_v16, %v2043_v5  ;;  %3109 = vpow2.f32 %v2142_v61 }
 0x401   :  { %v3100_v15 = vpop.eup %3099  ;;  %v2136_v22 = vmul.f32 1.442695, %v4662_v40  ;;  %2186 = vadd.xlane.f32.xlu1 %v3098_v59 }
 0x402   :  { %v2138_v12 = vmul.f32 1.442695, %v4665_v8  ;;  %2196 = vadd.xlane.f32.xlu0 %v3100_v15  ;;  %v2053_v31 = vpop.xlane.xlu0 %2052  ;;  %v3102_v7 = vpop.eup %3101 }
 0x403   :  { %3111 = vpow2.f32 %v2136_v22  ;;  %v4670_v41 = vsub.f32 %v4541_v10, %v2053_v31  ;;  %v2055_v23 = vpop.xlane.xlu1 %2054 }
 0x404   :  { %v4673_v0 = vsub.f32 %v4545_v14, %v2055_v23  ;;  %3113 = vpow2.f32 %v2138_v12 }
 0x405   :  { %v3104_v16 = vpop.eup %3103  ;;  %v2148_v43 = vmul.f32 1.442695, %v4670_v41  ;;  %2198 = vadd.xlane.f32.xlu1 %v3102_v7 }
 0x406   :  { %v2150_v57 = vmul.f32 1.442695, %v4673_v0  ;;  %2192 = vadd.xlane.f32.xlu0 %v3104_v16  ;;  %v2049_v33 = vpop.xlane.xlu0 %2048  ;;  %v3106_v42 = vpop.eup %3105 }
 0x407   :  { %3115 = vpow2.f32 %v2148_v43  ;;  %v4678_v32 = vsub.f32 %v4550_v11, %v2049_v33  ;;  %v2051_v10 = vpop.xlane.xlu1 %2050 }
 0x408   :  { %v4681_v49 = vsub.f32 %v4553_v51, %v2051_v10  ;;  %3117 = vpow2.f32 %v2150_v57 }
 0x409   :  { %v3108_v14 = vpop.eup %3107  ;;  %v2144_v39 = vmul.f32 1.442695, %v4678_v32  ;;  %2194 = vadd.xlane.f32.xlu1 %v3106_v42 }
 0x40a   :  { %v2146_v53 = vmul.f32 1.442695, %v4681_v49  ;;  %2204 = vadd.xlane.f32.xlu0 %v3108_v14  ;;  %v2061_v26 = vpop.xlane.xlu0 %2060  ;;  %v3110_v19 = vpop.eup %3109 }
 0x40b   :  { %3119 = vpow2.f32 %v2144_v39  ;;  %v4686_v60 = vsub.f32 %v4557_v4, %v2061_v26  ;;  %v2063_v11 = vpop.xlane.xlu1 %2062 }
 0x40c   :  { %v4689_v44 = vsub.f32 %v4561_v24, %v2063_v11  ;;  %3121 = vpow2.f32 %v2146_v53 }
 0x40d   :  { %v3112_v51 = vpop.eup %3111  ;;  %v2156_v38 = vmul.f32 1.442695, %v4686_v60  ;;  %2206 = vadd.xlane.f32.xlu1 %v3110_v19 }
 0x40e   :  { %v2158_v2 = vmul.f32 1.442695, %v4689_v44  ;;  %2200 = vadd.xlane.f32.xlu0 %v3112_v51  ;;  %v2057_v45 = vpop.xlane.xlu0 %2056  ;;  %v3114_v21 = vpop.eup %3113 }
 0x40f   :  { %3123 = vpow2.f32 %v2156_v38  ;;  %v4694_v46 = vsub.f32 %v4566_v47, %v2057_v45  ;;  %v2059_v4 = vpop.xlane.xlu1 %2058 }
 0x410   :  { %v4697_v20 = vsub.f32 %v4569_v37, %v2059_v4  ;;  %3125 = vpow2.f32 %v2158_v2 }
 0x411   :  { %v3116_v24 = vpop.eup %3115  ;;  %v2152_v17 = vmul.f32 1.442695, %v4694_v46  ;;  %2202 = vadd.xlane.f32.xlu1 %v3114_v21 }
 0x412   :  { %v2154_v61 = vmul.f32 1.442695, %v4697_v20  ;;  %2212 = vadd.xlane.f32.xlu0 %v3116_v24  ;;  %v2069_v1 = vpop.xlane.xlu0 %2068  ;;  %v3118_v59 = vpop.eup %3117 }
 0x413   :  { %3127 = vpow2.f32 %v2152_v17  ;;  %v4702_v5 = vsub.f32 %v4573_v34, %v2069_v1  ;;  %v2071_v47 = vpop.xlane.xlu1 %2070 }
 0x414   :  { %v4705_v15 = vsub.f32 %v4577_v48, %v2071_v47  ;;  %3129 = vpow2.f32 %v2154_v61 }
 0x415   :  { %v3120_v37 = vpop.eup %3119  ;;  %v2164_v22 = vmul.f32 1.442695, %v4702_v5  ;;  %2214 = vadd.xlane.f32.xlu1 %v3118_v59 }
 0x416   :  { %v2166_v12 = vmul.f32 1.442695, %v4705_v15  ;;  %2208 = vadd.xlane.f32.xlu0 %v3120_v37  ;;  %v2065_v31 = vpop.xlane.xlu0 %2064  ;;  %v3122_v7 = vpop.eup %3121 }
 0x417   :  { %3131 = vpow2.f32 %v2164_v22  ;;  %v4710_v23 = vsub.f32 %v4582_v54, %v2065_v31  ;;  %v2067_v34 = vpop.xlane.xlu1 %2066 }
 0x418   :  { %v4713_v16 = vsub.f32 %v4585_v56, %v2067_v34  ;;  %3133 = vpow2.f32 %v2166_v12 }
 0x419   :  { %v3124_v48 = vpop.eup %3123  ;;  %v2160_v43 = vmul.f32 1.442695, %v4710_v23  ;;  %2210 = vadd.xlane.f32.xlu1 %v3122_v7 }
 0x41a   :  { %v2162_v57 = vmul.f32 1.442695, %v4713_v16  ;;  %2220 = vadd.xlane.f32.xlu0 %v3124_v48  ;;  %v3126_v33 = vpop.eup %3125 }
 0x41b   :  { %3135 = vpow2.f32 %v2160_v43 }
 0x41c   :  { %3137 = vpow2.f32 %v2162_v57 }
 0x41d   :  { %v3128_v10 = vpop.eup %3127  ;;  %2222 = vadd.xlane.f32.xlu1 %v3126_v33  ;;  %v2073_v42 = vpop.xlane.xlu0 %2072 }
 0x41e   :  { %v4718_v54 = vsub.f32 %v4593_v28, %v2073_v42  ;;  %2216 = vadd.xlane.f32.xlu0 %v3128_v10  ;;  %v3130_v14 = vpop.eup %3129 }
 0x41f   :  { %v2075_v56 = vpop.xlane.xlu1 %2074 }
 0x420   :  { %v2168_v39 = vmul.f32 1.442695, %v4718_v54  ;;  %v4722_v53 = vsub.f32 %v4599_v18, %v2075_v56 }
 0x421   :  { %v3132_v26 = vpop.eup %3131  ;;  %2218 = vadd.xlane.f32.xlu1 %v3130_v14  ;;  %v2077_v11 = vpop.xlane.xlu0 %2076 }
 0x422   :  { %3139 = vpow2.f32 %v2168_v39  ;;  %v2170_v19 = vmul.f32 1.442695, %v4722_v53  ;;  %v4726_v51 = vsub.f32 %v4590_v35, %v2077_v11  ;;  %2228 = vadd.xlane.f32.xlu0 %v3132_v26  ;;  %v3134_v38 = vpop.eup %3133 }
 0x423   :  { %v2079_v28 = vpop.xlane.xlu1 %2078 }
 0x424   :  { %3141 = vpow2.f32 %v2170_v19  ;;  %v2172_v2 = vmul.f32 1.442695, %v4726_v51  ;;  %v4730_v45 = vsub.f32 %v4596_v3, %v2079_v28 }
 0x425   :  { %v3136_v18 = vpop.eup %3135  ;;  %2230 = vadd.xlane.f32.xlu1 %v3134_v38 }
 0x426   :  { %3143 = vpow2.f32 %v2172_v2  ;;  %v2174_v4 = vmul.f32 1.442695, %v4730_v45  ;;  %2224 = vadd.xlane.f32.xlu0 %v3136_v18  ;;  %v3138_v21 = vpop.eup %3137 }
 0x428   :  { %3145 = vpow2.f32 %v2174_v4 }
 0x429   :  { %2226 = vadd.xlane.f32.xlu1 %v3138_v21 }
 0x42c   :  { %v3140_v35 = vpop.eup %3139 }
 0x42d   :  { %2232 = vadd.xlane.f32.xlu0 %v3140_v35 }
 0x42e   :  { %v3142_v24 = vpop.eup %3141 }
 0x42f   :  { %2234 = vadd.xlane.f32.xlu1 %v3142_v24 }
 0x430   :  { %v3144_v17 = vpop.eup %3143 }
 0x431   :  { %2236 = vadd.xlane.f32.xlu0 %v3144_v17 }
 0x432   :  { %v3146_v61 = vpop.eup %3145 }
 0x433   :  { %2238 = vadd.xlane.f32.xlu1 %v3146_v61 }
 0x47e   :  { %v2181_v1 = vpop.xlane.xlu0 %2180 }
 0x47f   :  { %3147 = vlog2.f32 %v2181_v1 }
 0x482   :  { %v2183_v3 = vpop.xlane.xlu1 %2182  ;;  %v2177_v47 = vpop.xlane.xlu0 %2176 }
 0x483   :  { %3149 = vlog2.f32 %v2183_v3 }
 0x484   :  { %3151 = vlog2.f32 %v2177_v47 }
 0x486   :  { %v2179_v59 = vpop.xlane.xlu1 %2178 }
 0x487   :  { %3153 = vlog2.f32 %v2179_v59  ;;  %v2189_v37 = vpop.xlane.xlu0 %2188 }
 0x488   :  { %3155 = vlog2.f32 %v2189_v37 }
 0x489   :  { %v3148_v22 = vpop.eup %3147 }
 0x48a   :  { %v2245_v12 = vmul.f32 0.6931472, %v3148_v22  ;;  %v2191_v31 = vpop.xlane.xlu1 %2190 }
 0x48b   :  { %3157 = vlog2.f32 %v2191_v31  ;;  %v2185_v34 = vpop.xlane.xlu0 %2184 }
 0x48c   :  { %v2306_v7 = vsub.f32 %v4606_v13, %v2245_v12  ;;  %3159 = vlog2.f32 %v2185_v34 }
 0x48d   :  { %v3150_v48 = vpop.eup %3149 }
 0x48e   :  { %v3152_v43 = vpop.eup %3151  ;;  %2338 = vst [vmem:[#allocation2 + $0x10] sm:$0xff] %v2306_v7  ;;  %v2247_v57 = vmul.f32 0.6931472, %v3150_v48  ;;  %v2187_v33 = vpop.xlane.xlu1 %2186 }
 0x48f   :  { %v2241_v10 = vmul.f32 0.6931472, %v3152_v43  ;;  %3161 = vlog2.f32 %v2187_v33  ;;  %v2197_v42 = vpop.xlane.xlu0 %2196 }
 0x490   :  { %v2307_v56 = vsub.f32 %v4614_v58, %v2247_v57  ;;  %3163 = vlog2.f32 %v2197_v42 }
 0x491   :  { %v3154_v14 = vpop.eup %3153  ;;  %v2304_v39 = vsub.f32 %v4609_v50, %v2241_v10 }
 0x492   :  { %v3156_v26 = vpop.eup %3155  ;;  %2339 = vst [vmem:[#allocation2 + $0x18] sm:$0xff] %v2307_v56  ;;  %v2243_v11 = vmul.f32 0.6931472, %v3154_v14  ;;  %v2199_v19 = vpop.xlane.xlu1 %2198 }
 0x493   :  { %2336 = vst [vmem:[#allocation2] sm:$0xff] %v2304_v39  ;;  %v2253_v13 = vmul.f32 0.6931472, %v3156_v26  ;;  %3165 = vlog2.f32 %v2199_v19  ;;  %v2193_v28 = vpop.xlane.xlu0 %2192 }
 0x494   :  { %v2305_v38 = vsub.f32 %v4617_v52, %v2243_v11  ;;  %3167 = vlog2.f32 %v2193_v28 }
 0x495   :  { %v3158_v2 = vpop.eup %3157  ;;  %v2310_v18 = vsub.f32 %v4622_v25, %v2253_v13 }
 0x496   :  { %v3160_v4 = vpop.eup %3159  ;;  %2337 = vst [vmem:[#allocation2 + $0x8] sm:$0xff] %v2305_v38  ;;  %v2255_v58 = vmul.f32 0.6931472, %v3158_v2  ;;  %v2195_v21 = vpop.xlane.xlu1 %2194 }
 0x497   :  { %2342 = vst [vmem:[#allocation2 + $0x30] sm:$0xff] %v2310_v18  ;;  %v2249_v50 = vmul.f32 0.6931472, %v3160_v4  ;;  %3169 = vlog2.f32 %v2195_v21  ;;  %v2205_v35 = vpop.xlane.xlu0 %2204 }
 0x498   :  { %v2311_v24 = vsub.f32 %v4625_v6, %v2255_v58  ;;  %3171 = vlog2.f32 %v2205_v35 }
 0x499   :  { %v3162_v17 = vpop.eup %3161  ;;  %v2308_v61 = vsub.f32 %v4630_v9, %v2249_v50 }
 0x49a   :  { %v3164_v1 = vpop.eup %3163  ;;  %2343 = vst [vmem:[#allocation2 + $0x38] sm:$0xff] %v2311_v24  ;;  %v2251_v52 = vmul.f32 0.6931472, %v3162_v17  ;;  %v2207_v3 = vpop.xlane.xlu1 %2206 }
 0x49b   :  { %2340 = vst [vmem:[#allocation2 + $0x20] sm:$0xff] %v2308_v61  ;;  %v2261_v25 = vmul.f32 0.6931472, %v3164_v1  ;;  %3173 = vlog2.f32 %v2207_v3  ;;  %v2201_v47 = vpop.xlane.xlu0 %2200 }
 0x49c   :  { %v2309_v59 = vsub.f32 %v4633_v30, %v2251_v52  ;;  %3175 = vlog2.f32 %v2201_v47 }
 0x49d   :  { %v3166_v37 = vpop.eup %3165  ;;  %v2314_v22 = vsub.f32 %v4638_v29, %v2261_v25 }
 0x49e   :  { %v3168_v12 = vpop.eup %3167  ;;  %2341 = vst [vmem:[#allocation2 + $0x28] sm:$0xff] %v2309_v59  ;;  %v2263_v6 = vmul.f32 0.6931472, %v3166_v37  ;;  %v2203_v31 = vpop.xlane.xlu1 %2202 }
 0x49f   :  { %2346 = vst [vmem:[#allocation2 + $0x50] sm:$0xff] %v2314_v22  ;;  %v2257_v9 = vmul.f32 0.6931472, %v3168_v12  ;;  %3177 = vlog2.f32 %v2203_v31  ;;  %v2213_v34 = vpop.xlane.xlu0 %2212 }
 0x4a0   :  { %v2315_v7 = vsub.f32 %v4641_v36, %v2263_v6  ;;  %3179 = vlog2.f32 %v2213_v34 }
 0x4a1   :  { %v3170_v48 = vpop.eup %3169  ;;  %v2312_v43 = vsub.f32 %v4646_v63, %v2257_v9 }
 0x4a2   :  { %v3172_v57 = vpop.eup %3171  ;;  %2347 = vst [vmem:[#allocation2 + $0x58] sm:$0xff] %v2315_v7  ;;  %v2259_v30 = vmul.f32 0.6931472, %v3170_v48  ;;  %v2215_v33 = vpop.xlane.xlu1 %2214 }
 0x4a3   :  { %2344 = vst [vmem:[#allocation2 + $0x40] sm:$0xff] %v2312_v43  ;;  %v2269_v29 = vmul.f32 0.6931472, %v3172_v57  ;;  %3181 = vlog2.f32 %v2215_v33  ;;  %v2209_v10 = vpop.xlane.xlu0 %2208 }
 0x4a4   :  { %v2313_v42 = vsub.f32 %v4649_v55, %v2259_v30  ;;  %3183 = vlog2.f32 %v2209_v10 }
 0x4a5   :  { %v3174_v56 = vpop.eup %3173  ;;  %v2318_v14 = vsub.f32 %v4654_v62, %v2269_v29 }
 0x4a6   :  { %v3176_v39 = vpop.eup %3175  ;;  %2345 = vst [vmem:[#allocation2 + $0x48] sm:$0xff] %v2313_v42  ;;  %v2271_v36 = vmul.f32 0.6931472, %v3174_v56  ;;  %v2211_v26 = vpop.xlane.xlu1 %2210 }
 0x4a7   :  { %2350 = vst [vmem:[#allocation2 + $0x70] sm:$0xff] %v2318_v14  ;;  %v2265_v63 = vmul.f32 0.6931472, %v3176_v39  ;;  %3185 = vlog2.f32 %v2211_v26  ;;  %v2221_v11 = vpop.xlane.xlu0 %2220 }
 0x4a8   :  { %v2319_v19 = vsub.f32 %v4657_v27, %v2271_v36  ;;  %3187 = vlog2.f32 %v2221_v11 }
 0x4a9   :  { %v3178_v13 = vpop.eup %3177  ;;  %v2316_v28 = vsub.f32 %v4662_v40, %v2265_v63 }
 0x4aa   :  { %v3180_v38 = vpop.eup %3179  ;;  %2351 = vst [vmem:[#allocation2 + $0x78] sm:$0xff] %v2319_v19  ;;  %v2267_v55 = vmul.f32 0.6931472, %v3178_v13  ;;  %v2223_v2 = vpop.xlane.xlu1 %2222 }
 0x4ab   :  { %2348 = vst [vmem:[#allocation2 + $0x60] sm:$0xff] %v2316_v28  ;;  %v2277_v62 = vmul.f32 0.6931472, %v3180_v38  ;;  %3189 = vlog2.f32 %v2223_v2  ;;  %v2217_v18 = vpop.xlane.xlu0 %2216 }
 0x4ac   :  { %v2317_v4 = vsub.f32 %v4665_v8, %v2267_v55  ;;  %3191 = vlog2.f32 %v2217_v18 }
 0x4ad   :  { %v3182_v58 = vpop.eup %3181  ;;  %v2322_v21 = vsub.f32 %v4670_v41, %v2277_v62 }
 0x4ae   :  { %v3184_v50 = vpop.eup %3183  ;;  %2349 = vst [vmem:[#allocation2 + $0x68] sm:$0xff] %v2317_v4  ;;  %v2279_v27 = vmul.f32 0.6931472, %v3182_v58  ;;  %v2219_v35 = vpop.xlane.xlu1 %2218 }
 0x4af   :  { %2354 = vst [vmem:[#allocation2 + $0x90] sm:$0xff] %v2322_v21  ;;  %v2273_v40 = vmul.f32 0.6931472, %v3184_v50  ;;  %3193 = vlog2.f32 %v2219_v35  ;;  %v2229_v24 = vpop.xlane.xlu0 %2228 }
 0x4b0   :  { %v2323_v17 = vsub.f32 %v4673_v0, %v2279_v27  ;;  %3195 = vlog2.f32 %v2229_v24 }
 0x4b1   :  { %v3186_v61 = vpop.eup %3185  ;;  %v2320_v1 = vsub.f32 %v4678_v32, %v2273_v40 }
 0x4b2   :  { %v3188_v52 = vpop.eup %3187  ;;  %2355 = vst [vmem:[#allocation2 + $0x98] sm:$0xff] %v2323_v17  ;;  %v2275_v8 = vmul.f32 0.6931472, %v3186_v61  ;;  %v2231_v3 = vpop.xlane.xlu1 %2230 }
 0x4b3   :  { %2352 = vst [vmem:[#allocation2 + $0x80] sm:$0xff] %v2320_v1  ;;  %v2285_v41 = vmul.f32 0.6931472, %v3188_v52  ;;  %3197 = vlog2.f32 %v2231_v3  ;;  %v2225_v25 = vpop.xlane.xlu0 %2224 }
 0x4b4   :  { %v2321_v47 = vsub.f32 %v4681_v49, %v2275_v8  ;;  %3199 = vlog2.f32 %v2225_v25 }
 0x4b5   :  { %v3190_v59 = vpop.eup %3189  ;;  %v2326_v37 = vsub.f32 %v4686_v60, %v2285_v41 }
 0x4b6   :  { %v3192_v22 = vpop.eup %3191  ;;  %2353 = vst [vmem:[#allocation2 + $0x88] sm:$0xff] %v2321_v47  ;;  %v2287_v0 = vmul.f32 0.6931472, %v3190_v59  ;;  %v2227_v12 = vpop.xlane.xlu1 %2226 }
 0x4b7   :  { %2358 = vst [vmem:[#allocation2 + $0xb0] sm:$0xff] %v2326_v37  ;;  %v2281_v32 = vmul.f32 0.6931472, %v3192_v22  ;;  %3201 = vlog2.f32 %v2227_v12 }
 0x4b8   :  { %v2327_v6 = vsub.f32 %v4689_v44, %v2287_v0 }
 0x4b9   :  { %v3194_v31 = vpop.eup %3193  ;;  %v2324_v9 = vsub.f32 %v4694_v46, %v2281_v32 }
 0x4ba   :  { %v3196_v34 = vpop.eup %3195  ;;  %2359 = vst [vmem:[#allocation2 + $0xb8] sm:$0xff] %v2327_v6  ;;  %v2283_v7 = vmul.f32 0.6931472, %v3194_v31  ;;  %v2233_v49 = vpop.xlane.xlu0 %2232 }
 0x4bb   :  { %2356 = vst [vmem:[#allocation2 + $0xa0] sm:$0xff] %v2324_v9  ;;  %v2293_v48 = vmul.f32 0.6931472, %v3196_v34  ;;  %3203 = vlog2.f32 %v2233_v49 }
 0x4bc   :  { %v2325_v60 = vsub.f32 %v4697_v20, %v2283_v7  ;;  %v2235_v43 = vpop.xlane.xlu1 %2234 }
 0x4bd   :  { %v3198_v57 = vpop.eup %3197  ;;  %v2330_v30 = vsub.f32 %v4702_v5, %v2293_v48  ;;  %3205 = vlog2.f32 %v2235_v43 }
 0x4be   :  { %v3200_v33 = vpop.eup %3199  ;;  %2357 = vst [vmem:[#allocation2 + $0xa8] sm:$0xff] %v2325_v60  ;;  %v2295_v44 = vmul.f32 0.6931472, %v3198_v57  ;;  %v2237_v29 = vpop.xlane.xlu0 %2236 }
 0x4bf   :  { %2362 = vst [vmem:[#allocation2 + $0xd0] sm:$0xff] %v2330_v30  ;;  %v2289_v46 = vmul.f32 0.6931472, %v3200_v33  ;;  %3207 = vlog2.f32 %v2237_v29 }
 0x4c0   :  { %v2331_v10 = vsub.f32 %v4705_v15, %v2295_v44  ;;  %v2239_v42 = vpop.xlane.xlu1 %2238 }
 0x4c1   :  { %v3202_v56 = vpop.eup %3201  ;;  %v2328_v14 = vsub.f32 %v4710_v23, %v2289_v46  ;;  %3209 = vlog2.f32 %v2239_v42 }
 0x4c2   :  { %2363 = vst [vmem:[#allocation2 + $0xd8] sm:$0xff] %v2331_v10  ;;  %v2291_v20 = vmul.f32 0.6931472, %v3202_v56 }
 0x4c3   :  { %2360 = vst [vmem:[#allocation2 + $0xc0] sm:$0xff] %v2328_v14 }
 0x4c4   :  { %v2329_v5 = vsub.f32 %v4713_v16, %v2291_v20 }
 0x4c5   :  { %v3204_v39 = vpop.eup %3203 }
 0x4c6   :  { %2361 = vst [vmem:[#allocation2 + $0xc8] sm:$0xff] %v2329_v5  ;;  %v2297_v36 = vmul.f32 0.6931472, %v3204_v39 }
 0x4c7   :  { %v3206_v26 = vpop.eup %3205 }
 0x4c8   :  { %v2332_v63 = vsub.f32 %v4718_v54, %v2297_v36  ;;  %v2299_v11 = vmul.f32 0.6931472, %v3206_v26 }
 0x4c9   :  { %v3208_v19 = vpop.eup %3207 }
 0x4ca   :  { %2364 = vst [vmem:[#allocation2 + $0xe0] sm:$0xff] %v2332_v63  ;;  %v2333_v15 = vsub.f32 %v4722_v53, %v2299_v11  ;;  %v2301_v13 = vmul.f32 0.6931472, %v3208_v19 }
 0x4cb   :  { %v3210_v28 = vpop.eup %3209 }
 0x4cc   :  { %2365 = vst [vmem:[#allocation2 + $0xe8] sm:$0xff] %v2333_v15  ;;  %v2334_v23 = vsub.f32 %v4726_v51, %v2301_v13  ;;  %v2303_v38 = vmul.f32 0.6931472, %v3210_v28 }
 0x4ce   :  { %2366 = vst [vmem:[#allocation2 + $0xf0] sm:$0xff] %v2334_v23  ;;  %v2335_v16 = vsub.f32 %v4730_v45, %v2303_v38 }
 0x4d0   :  { %2367 = vst [vmem:[#allocation2 + $0xf8] sm:$0xff] %v2335_v16 }
 0x4d1   :  { %3222 = shalt.err (!%p3219_p4)
}
 0x4d2   :  { %s3223_s16 = scalar_lea.hbm %s4784_s7, 4096 }
 0x4d3   :  { %p3224_p5 = scmp.ne.s32.totalorder %s4784_s7, %s3223_s16  ;;  %p3227_p6 = scmp.lt.u32.totalorder %s3223_s16, %s4784_s7 }
 0x4d5   :  { %p3229_p7 = pnand %p3227_p6, %p3224_p5 }
 0x4d7   :  { %3232 = shalt.err (!%p3229_p7)
}
 0x4d8   :  { %s3236_s3 = smov 128   ;;  %s3237_s19 = smov 8  }
 0x4d9   :  { %2379 = dma.vmem_to_hbm [thread:$0]  %s2374_s12, 4096, %s4784_s7, [#allocation3], %s3236_s3, %s3236_s3, %s3237_s19  }
 0x4da   :  { %3233 = dma.done.wait [#allocation3], 4096  }
 0x4db   :  { %3234 = vsyncadd [#allocation3], 4294963200 }
 0x4dc   :  { %2383 = vsyncpa [#allocation3], 1 }

</bundles_post_ra>
